<compile_context>
chip_gen: v7x
topology: tpu7x:2x2x1
jax: 0.10.0
libtpu: 0.0.40
codegen_flags: <defaults>
</compile_context>

<pallas_src>
import functools

import jax
import jax.numpy as jnp
from jax.experimental import pallas as pl
from jax.experimental.pallas import tpu as pltpu

_EPS = 1e-5


@functools.lru_cache(maxsize=1)
def _vmem_limit_bytes():
    # ~3/4 of physical VMEM: ~48 MiB on v7x (64 MiB), ~96 MiB on v5e/v6e.
    try:
        cap = int(pltpu.get_tpu_info().vmem_capacity_bytes)
        return (cap * 3) // 4
    except Exception:
        return 48 * 1024 * 1024


def _cparams(semantics):
    return pltpu.CompilerParams(dimension_semantics=semantics,
                                vmem_limit_bytes=_vmem_limit_bytes())


# --------------------------- pass 1: depthwise ----------------------------
def _dw_conv_kernel(x_ref, w_ref, dw_ref, sum_ref, sq_ref, *, taps, ho, wo):
    """Depthwise 3x3 conv for one (image, channel block) + BN1 partial sums.

    x_ref : (P, Hs, Ws, tc)  phase planes (P=1 stride-1 / P=4 stride-2)
    w_ref : (9, tc)          depthwise weights, tap-major (t = ky*3 + kx)
    dw_ref: (Ho, Wo, tc)     depthwise conv output block
    sum_ref / sq_ref: (1, tc) per-grid-step partial sum / sum of squares
    """
    tc = w_ref.shape[-1]
    w = w_ref[...].astype(jnp.float32)

    bands = {}
    acc = None
    for t, (p, ro, co) in enumerate(taps):
        if (p, ro) not in bands:                     # 3 / 6 aligned band loads
            bands[(p, ro)] = x_ref[p, pl.ds(ro, ho), :, :].astype(jnp.float32)
        tap = bands[(p, ro)][:, co:co + wo, :]       # in-register column shift
        term = tap * w[t].reshape(1, 1, tc)
        acc = term if acc is None else acc + term

    dw_ref[...] = acc.astype(dw_ref.dtype)

    # per-step BN1 partial statistics (reduced over the grid in the wrapper)
    sum_ref[...] = jnp.sum(jnp.sum(acc, axis=0), axis=0, keepdims=True)
    sq_ref[...] = jnp.sum(jnp.sum(acc * acc, axis=0), axis=0, keepdims=True)


# ---------------- pass 2: BN1 + ReLU + pointwise matmul -------------------
def _pw_conv_kernel(x_ref, scale_ref, shift_ref, w_ref, y_ref, sum_ref, sq_ref,
                    *, m_total, tile_m, masked, mxu_dtype):
    """x_ref (TM, C) -> y_ref (TM, Cout);  (1, Cout) BN2 partial sums."""
    x = x_ref[...].astype(jnp.float32)
    y1 = jnp.maximum(x * scale_ref[...] + shift_ref[...], 0.0)   # BN1 + ReLU

    if jnp.dtype(mxu_dtype) == jnp.dtype(jnp.float32):
        # opt-in exact path
        y2 = jnp.dot(y1, w_ref[...].astype(jnp.float32),
                     preferred_element_type=jnp.float32)
    else:
        # default: bf16 MXU inputs, f32 accumulate
        y2 = jnp.dot(y1.astype(mxu_dtype), w_ref[...].astype(mxu_dtype),
                     preferred_element_type=jnp.float32)

    y_ref[...] = y2.astype(y_ref.dtype)

    sum_ref[...] = jnp.sum(y2, axis=0, keepdims=True)
    sq_ref[...] = jnp.sum(y2 * y2, axis=0, keepdims=True)

    if masked:   # fallback only: last tile straddles M -> fix its statistics
        i = pl.program_id(0)

        @pl.when(i == pl.num_programs(0) - 1)
        def _():
            row = (i * tile_m
                   + jax.lax.broadcasted_iota(jnp.int32, (tile_m, 1), 0))
            y2m = jnp.where(row < m_total, y2, 0.0)
            sum_ref[...] = jnp.sum(y2m, axis=0, keepdims=True)
            sq_ref[...] = jnp.sum(y2m * y2m, axis=0, keepdims=True)


# --------------------------- pass 3: BN2 + ReLU ---------------------------
def _bn_relu_kernel(y_ref, scale_ref, shift_ref, o_ref):
    y = y_ref[...].astype(jnp.float32)
    o_ref[...] = jnp.maximum(y * scale_ref[...] + shift_ref[...],
                             0.0).astype(o_ref.dtype)


# ------------------------------- helpers ----------------------------------
def _affine_from_sums(s, ss, count, gamma, beta):
    """(sum, sumsq) -> fused BN scale/shift (training-mode, biased variance)."""
    # TODO(synk): E[x^2]-E[x]^2 in f32 loses precision for very large M; use a
    # shifted / two-pass formulation if feature maps grow to 1e6+ elements.
    mean = s / count
    var = jnp.maximum(ss / count - mean * mean, 0.0)
    inv = jax.lax.rsqrt(var + _EPS)
    scale = gamma.reshape(1, -1).astype(jnp.float32) * inv
    shift = beta.reshape(1, -1).astype(jnp.float32) - mean * scale
    return scale, shift


def _pick_tile_m(m, max_tile):
    """Largest divisor of m that is <= max_tile and (multiple of 8 or == m)."""
    best = None
    d = 1
    while d * d <= m:
        if m % d == 0:
            for cand in (d, m // d):
                if cand <= max_tile and (cand % 8 == 0 or cand == m):
                    if best is None or cand > best:
                        best = cand
        d += 1
    return best


def _pick_tile_c(c):
    if c % 256 == 0 and c >= 512:
        return 256
    if c % 128 == 0 and c >= 256:
        return 128
    return c
    # TODO(synk): for small C (32/64) fold a factor of Wo into the lane dim to
    # avoid masked stores; only worth it if early MobileNet layers dominate.


# ------------------------------- wrapper ----------------------------------
def depthwise_separable_block(x_nchw, conv1_w, g1, b1, conv2_w, g2, b2,
                              down_sample=False, compute_dtype=jnp.bfloat16,
                              max_tile_m=1024):
    """Pallas DepthwiseSeperableBlock.forward (NCHW in / NCHW out).

    conv1_w: (C, 1, 3, 3) depthwise weights;  conv2_w: (Cout, C, 1, 1)
    g1,b1: (C,) BN1 affine;  g2,b2: (Cout,) BN2 affine.
    compute_dtype: MXU-input & intermediate-storage dtype (bf16 by default;
                   pass jnp.float32 for the exact / 1e-4 path).
    """
    stride = 2 if down_sample else 1
    N, C, H, W = x_nchw.shape
    Cout = conv2_w.shape[0]
    Ho = (H + 2 - 3) // stride + 1
    Wo = (W + 2 - 3) // stride + 1
    M = N * Ho * Wo

    # ---- layout glue (wrapper side, XLA-fused): NCHW -> NHWC, zero pad=1 --
    x = jnp.transpose(x_nchw, (0, 2, 3, 1))
    if stride == 1:
        x_planes = jnp.pad(x, ((0, 0), (1, 1), (1, 1), (0, 0)))[:, None]
        taps = tuple((0, ky, kx) for ky in range(3) for kx in range(3))
    else:
        # De-interleave into 4 even/odd phase planes so the kernel only does
        # contiguous (non-strided) reads:  P[py,px][i, j] = x_pad[2i+py, 2j+px]
        Hp, Wp = H + 2, W + 2
        Hp2, Wp2 = Hp + Hp % 2, Wp + Wp % 2
        xp = jnp.pad(x, ((0, 0), (1, 1 + Hp2 - Hp), (1, 1 + Wp2 - Wp), (0, 0)))
        xp = xp.reshape(N, Hp2 // 2, 2, Wp2 // 2, 2, C)
        x_planes = xp.transpose(0, 2, 4, 1, 3, 5).reshape(
            N, 4, Hp2 // 2, Wp2 // 2, C)
        taps = tuple(((ky % 2) * 2 + (kx % 2), ky // 2, kx // 2)
                     for ky in range(3) for kx in range(3))
    _, P, Hs, Ws, _ = x_planes.shape

    w_dw = conv1_w.reshape(C, 9).T.astype(jnp.float32)            # (9, C)
    w_pw = conv2_w.reshape(Cout, C).T                              # (C, Cout)

    # ---- pass 1: depthwise conv + BN1 partial sums ------------------------
    # Grid over (batch, channel blocks): per-channel conv -> no halo needed,
    # bounded VMEM, real pipeline depth even for N=1, both axes "parallel".
    # TODO(synk): for very large H*W with small C add H-strip (halo) tiling.
    tc = _pick_tile_c(C)
    num_cb = C // tc
    dw_out, sum1, sq1 = pl.pallas_call(
        functools.partial(_dw_conv_kernel, taps=taps, ho=Ho, wo=Wo),
        out_shape=(jax.ShapeDtypeStruct((N, Ho, Wo, C), compute_dtype),
                   jax.ShapeDtypeStruct((N, 1, C), jnp.float32),
                   jax.ShapeDtypeStruct((N, 1, C), jnp.float32)),
        grid=(N, num_cb),
        in_specs=[pl.BlockSpec((None, P, Hs, Ws, tc),
                               lambda n, cb: (n, 0, 0, 0, cb)),
                  pl.BlockSpec((9, tc), lambda n, cb: (0, cb))],
        out_specs=(pl.BlockSpec((None, Ho, Wo, tc),
                                lambda n, cb: (n, 0, 0, cb)),
                   pl.BlockSpec((None, 1, tc), lambda n, cb: (n, 0, cb)),
                   pl.BlockSpec((None, 1, tc), lambda n, cb: (n, 0, cb))),
        compiler_params=_cparams(("parallel", "parallel")),
    )(x_planes, w_dw)

    scale1, shift1 = _affine_from_sums(jnp.sum(sum1, axis=0),
                                       jnp.sum(sq1, axis=0),
                                       jnp.float32(M), g1, b1)

    # ---- pass 2: BN1+ReLU + pointwise matmul (MXU) + BN2 partial sums -----
    tile_m = _pick_tile_m(M, max_tile_m)
    masked = tile_m is None
    if masked:                       # fallback: no good divisor of M
        tile_m = min(max_tile_m, ((M + 7) // 8) * 8)
    num_m = pl.cdiv(M, tile_m)
    dw_flat = dw_out.reshape(M, C)   # row-major reshape, no pad / extra copy

    y2, sum2, sq2 = pl.pallas_call(
        functools.partial(_pw_conv_kernel, m_total=M, tile_m=tile_m,
                          masked=masked, mxu_dtype=compute_dtype),
        out_shape=(jax.ShapeDtypeStruct((M, Cout), compute_dtype),
                   jax.ShapeDtypeStruct((num_m, 1, Cout), jnp.float32),
                   jax.ShapeDtypeStruct((num_m, 1, Cout), jnp.float32)),
        grid=(num_m,),
        in_specs=[pl.BlockSpec((tile_m, C), lambda i: (i, 0)),
                  pl.BlockSpec((1, C), lambda i: (0, 0)),
                  pl.BlockSpec((1, C), lambda i: (0, 0)),
                  pl.BlockSpec((C, Cout), lambda i: (0, 0))],
        out_specs=(pl.BlockSpec((tile_m, Cout), lambda i: (i, 0)),
                   pl.BlockSpec((None, 1, Cout), lambda i: (i, 0, 0)),
                   pl.BlockSpec((None, 1, Cout), lambda i: (i, 0, 0))),
        compiler_params=_cparams(("parallel",)),
    )(dw_flat, scale1, shift1, w_pw)

    scale2, shift2 = _affine_from_sums(jnp.sum(sum2, axis=0),
                                       jnp.sum(sq2, axis=0),
                                       jnp.float32(M), g2, b2)

    # ---- pass 3: BN2 + ReLU ------------------------------------------------
    # TODO(synk): in a full MobileNet this pass should be fused into the next
    # block's pass 1 (and emit NHWC directly) instead of a standalone pass.
    out_flat = pl.pallas_call(
        _bn_relu_kernel,
        out_shape=jax.ShapeDtypeStruct((M, Cout), x_nchw.dtype),
        grid=(num_m,),
        in_specs=[pl.BlockSpec((tile_m, Cout), lambda i: (i, 0)),
                  pl.BlockSpec((1, Cout), lambda i: (0, 0)),
                  pl.BlockSpec((1, Cout), lambda i: (0, 0))],
        out_specs=pl.BlockSpec((tile_m, Cout), lambda i: (i, 0)),
        compiler_params=_cparams(("parallel",)),
    )(y2, scale2, shift2)

    out = out_flat.reshape(N, Ho, Wo, Cout)
    return jnp.transpose(out, (0, 3, 1, 2))              # NHWC -> NCHW


# --------------------------- pure-JAX reference ---------------------------
def _reference_block(x_nchw, conv1_w, g1, b1, conv2_w, g2, b2,
                     down_sample=False):
    stride = 2 if down_sample else 1
    C = x_nchw.shape[1]
    hi = jax.lax.Precision.HIGHEST

    def bn(y, g, b):
        mean = jnp.mean(y, axis=(0, 2, 3), keepdims=True)
        var = jnp.mean((y - mean) ** 2, axis=(0, 2, 3), keepdims=True)
        return ((y - mean) * jax.lax.rsqrt(var + _EPS)
                * g.reshape(1, -1, 1, 1) + b.reshape(1, -1, 1, 1))

    y = jax.lax.conv_general_dilated(
        x_nchw, conv1_w, window_strides=(stride, stride),
        padding=((1, 1), (1, 1)),
        dimension_numbers=("NCHW", "OIHW", "NCHW"),
        feature_group_count=C, precision=hi)
    y = jnp.maximum(bn(y, g1, b1), 0.0)
    y = jax.lax.conv_general_dilated(
        y, conv2_w, window_strides=(1, 1), padding=((0, 0), (0, 0)),
        dimension_numbers=("NCHW", "OIHW", "NCHW"), precision=hi)
    y = jnp.maximum(bn(y, g2, b2), 0.0)
    return y


if __name__ == "__main__":
    key = jax.random.PRNGKey(0)
    N, C, H, W = 2, 4, 16, 16
    Cout = 8

    k_x, k_w1, k_w2 = jax.random.split(key, 3)
    x = jax.random.normal(k_x, (N, C, H, W), dtype=jnp.float32)
    conv1_w = 0.1 * jax.random.normal(k_w1, (C, 1, 3, 3), dtype=jnp.float32)
    conv2_w = 0.1 * jax.random.normal(k_w2, (Cout, C, 1, 1), dtype=jnp.float32)
    g1 = jnp.ones((C,), jnp.float32)      # BatchNorm2d default affine
    b1 = jnp.zeros((C,), jnp.float32)
    g2 = jnp.ones((Cout,), jnp.float32)
    b2 = jnp.zeros((Cout,), jnp.float32)

    configs = [
        (False, jnp.float32, 1e-4),    # exact path, stride 1
        (False, jnp.bfloat16, 5e-2),   # default bf16-MXU path, stride 1
        (True, jnp.float32, 1e-4),     # exact path, stride 2 (down_sample)
    ]
    for down_sample, cdt, tol in configs:
        ref = jax.block_until_ready(_reference_block(
            x, conv1_w, g1, b1, conv2_w, g2, b2, down_sample=down_sample))
        out = jax.block_until_ready(depthwise_separable_block(
            x, conv1_w, g1, b1, conv2_w, g2, b2, down_sample=down_sample,
            compute_dtype=cdt))
        assert out.shape == ref.shape, (out.shape, ref.shape)
        max_err = float(jnp.max(jnp.abs(out - ref)))
        assert jnp.allclose(out, ref, atol=tol, rtol=tol), \
            (down_sample, str(cdt), max_err)
    print("KERNEL_OK")
</pallas_src>

<mosaic_0001>
module attributes {stable_mosaic.version = 11 : i64} {
  func.func @_dw_conv_kernel(%arg0: i32, %arg1: i32, %arg2: memref<1x1x18x18x4xf32, #tpu.memory_space<vmem>>, %arg3: memref<9x4xf32, #tpu.memory_space<vmem>>, %arg4: memref<1x16x16x4xf32, #tpu.memory_space<vmem>>, %arg5: memref<1x1x4xf32, #tpu.memory_space<vmem>>, %arg6: memref<1x1x4xf32, #tpu.memory_space<vmem>>) attributes {dimension_semantics = [#tpu.dimension_semantics<parallel>, #tpu.dimension_semantics<parallel>], iteration_bounds = array<i64: 2, 1>, scalar_prefetch = 0 : i64, scratch_operands = 0 : i64, tpu.core_type = #tpu.core_type<tc>, window_params = [{transform_indices = @transform_0, window_bounds = array<i64: 1, 1, 18, 18, 4>}, {transform_indices = @transform_1, window_bounds = array<i64: 9, 4>}, {transform_indices = @transform_2, window_bounds = array<i64: 1, 16, 16, 4>}, {transform_indices = @transform_3, window_bounds = array<i64: 1, 1, 4>}, {transform_indices = @transform_4, window_bounds = array<i64: 1, 1, 4>}]} {
    %c0 = arith.constant 0 : index
    %c0_0 = arith.constant 0 : index
    %0 = vector.load %arg3[%c0, %c0_0] : memref<9x4xf32, #tpu.memory_space<vmem>>, vector<9x4xf32>
    %c0_1 = arith.constant 0 : index
    %c0_2 = arith.constant 0 : index
    %c0_3 = arith.constant 0 : index
    %c0_4 = arith.constant 0 : index
    %c0_5 = arith.constant 0 : index
    %1 = vector.load %arg2[%c0_1, %c0_2, %c0_3, %c0_4, %c0_5] : memref<1x1x18x18x4xf32, #tpu.memory_space<vmem>>, vector<1x1x16x18x4xf32>
    %2 = vector.shape_cast %1 : vector<1x1x16x18x4xf32> to vector<16x18x4xf32>
    %3 = vector.extract_strided_slice %2 {offsets = [0, 0, 0], sizes = [16, 16, 4], strides = [1, 1, 1]} : vector<16x18x4xf32> to vector<16x16x4xf32>
    %4 = vector.extract_strided_slice %0 {offsets = [0, 0], sizes = [1, 4], strides = [1, 1]} : vector<9x4xf32> to vector<1x4xf32>
    %5 = vector.shape_cast %4 : vector<1x4xf32> to vector<4xf32>
    %6 = vector.shape_cast %5 : vector<4xf32> to vector<1x1x4xf32>
    %7 = vector.broadcast %6 : vector<1x1x4xf32> to vector<16x16x4xf32>
    %8 = arith.mulf %3, %7 : vector<16x16x4xf32>
    %9 = vector.extract_strided_slice %2 {offsets = [0, 1, 0], sizes = [16, 16, 4], strides = [1, 1, 1]} : vector<16x18x4xf32> to vector<16x16x4xf32>
    %10 = vector.extract_strided_slice %0 {offsets = [1, 0], sizes = [1, 4], strides = [1, 1]} : vector<9x4xf32> to vector<1x4xf32>
    %11 = vector.shape_cast %10 : vector<1x4xf32> to vector<4xf32>
    %12 = vector.shape_cast %11 : vector<4xf32> to vector<1x1x4xf32>
    %13 = vector.broadcast %12 : vector<1x1x4xf32> to vector<16x16x4xf32>
    %14 = arith.mulf %9, %13 : vector<16x16x4xf32>
    %15 = arith.addf %8, %14 : vector<16x16x4xf32>
    %16 = vector.extract_strided_slice %2 {offsets = [0, 2, 0], sizes = [16, 16, 4], strides = [1, 1, 1]} : vector<16x18x4xf32> to vector<16x16x4xf32>
    %17 = vector.extract_strided_slice %0 {offsets = [2, 0], sizes = [1, 4], strides = [1, 1]} : vector<9x4xf32> to vector<1x4xf32>
    %18 = vector.shape_cast %17 : vector<1x4xf32> to vector<4xf32>
    %19 = vector.shape_cast %18 : vector<4xf32> to vector<1x1x4xf32>
    %20 = vector.broadcast %19 : vector<1x1x4xf32> to vector<16x16x4xf32>
    %21 = arith.mulf %16, %20 : vector<16x16x4xf32>
    %22 = arith.addf %15, %21 : vector<16x16x4xf32>
    %c0_6 = arith.constant 0 : index
    %c0_7 = arith.constant 0 : index
    %c1 = arith.constant 1 : index
    %c0_8 = arith.constant 0 : index
    %c0_9 = arith.constant 0 : index
    %23 = vector.load %arg2[%c0_6, %c0_7, %c1, %c0_8, %c0_9] : memref<1x1x18x18x4xf32, #tpu.memory_space<vmem>>, vector<1x1x16x18x4xf32>
    %24 = vector.shape_cast %23 : vector<1x1x16x18x4xf32> to vector<16x18x4xf32>
    %25 = vector.extract_strided_slice %24 {offsets = [0, 0, 0], sizes = [16, 16, 4], strides = [1, 1, 1]} : vector<16x18x4xf32> to vector<16x16x4xf32>
    %26 = vector.extract_strided_slice %0 {offsets = [3, 0], sizes = [1, 4], strides = [1, 1]} : vector<9x4xf32> to vector<1x4xf32>
    %27 = vector.shape_cast %26 : vector<1x4xf32> to vector<4xf32>
    %28 = vector.shape_cast %27 : vector<4xf32> to vector<1x1x4xf32>
    %29 = vector.broadcast %28 : vector<1x1x4xf32> to vector<16x16x4xf32>
    %30 = arith.mulf %25, %29 : vector<16x16x4xf32>
    %31 = arith.addf %22, %30 : vector<16x16x4xf32>
    %32 = vector.extract_strided_slice %24 {offsets = [0, 1, 0], sizes = [16, 16, 4], strides = [1, 1, 1]} : vector<16x18x4xf32> to vector<16x16x4xf32>
    %33 = vector.extract_strided_slice %0 {offsets = [4, 0], sizes = [1, 4], strides = [1, 1]} : vector<9x4xf32> to vector<1x4xf32>
    %34 = vector.shape_cast %33 : vector<1x4xf32> to vector<4xf32>
    %35 = vector.shape_cast %34 : vector<4xf32> to vector<1x1x4xf32>
    %36 = vector.broadcast %35 : vector<1x1x4xf32> to vector<16x16x4xf32>
    %37 = arith.mulf %32, %36 : vector<16x16x4xf32>
    %38 = arith.addf %31, %37 : vector<16x16x4xf32>
    %39 = vector.extract_strided_slice %24 {offsets = [0, 2, 0], sizes = [16, 16, 4], strides = [1, 1, 1]} : vector<16x18x4xf32> to vector<16x16x4xf32>
    %40 = vector.extract_strided_slice %0 {offsets = [5, 0], sizes = [1, 4], strides = [1, 1]} : vector<9x4xf32> to vector<1x4xf32>
    %41 = vector.shape_cast %40 : vector<1x4xf32> to vector<4xf32>
    %42 = vector.shape_cast %41 : vector<4xf32> to vector<1x1x4xf32>
    %43 = vector.broadcast %42 : vector<1x1x4xf32> to vector<16x16x4xf32>
    %44 = arith.mulf %39, %43 : vector<16x16x4xf32>
    %45 = arith.addf %38, %44 : vector<16x16x4xf32>
    %c0_10 = arith.constant 0 : index
    %c0_11 = arith.constant 0 : index
    %c2 = arith.constant 2 : index
    %c0_12 = arith.constant 0 : index
    %c0_13 = arith.constant 0 : index
    %46 = vector.load %arg2[%c0_10, %c0_11, %c2, %c0_12, %c0_13] : memref<1x1x18x18x4xf32, #tpu.memory_space<vmem>>, vector<1x1x16x18x4xf32>
    %47 = vector.shape_cast %46 : vector<1x1x16x18x4xf32> to vector<16x18x4xf32>
    %48 = vector.extract_strided_slice %47 {offsets = [0, 0, 0], sizes = [16, 16, 4], strides = [1, 1, 1]} : vector<16x18x4xf32> to vector<16x16x4xf32>
    %49 = vector.extract_strided_slice %0 {offsets = [6, 0], sizes = [1, 4], strides = [1, 1]} : vector<9x4xf32> to vector<1x4xf32>
    %50 = vector.shape_cast %49 : vector<1x4xf32> to vector<4xf32>
    %51 = vector.shape_cast %50 : vector<4xf32> to vector<1x1x4xf32>
    %52 = vector.broadcast %51 : vector<1x1x4xf32> to vector<16x16x4xf32>
    %53 = arith.mulf %48, %52 : vector<16x16x4xf32>
    %54 = arith.addf %45, %53 : vector<16x16x4xf32>
    %55 = vector.extract_strided_slice %47 {offsets = [0, 1, 0], sizes = [16, 16, 4], strides = [1, 1, 1]} : vector<16x18x4xf32> to vector<16x16x4xf32>
    %56 = vector.extract_strided_slice %0 {offsets = [7, 0], sizes = [1, 4], strides = [1, 1]} : vector<9x4xf32> to vector<1x4xf32>
    %57 = vector.shape_cast %56 : vector<1x4xf32> to vector<4xf32>
    %58 = vector.shape_cast %57 : vector<4xf32> to vector<1x1x4xf32>
    %59 = vector.broadcast %58 : vector<1x1x4xf32> to vector<16x16x4xf32>
    %60 = arith.mulf %55, %59 : vector<16x16x4xf32>
    %61 = arith.addf %54, %60 : vector<16x16x4xf32>
    %62 = vector.extract_strided_slice %47 {offsets = [0, 2, 0], sizes = [16, 16, 4], strides = [1, 1, 1]} : vector<16x18x4xf32> to vector<16x16x4xf32>
    %63 = vector.extract_strided_slice %0 {offsets = [8, 0], sizes = [1, 4], strides = [1, 1]} : vector<9x4xf32> to vector<1x4xf32>
    %64 = vector.shape_cast %63 : vector<1x4xf32> to vector<4xf32>
    %65 = vector.shape_cast %64 : vector<4xf32> to vector<1x1x4xf32>
    %66 = vector.broadcast %65 : vector<1x1x4xf32> to vector<16x16x4xf32>
    %67 = arith.mulf %62, %66 : vector<16x16x4xf32>
    %68 = arith.addf %61, %67 : vector<16x16x4xf32>
    %c0_14 = arith.constant 0 : index
    %c0_15 = arith.constant 0 : index
    %c0_16 = arith.constant 0 : index
    %c0_17 = arith.constant 0 : index
    %69 = vector.load %arg4[%c0_14, %c0_15, %c0_16, %c0_17] : memref<1x16x16x4xf32, #tpu.memory_space<vmem>>, vector<1x16x16x4xf32>
    %70 = vector.shape_cast %69 : vector<1x16x16x4xf32> to vector<16x16x4xf32>
    %71 = vector.shape_cast %68 : vector<16x16x4xf32> to vector<1x16x16x4xf32>
    tpu.vector_store %arg4[%c0_14, %c0_15, %c0_16, %c0_17], %71 {strides = array<i32>} : memref<1x16x16x4xf32, #tpu.memory_space<vmem>>, vector<1x16x16x4xf32>,
    %cst = arith.constant dense<0.000000e+00> : vector<16x4xf32>
    %72 = vector.multi_reduction <add>, %68, %cst [0] : vector<16x16x4xf32> to vector<16x4xf32>
    %cst_18 = arith.constant dense<0.000000e+00> : vector<4xf32>
    %73 = vector.multi_reduction <add>, %72, %cst_18 [0] : vector<16x4xf32> to vector<4xf32>
    %74 = vector.shape_cast %73 : vector<4xf32> to vector<1x4xf32>
    %c0_19 = arith.constant 0 : index
    %c0_20 = arith.constant 0 : index
    %c0_21 = arith.constant 0 : index
    %75 = vector.load %arg5[%c0_19, %c0_20, %c0_21] : memref<1x1x4xf32, #tpu.memory_space<vmem>>, vector<1x1x4xf32>
    %76 = vector.shape_cast %75 : vector<1x1x4xf32> to vector<1x4xf32>
    %77 = vector.shape_cast %74 : vector<1x4xf32> to vector<1x1x4xf32>
    tpu.vector_store %arg5[%c0_19, %c0_20, %c0_21], %77 {strides = array<i32>} : memref<1x1x4xf32, #tpu.memory_space<vmem>>, vector<1x1x4xf32>,
    %78 = arith.mulf %68, %68 : vector<16x16x4xf32>
    %cst_22 = arith.constant dense<0.000000e+00> : vector<16x4xf32>
    %79 = vector.multi_reduction <add>, %78, %cst_22 [0] : vector<16x16x4xf32> to vector<16x4xf32>
    %cst_23 = arith.constant dense<0.000000e+00> : vector<4xf32>
    %80 = vector.multi_reduction <add>, %79, %cst_23 [0] : vector<16x4xf32> to vector<4xf32>
    %81 = vector.shape_cast %80 : vector<4xf32> to vector<1x4xf32>
    %c0_24 = arith.constant 0 : index
    %c0_25 = arith.constant 0 : index
    %c0_26 = arith.constant 0 : index
    %82 = vector.load %arg6[%c0_24, %c0_25, %c0_26] : memref<1x1x4xf32, #tpu.memory_space<vmem>>, vector<1x1x4xf32>
    %83 = vector.shape_cast %82 : vector<1x1x4xf32> to vector<1x4xf32>
    %84 = vector.shape_cast %81 : vector<1x4xf32> to vector<1x1x4xf32>
    tpu.vector_store %arg6[%c0_24, %c0_25, %c0_26], %84 {strides = array<i32>} : memref<1x1x4xf32, #tpu.memory_space<vmem>>, vector<1x1x4xf32>,
    return
  }
  func.func @transform_0(%arg0: i32, %arg1: i32) -> (i32, i32, i32, i32, i32) {
    %c0_i32 = arith.constant 0 : i32
    %c0_i32_0 = arith.constant 0 : i32
    %c0_i32_1 = arith.constant 0 : i32
    %c0_i32_2 = arith.constant 0 : i32
    return %arg0, %c0_i32, %c0_i32_0, %c0_i32_1, %arg1 : i32, i32, i32, i32, i32
  }
  func.func @transform_1(%arg0: i32, %arg1: i32) -> (i32, i32) {
    %c0_i32 = arith.constant 0 : i32
    %c0_i32_0 = arith.constant 0 : i32
    return %c0_i32, %arg1 : i32, i32
  }
  func.func @transform_2(%arg0: i32, %arg1: i32) -> (i32, i32, i32, i32) {
    %c0_i32 = arith.constant 0 : i32
    %c0_i32_0 = arith.constant 0 : i32
    %c0_i32_1 = arith.constant 0 : i32
    return %arg0, %c0_i32, %c0_i32_0, %arg1 : i32, i32, i32, i32
  }
  func.func @transform_3(%arg0: i32, %arg1: i32) -> (i32, i32, i32) {
    %c0_i32 = arith.constant 0 : i32
    %c0_i32_0 = arith.constant 0 : i32
    return %arg0, %c0_i32, %arg1 : i32, i32, i32
  }
  func.func @transform_4(%arg0: i32, %arg1: i32) -> (i32, i32, i32) {
    %c0_i32 = arith.constant 0 : i32
    %c0_i32_0 = arith.constant 0 : i32
    return %arg0, %c0_i32, %arg1 : i32, i32, i32
  }
}

</mosaic_0001>

<bundles_post_ra>
// kernel: tpu_custom_call.1
= control target key start
LH: loop header
LB: loop body
LE: loop exit
PB: predicated region body
PF: predicated region fallthrough
CT: control target
= control target key end

     0   :  { %10 = vsyncpa [#allocation3], 0  ;;  %s6386_s0 = inlined_call_operand.vmem [shape: f32[2,1,18,18,4], index: 0, kind: input, shape index: {}]   ;;  %s6387_s1 = inlined_call_operand.vmem [shape: f32[9,4], index: 1, kind: input, shape index: {}]   ;;  %s6388_s2 = inlined_call_operand.vmem [shape: f32[2,16,16,4], index: 2, kind: output, shape index: {0}]   ;;  %s6389_s3 = inlined_call_operand.hbm [shape: f32[2,1,4], index: 3, kind: output, shape index: {1}]   ;;  %s6390_s4 = inlined_call_operand.hbm [shape: f32[2,1,4], index: 4, kind: output, shape index: {2}]  }
   0x1   :  { %12 = vsyncpa [#allocation3 + $0x1], 0 }
   0x2   :  { %13 = vsyncpa [#allocation5], 0 }
   0x3   :  { %15 = vsyncpa [#allocation5 + $0x1], 0  ;;  %s2802_s15 = smov 0   ;;  %s2804_s16 = smov 0  }
   0x4   :  { %s2806_s17 = smov 0   ;;  %s2808_s18 = smov 0  }
   0x5   :  { %s2810_s19 = smov 0   ;;  %s2812_s20 = smov 0  }
   0x6 LB: > { %s2458_s21 = sadd.s32 4294967295, %s2773_s20   ;;  %s2459_s22 = sadd.s32 4294967294, %s2773_s20   ;;  %s2773_s20 = sphi %s2812_s20, %s21_s20   ;;  %s2769_s19 = sphi %s2810_s19, %s7286_s19   ;;  %s2765_s18 = sphi %s2808_s18, %s7285_s18   ;;  %s2761_s17 = sphi %s2806_s17, %s7284_s17   ;;  %s2757_s16 = sphi %s2804_s16, %s7283_s16   ;;  %s2753_s15 = sphi %s2802_s15, %s7282_s15  }
   0x7   : > { %s33_s23 = sadd.s32 1, %s2769_s19  ;;  %s124_s24 = sadd.s32 1, %s2761_s17 }
   0x8   : > { %p35_p0 = scmp.ge.s32.totalorder %s33_s23, 2  ;;  %p134_p1 = scmp.ne.s32.totalorder %s2761_s17, %s2757_s16 }
   0x9   : > { %p135_p2 = scmp.eq.s32.totalorder %s2458_s21, 1  ;;  %p140_p3 = scmp.ne.s32.totalorder %s2757_s16, %s2753_s15 }
   0xa   : > { %s7288_s23 = smov (%p35_p0, %s33_s23), 0  ;;  %p141_p5 = scmp.eq.s32.totalorder %s2459_s22, 1 }
   0xb   : > { %p2842_p4 = por %p135_p2, %p134_p1  ;;  %s119_s26 = ssub.s32 %s2769_s19, %s7288_s23 }
   0xc   : > { %p2463_p6 = scmp.ge.s32.totalorder %s2773_s20, 1  ;;  %p122_p7 = scmp.eq.s32.totalorder %s119_s26, 0 }
   0xd   : > { %p2849_p8 = por %p141_p5, %p140_p3  ;;  %p205_p9 = scmp.lt.s32.totalorder %s2773_s20, 3 }
   0xe   : > { %s2855_s28 = scalar_select %p122_p7, %s2761_s17, %s124_s24  }
   0xf   : > { %p206_p10 = pnand %p2463_p6, %p205_p9 }
  0x11   : > { %209 = sbr.rel (%p206_p10) target bundleno = 476 (0x1dc), region = 28 }
  0x18   : > { %p249_p11 = scmp.lt.s32.totalorder %s2765_s18, 1  ;;  %v319_v0 = vlaneseq  ;;  %v269_v2 = vld [vmem:[%s6387_s1] sm:$0xff]  ;;  %vm455_vm0 = vcmask 1046528   ;;  %vm700_vm1 = vcmask 1045504   ;;  %vm2055_vm2 = vcmask 31744   ;;  %s6262_s26 = sand.u32 1, %s2757_s16  }
  0x19   : > { %s2564_s5 = sshll.u32 %s2765_s18, 4  ;;  %vm2159_vm3 = vcmask 24576   ;;  %s2775_s11 = smov [#allocation2]  }
  0x1a   : > { %s2859_s29 = scalar_select %p249_p11, %s2765_s18, 1  ;;  %v2861_v1 = vshrl.u32 %v319_v0, 7 }
  0x1b   : > { %s6298_s8 = scalar_lea.hbm %s6389_s3, %s2564_s5  ;;  %s2667_s12 = sshll.u32 %s2775_s11, 4  ;;  %s2668_s12 = int_to_ptr.vmem [resolvable:$false] %s2667_s12 }
  0x1c   : > { %6574 = vst [vmem:[#allocation8_spill] sm:$0xff] %v2861_v1  ;;  %s2569_s6 = smul.u32 432, %s2859_s29  ;;  %v321_v3 = vsub.s32 0, %v2861_v1  ;;  %v357_v4 = vsub.s32 1, %v2861_v1  ;;  %v602_v5 = vsub.s32 2, %v2861_v1  ;;  %v896_v6 = vsub.s32 3, %v2861_v1 }
  0x1d   : > { %v964_v7 = vsub.s32 4, %v2861_v1  ;;  %s2568_s14 = sshll.u32 %s2859_s29, 8  ;;  %s242_s29 = scalar_lea.vmem [#allocation2], %s6262_s26 }
  0x1e   : > { %s2875_s9 = scalar_lea.vmem %s6386_s0, %s2569_s6  ;;  %v2877_v8 = vrot.slane %v269_v2, %v321_v3  ;;  %v2879_v9 = vrot.slane %v269_v2, %v357_v4  ;;  %v2890_v13 = vrot.slane %v269_v2, %v602_v5  ;;  %v2892_v14 = vrot.slane %v269_v2, %v896_v6  ;;  %s6014_s24 = scalar_lea.vmem %s6388_s2, %s2568_s14 }
  0x1f   : > { %v2882_v10 = vld [vmem:[%s2875_s9] sm:$0xff]  ;;  %v2885_v11 = vld [vmem:[%s2875_s9 + $0x8] sm:$0xff]  ;;  %v2888_v12 = vld [vmem:[%s2875_s9 + $0x10] sm:$0x3]  ;;  %v2894_v15 = vrot.slane %v269_v2, %v964_v7  ;;  %s2294_s30 = sshll.u32 %s242_s29, 4  ;;  %s2669_s13 = scalar_lea.vmem %s2668_s12, 32  ;;  %s6288_s30 = int_to_ptr.vmem [resolvable:$true] %s2294_s30 }
  0x20   : > { %6575 = vst [vmem:[#allocation9_spill] sm:$0xff] %v2882_v10  ;;  %6576 = vst [vmem:[#allocation10_spill] sm:$0xff] %v2885_v11  ;;  %v2897_v16 = vld [vmem:[%s2875_s9 + $0x18] sm:$0xff]  ;;  %v2900_v17 = vld [vmem:[%s2875_s9 + $0x20] sm:$0xff]  ;;  %v2907_v19 = vmul.f32 %v2877_v8, %v2882_v10  ;;  %v2911_v20 = vmul.f32 %v2877_v8, %v2885_v11  ;;  %v2915_v21 = vmul.f32 %v2879_v9, %v2882_v10  ;;  %s2663_s10 = scalar_lea.vmem %s6288_s30, 16  ;;  %p2670_p1 = scmp.lt.s32.totalorder %s6288_s30, %s2668_s12 }
  0x21   : > { %6577 = vst [vmem:[#allocation11_spill] sm:$0xff] %v2888_v12  ;;  %6578 = vst [vmem:[#allocation12_spill] sm:$0xff] %v2890_v13  ;;  %v2903_v18 = vld [vmem:[%s2875_s9 + $0x28] sm:$0x3]  ;;  %v2919_v22 = vmul.f32 %v2879_v9, %v2885_v11  ;;  %v2922_v23 = vld [vmem:[%s2875_s9 + $0x30] sm:$0xff]  ;;  %v2932_v26 = vmul.f32 %v2877_v8, %v2897_v16  ;;  %v2936_v27 = vmul.f32 %v2877_v8, %v2900_v17  ;;  %p2664_p12 = scmp.ne.s32.totalorder %s6288_s30, %s2663_s10  ;;  %p2671_p2 = scmp.lt.s32.totalorder %s2669_s13, %s2663_s10 }
  0x22   : > { %6579 = vst [vmem:[#allocation13_spill] sm:$0xff] %v2892_v14  ;;  %6580 = vst [vmem:[#allocation14_spill] sm:$0xff] %v2894_v15  ;;  %v2925_v24 = vld [vmem:[%s2875_s9 + $0x38] sm:$0xff]  ;;  %v2928_v25 = vld [vmem:[%s2875_s9 + $0x40] sm:$0x3]  ;;  %v2940_v28 = vmul.f32 %v2879_v9, %v2888_v12  ;;  %v2944_v29 = vmul.f32 %v2879_v9, %v2897_v16  ;;  %v2957_v33 = vmul.f32 %v2877_v8, %v2922_v23 }
  0x23   : > { %6581 = vst [vmem:[#allocation15_spill] sm:$0xff] %v2897_v16  ;;  %6582 = vst [vmem:[#allocation16_spill] sm:$0xff] %v2900_v17  ;;  %v2947_v30 = vld [vmem:[%s2875_s9 + $0x48] sm:$0xff]  ;;  %v2950_v31 = vld [vmem:[%s2875_s9 + $0x50] sm:$0xff]  ;;  %v2961_v34 = vmul.f32 %v2877_v8, %v2925_v24  ;;  %v2965_v35 = vmul.f32 %v2879_v9, %v2900_v17  ;;  %v2969_v36 = vmul.f32 %v2879_v9, %v2903_v18  ;;  %p2665_p13 = pnand %p2664_p12, %p2842_p4  ;;  %p2672_p3 = por %p2671_p2, %p2670_p1 }
  0x24   : > { %6583 = vst [vmem:[#allocation17_spill] sm:$0xff] %v2903_v18  ;;  %6584 = vst [vmem:[#allocation18_spill] sm:$0xff] %v2922_v23  ;;  %v2953_v32 = vld [vmem:[%s2875_s9 + $0x58] sm:$0x3]  ;;  %v2972_v37 = vld [vmem:[%s2875_s9 + $0x60] sm:$0xff]  ;;  %v2979_v39 = vmul.f32 %v2877_v8, %v2947_v30  ;;  %v2983_v40 = vmul.f32 %v2877_v8, %v2950_v31  ;;  %v2987_v41 = vmul.f32 %v2879_v9, %v2922_v23 }
  0x25   : > { %6585 = vst [vmem:[#allocation19_spill] sm:$0xff] %v2925_v24  ;;  %6586 = vst [vmem:[#allocation20_spill] sm:$0xff] %v2928_v25  ;;  %v2975_v38 = vld [vmem:[%s2875_s9 + $0x68] sm:$0xff]  ;;  %v2991_v42 = vmul.f32 %v2879_v9, %v2925_v24  ;;  %v2994_v43 = vld [vmem:[%s2875_s9 + $0x70] sm:$0x3]  ;;  %v3004_v46 = vmul.f32 %v2877_v8, %v2972_v37  ;;  %v3012_v48 = vmul.f32 %v2879_v9, %v2928_v25  ;;  %p2666_p0 = pneg %p2665_p13 }
  0x26   : > { %6587 = vst [vmem:[#allocation21_spill] sm:$0xff] %v2947_v30  ;;  %6588 = vst [vmem:[#allocation22_spill] sm:$0xff] %v2950_v31  ;;  %v2997_v44 = vld [vmem:[%s2875_s9 + $0x78] sm:$0xff]  ;;  %v3000_v45 = vld [vmem:[%s2875_s9 + $0x80] sm:$0xff]  ;;  %v3008_v47 = vmul.f32 %v2877_v8, %v2975_v38  ;;  %v3016_v49 = vmul.f32 %v2879_v9, %v2947_v30  ;;  %v3037_v55 = vmul.f32 %v2879_v9, %v2950_v31 }
  0x27   : > { %6589 = vst [vmem:[#allocation23_spill] sm:$0xff] %v2953_v32  ;;  %6590 = vst [vmem:[#allocation24_spill] sm:$0xff] %v2961_v34  ;;  %v3019_v50 = vld [vmem:[%s2875_s9 + $0x88] sm:$0x3]  ;;  %v3022_v51 = vld [vmem:[%s2875_s9 + $0x90] sm:$0xff]  ;;  %v3029_v53 = vmul.f32 %v2877_v8, %v2997_v44  ;;  %v3033_v54 = vmul.f32 %v2877_v8, %v3000_v45  ;;  %v3041_v56 = vmul.f32 %v2879_v9, %v2953_v32  ;;  %p2673_p5 = pnand %p2672_p3, %p2666_p0 }
  0x28   : > { %6591 = vst [vmem:[#allocation25_spill] sm:$0xff] %v2972_v37  ;;  %6592 = vst [vmem:[#allocation26_spill] sm:$0xff] %v2975_v38  ;;  %v3025_v52 = vld [vmem:[%s2875_s9 + $0x98] sm:$0xff]  ;;  %v3044_v57 = vld [vmem:[%s2875_s9 + $0xa8] sm:$0xff]  ;;  %v3051_v59 = vmul.f32 %v2877_v8, %v3022_v51  ;;  %v3059_v61 = vmul.f32 %v2879_v9, %v2972_v37  ;;  %v3063_v62 = vmul.f32 %v2879_v9, %v2975_v38 }
  0x29   : > { %6593 = vst [vmem:[#allocation27_spill] sm:$0xff] %v2979_v39  ;;  %6594 = vst [vmem:[#allocation28_spill] sm:$0xff] %v2983_v40  ;;  %v3047_v58 = vld [vmem:[%s2875_s9 + $0xb0] sm:$0xff]  ;;  %v3055_v60 = vmul.f32 %v2877_v8, %v3025_v52  ;;  %v3066_v63 = vld [vmem:[%s2875_s9 + $0xa0] sm:$0x3]  ;;  %v3076_v3 = vmul.f32 %v2877_v8, %v3044_v57  ;;  %v3084_v5 = vmul.f32 %v2879_v9, %v2994_v43  ;;  %v462_v40 = vrot.slane %v2965_v35, 1 }
  0x2a   : > { %6595 = vst [vmem:[#allocation29_spill] sm:$0xff] %v2994_v43  ;;  %6596 = vst [vmem:[#allocation30_spill] sm:$0xff] %v2997_v44  ;;  %v3069_v0 = vld [vmem:[%s2875_s9 + $0xc0] sm:$0xff]  ;;  %v3072_v2 = vld [vmem:[%s2875_s9 + $0xc8] sm:$0xff]  ;;  %v3080_v4 = vmul.f32 %v2877_v8, %v3047_v58  ;;  %v3088_v6 = vmul.f32 %v2879_v9, %v2997_v44  ;;  %v3109_v44 = vmul.f32 %v2879_v9, %v3000_v45  ;;  %v466_v39 = vrot.slane %v2987_v41, 1 }
  0x2b   : > { %6597 = vst [vmem:[#allocation31_spill] sm:$0xff] %v3000_v45  ;;  %6598 = vst [vmem:[#allocation32_spill] sm:$0xff] %v3004_v46  ;;  %v3091_v7 = vld [vmem:[%s2875_s9 + $0xb8] sm:$0x3]  ;;  %v3097_v15 = vld [vmem:[%s2875_s9 + $0xe0] sm:$0xff]  ;;  %v3101_v14 = vmul.f32 %v2877_v8, %v3069_v0  ;;  %v3105_v43 = vmul.f32 %v2877_v8, %v3072_v2  ;;  %v3113_v38 = vmul.f32 %v2879_v9, %v3019_v50  ;;  %v459_v46 = vrot.slane %v2940_v28, 1 }
  0x2c   : > { %6599 = vst [vmem:[#allocation33_spill] sm:$0xff] %v3008_v47  ;;  %6600 = vst [vmem:[#allocation34_spill] sm:$0xff] %v3019_v50  ;;  %v3094_v1 = vld [vmem:[%s2875_s9 + $0xd8] sm:$0xff]  ;;  %v3116_v37 = vld [vmem:[%s2875_s9 + $0xf0] sm:$0xff]  ;;  %v3127_v30 = vmul.f32 %v2877_v8, %v3097_v15  ;;  %v3131_v45 = vmul.f32 %v2879_v9, %v3022_v51  ;;  %v3135_v50 = vmul.f32 %v2879_v9, %v3025_v52 }
  0x2d   : > { %6601 = vst [vmem:[#allocation35_spill] sm:$0xff] %v3022_v51  ;;  %6602 = vst [vmem:[#allocation36_spill] sm:$0xff] %v3025_v52  ;;  %v3119_v32 = vld [vmem:[%s2875_s9 + $0xf8] sm:$0xff]  ;;  %v3123_v31 = vmul.f32 %v2877_v8, %v3094_v1  ;;  %v3138_v25 = vld [vmem:[%s2875_s9 + $0xd0] sm:$0x3]  ;;  %v3148_v18 = vmul.f32 %v2877_v8, %v3116_v37  ;;  %v3156_v52 = vmul.f32 %v2879_v9, %v3066_v63 }
  0x2e   : > { %6603 = vst [vmem:[#allocation37_spill] sm:$0xff] %v3029_v53  ;;  %6604 = vst [vmem:[#allocation38_spill] sm:$0xff] %v3033_v54  ;;  %v3141_v24 = vld [vmem:[%s2875_s9 + $0x108] sm:$0xff]  ;;  %v3144_v23 = vld [vmem:[%s2875_s9 + $0x110] sm:$0xff]  ;;  %v3152_v51 = vmul.f32 %v2877_v8, %v3119_v32  ;;  %v3160_v17 = vmul.f32 %v2879_v9, %v3044_v57  ;;  %v3185_v10 = vmul.f32 %v2879_v9, %v3091_v7 }
  0x2f   : > { %6605 = vst [vmem:[#allocation39_spill] sm:$0xff] %v3044_v57  ;;  %6606 = vst [vmem:[#allocation40_spill] sm:$0xff] %v3047_v58  ;;  %v3163_v16 = vld [vmem:[%s2875_s9 + $0xe8] sm:$0x3]  ;;  %v3166_v12 = vld [vmem:[%s2875_s9 + $0x120] sm:$0xff]  ;;  %v3173_v13 = vmul.f32 %v2877_v8, %v3141_v24  ;;  %v3181_v57 = vmul.f32 %v2879_v9, %v3047_v58 }
  0x30   : > { %6607 = vst [vmem:[#allocation41_spill] sm:$0xff] %v3051_v59  ;;  %6608 = vst [vmem:[#allocation42_spill] sm:$0xff] %v3055_v60  ;;  %v3169_v11 = vld [vmem:[%s2875_s9 + $0x128] sm:$0xff]  ;;  %v3244_v60 = vld [vmem:[%s2875_s9 + $0x170] sm:$0xff] }
  0x31   : > { %6609 = vst [vmem:[#allocation43_spill] sm:$0xff] %v3066_v63  ;;  %6610 = vst [vmem:[#allocation44_spill] sm:$0xff] %v3069_v0  ;;  %v3177_v63 = vmul.f32 %v2877_v8, %v3144_v23  ;;  %v3202_v58 = vmul.f32 %v2877_v8, %v3169_v11  ;;  %v3263_v59 = vld [vmem:[%s2875_s9 + $0x148] sm:$0x3]  ;;  %v3285_v53 = vld [vmem:[%s2875_s9 + $0x178] sm:$0x3] }
  0x32   : > { %6611 = vst [vmem:[#allocation45_spill] sm:$0xff] %v3072_v2  ;;  %6612 = vst [vmem:[#allocation46_spill] sm:$0xff] %v3076_v3  ;;  %v3241_v3 = vld [vmem:[%s2875_s9 + $0x168] sm:$0xff] }
  0x33   : > { %6613 = vst [vmem:[#allocation47_spill] sm:$0xff] %v3080_v4  ;;  %6614 = vst [vmem:[#allocation48_spill] sm:$0xff] %v3091_v7  ;;  %v3206_v7 = vmul.f32 %v2879_v9, %v3069_v0  ;;  %v3238_v4 = vld [vmem:[%s2875_s9 + $0x130] sm:$0x3]  ;;  %v3267_v54 = vmul.f32 %v2877_v8, %v3241_v3 }
  0x34   : > { %6615 = vst [vmem:[#allocation49_spill] sm:$0xff] %v3094_v1  ;;  %6616 = vst [vmem:[#allocation50_spill] sm:$0xff] %v3097_v15 }
  0x35   : > { %6617 = vst [vmem:[#allocation51_spill] sm:$0xff] %v3101_v14  ;;  %6618 = vst [vmem:[#allocation52_spill] sm:$0xff] %v3105_v43  ;;  %v3216_v43 = vld [vmem:[%s2875_s9 + $0x150] sm:$0xff]  ;;  %v3219_v14 = vld [vmem:[%s2875_s9 + $0x158] sm:$0xff] }
  0x36   : > { %6619 = vst [vmem:[#allocation53_spill] sm:$0xff] %v3116_v37  ;;  %6620 = vst [vmem:[#allocation54_spill] sm:$0xff] %v3119_v32 }
  0x37   : > { %6621 = vst [vmem:[#allocation55_spill] sm:$0xff] %v3123_v31  ;;  %6622 = vst [vmem:[#allocation56_spill] sm:$0xff] %v3127_v30  ;;  %v3210_v30 = vmul.f32 %v2879_v9, %v3072_v2  ;;  %v3213_v31 = vld [vmem:[%s2875_s9 + $0x118] sm:$0x3]  ;;  %v3231_v2 = vmul.f32 %v2879_v9, %v3138_v25 }
  0x38   : > { %6623 = vst [vmem:[#allocation57_spill] sm:$0xff] %v3138_v25  ;;  %6624 = vst [vmem:[#allocation58_spill] sm:$0xff] %v3141_v24  ;;  %v3256_v25 = vmul.f32 %v2879_v9, %v3097_v15  ;;  %v3279_v15 = vmul.f32 %v2879_v9, %v3119_v32  ;;  %v3301_v32 = vmul.f32 %v2879_v9, %v3213_v31 }
  0x39   : > { %6625 = vst [vmem:[#allocation59_spill] sm:$0xff] %v3144_v23  ;;  %6626 = vst [vmem:[#allocation60_spill] sm:$0xff] %v3148_v18  ;;  %v3191_v18 = vld [vmem:[%s2875_s9 + $0x138] sm:$0xff] }
  0x3a   : > { %6627 = vst [vmem:[#allocation61_spill] sm:$0xff] %v3152_v51  ;;  %6628 = vst [vmem:[#allocation62_spill] sm:$0xff] %v3163_v16  ;;  %v3188_v51 = vld [vmem:[%s2875_s9 + $0x100] sm:$0x3] }
  0x3b   : > { %6629 = vst [vmem:[#allocation63_spill] sm:$0xff] %v3166_v12  ;;  %6630 = vst [vmem:[#allocation64_spill] sm:$0xff] %v3169_v11  ;;  %v3289_v47 = vmul.f32 %v2879_v9, %v3188_v51 }
  0x3c   : > { %6631 = vst [vmem:[#allocation65_spill] sm:$0xff] %v3173_v13  ;;  %6632 = vst [vmem:[#allocation66_spill] sm:$0xff] %v3177_v63  ;;  %v3194_v13 = vld [vmem:[%s2875_s9 + $0x140] sm:$0xff]  ;;  %v3198_v63 = vmul.f32 %v2877_v8, %v3166_v12 }
  0x3d   : > { %6633 = vst [vmem:[#allocation67_spill] sm:$0xff] %v3188_v51  ;;  %6634 = vst [vmem:[#allocation68_spill] sm:$0xff] %v3191_v18  ;;  %v3227_v0 = vmul.f32 %v2877_v8, %v3194_v13  ;;  %v3309_v51 = vmul.f32 %v2879_v9, %v3169_v11  ;;  %v3329_v11 = vmul.f32 %v2879_v9, %v3216_v43 }
  0x3e   : > { %6635 = vst [vmem:[#allocation69_spill] sm:$0xff] %v3194_v13  ;;  %6636 = vst [vmem:[#allocation70_spill] sm:$0xff] %v3198_v63  ;;  %v3223_v63 = vmul.f32 %v2877_v8, %v3191_v18 }
  0x3f   : > { %6637 = vst [vmem:[#allocation71_spill] sm:$0xff] %v3202_v58  ;;  %6638 = vst [vmem:[#allocation72_spill] sm:$0xff] %v3213_v31  ;;  %v3235_v58 = vmul.f32 %v2879_v9, %v3094_v1  ;;  %v3260_v1 = vmul.f32 %v2879_v9, %v3163_v16  ;;  %v3282_v16 = vld [vmem:[%s2875_s9 + $0x160] sm:$0x3]  ;;  %v3321_v31 = vmul.f32 %v2879_v9, %v3194_v13 }
  0x40   : > { %6639 = vst [vmem:[#allocation73_spill] sm:$0xff] %v3216_v43  ;;  %6640 = vst [vmem:[#allocation74_spill] sm:$0xff] %v3219_v14  ;;  %v3341_v13 = vmul.f32 %v2879_v9, %v3241_v3 }
  0x41   : > { %6641 = vst [vmem:[#allocation75_spill] sm:$0xff] %v3223_v63  ;;  %6642 = vst [vmem:[#allocation76_spill] sm:$0xff] %v3227_v0  ;;  %v3248_v63 = vmul.f32 %v2877_v8, %v3216_v43  ;;  %v3252_v0 = vmul.f32 %v2877_v8, %v3219_v14  ;;  %v3349_v43 = vmul.f32 %v2879_v9, %v3285_v53 }
  0x42   : > { %6643 = vst [vmem:[#allocation77_spill] sm:$0xff] %v3238_v4  ;;  %6644 = vst [vmem:[#allocation78_spill] sm:$0xff] %v3241_v3  ;;  %v464_v3 = vrot.slane %v2969_v36, 1  ;;  %v472_v36 = vrot.slane %v3037_v55, 1  ;;  %v484_v55 = vrot.slane %v3113_v38, 1 }
  0x43   : > { %6645 = vst [vmem:[#allocation79_spill] sm:$0xff] %v3244_v60  ;;  %6646 = vst [vmem:[#allocation80_spill] sm:$0xff] %v3248_v63  ;;  %v3271_v63 = vmul.f32 %v2877_v8, %v3244_v60  ;;  %v3293_v8 = vmul.f32 %v2879_v9, %v3141_v24  ;;  %v3313_v24 = vmul.f32 %v2879_v9, %v3238_v4 }
  0x44   : > { %6647 = vst [vmem:[#allocation81_spill] sm:$0xff] %v3252_v0  ;;  %6648 = vst [vmem:[#allocation82_spill] sm:$0xff] %v3263_v59  ;;  %v3275_v0 = vmul.f32 %v2879_v9, %v3116_v37  ;;  %v3297_v37 = vmul.f32 %v2879_v9, %v3144_v23  ;;  %v3317_v23 = vmul.f32 %v2879_v9, %v3191_v18 }
  0x45   : > { %6649 = vst [vmem:[#allocation83_spill] sm:$0xff] %v3267_v54  ;;  %6650 = vst [vmem:[#allocation84_spill] sm:$0xff] %v3271_v63  ;;  %v3305_v63 = vmul.f32 %v2879_v9, %v3166_v12  ;;  %v3325_v12 = vmul.f32 %v2879_v9, %v3263_v59  ;;  %v3333_v4 = vmul.f32 %v2879_v9, %v3219_v14  ;;  %v456_v54 = vrot.slane %v2915_v21, 1 }
  0x46   : > { %6651 = vst [vmem:[#allocation85_spill] sm:$0xff] %v3282_v16  ;;  %v3337_v18 = vmul.f32 %v2879_v9, %v3282_v16  ;;  %v3345_v59 = vmul.f32 %v2879_v9, %v3244_v60  ;;  %v457_v14 = vrot.slane %v2919_v22, 1  ;;  %v461_v16 = vrot.slane %v2944_v29, 1 }
  0x47   : > { %v467_v60 = vrot.slane %v2991_v42, 1  ;;  %v469_v21 = vrot.slane %v3012_v48, 1  ;;  %v471_v22 = vrot.slane %v3016_v49, 1  ;;  %v3371_v29 = vsel %vm455_vm0, %v462_v40, %v464_v3 }
  0x48   : > { %v3360_v34 = vsel %vm455_vm0, %v456_v54, %v457_v14  ;;  %v3363_v9 = vsel %vm455_vm0, %v457_v14, %v459_v46  ;;  %v3368_v28 = vsel %vm455_vm0, %v461_v16, %v462_v40  ;;  %v474_v14 = vrot.slane %v3041_v56, 1 }
  0x49   : > { %v3374_v35 = vsel %vm455_vm0, %v466_v39, %v467_v60  ;;  %v3378_v41 = vsel %vm455_vm0, %v467_v60, %v469_v21  ;;  %v476_v42 = vrot.slane %v3059_v61, 1  ;;  %v477_v46 = vrot.slane %v3063_v62, 1 }
  0x4a   : > { %v3384_v16 = vsel %vm455_vm0, %v471_v22, %v472_v36  ;;  %v479_v40 = vrot.slane %v3084_v5, 1  ;;  %v481_v48 = vrot.slane %v3088_v6, 1  ;;  %v482_v39 = vrot.slane %v3109_v44, 1 }
  0x4b   : > { %v3390_v49 = vsel %vm455_vm0, %v472_v36, %v474_v14  ;;  %v3393_v54 = vsel %vm455_vm0, %v476_v42, %v477_v46  ;;  %v486_v56 = vrot.slane %v3131_v45, 1  ;;  %v487_v62 = vrot.slane %v3135_v50, 1 }
  0x4c   : > { %v480_v60 = vsel %vm455_vm0, %v477_v46, %v479_v40  ;;  %v483_v61 = vsel %vm455_vm0, %v481_v48, %v482_v39  ;;  %v489_v3 = vrot.slane %v3156_v52, 1  ;;  %v485_v44 = vsel %vm455_vm0, %v482_v39, %v484_v55 }
  0x4d   : > { %v491_v5 = vrot.slane %v3160_v17, 1  ;;  %v492_v6 = vrot.slane %v3181_v57, 1  ;;  %v494_v21 = vrot.slane %v3185_v10, 1  ;;  %v488_v38 = vsel %vm455_vm0, %v486_v56, %v487_v62 }
  0x4e   : > { %v490_v45 = vsel %vm455_vm0, %v487_v62, %v489_v3  ;;  %v496_v22 = vrot.slane %v3206_v7, 1  ;;  %v497_v36 = vrot.slane %v3210_v30, 1  ;;  %v499_v14 = vrot.slane %v3231_v2, 1 }
  0x4f   : > { %v493_v50 = vsel %vm455_vm0, %v491_v5, %v492_v6  ;;  %v495_v52 = vsel %vm455_vm0, %v492_v6, %v494_v21  ;;  %v501_v17 = vrot.slane %v3235_v58, 1  ;;  %v502_v10 = vrot.slane %v3256_v25, 1 }
  0x50   : > { %v498_v57 = vsel %vm455_vm0, %v496_v22, %v497_v36  ;;  %v504_v42 = vrot.slane %v3260_v1, 1  ;;  %v506_v46 = vrot.slane %v3275_v0, 1  ;;  %v500_v7 = vsel %vm455_vm0, %v497_v36, %v499_v14 }
  0x51   : > { %v507_v30 = vrot.slane %v3279_v15, 1  ;;  %v509_v40 = vrot.slane %v3289_v47, 1  ;;  %v511_v48 = vrot.slane %v3293_v8, 1  ;;  %v503_v2 = vsel %vm455_vm0, %v501_v17, %v502_v10  ;;  %v6660_v17 = vld [vmem:[#allocation28_spill] sm:$0xff] }
  0x52   : > { %v505_v58 = vsel %vm455_vm0, %v502_v10, %v504_v42  ;;  %v512_v39 = vrot.slane %v3297_v37, 1  ;;  %v514_v25 = vrot.slane %v3301_v32, 1  ;;  %v516_v55 = vrot.slane %v3305_v63, 1 }
  0x53   : > { %v508_v1 = vsel %vm455_vm0, %v506_v46, %v507_v30  ;;  %v510_v0 = vsel %vm455_vm0, %v507_v30, %v509_v40  ;;  %v517_v15 = vrot.slane %v3309_v51, 1  ;;  %v519_v56 = vrot.slane %v3313_v24, 1  ;;  %v6670_v46 = vld [vmem:[#allocation41_spill] sm:$0xff]  ;;  %v6672_v30 = vld [vmem:[#allocation42_spill] sm:$0xff] }
  0x54   : > { %v513_v47 = vsel %vm455_vm0, %v511_v48, %v512_v39  ;;  %v515_v8 = vsel %vm455_vm0, %v512_v39, %v514_v25  ;;  %v521_v62 = vrot.slane %v3317_v23, 1  ;;  %v522_v32 = vrot.slane %v3321_v31, 1 }
  0x55   : > { %v518_v37 = vsel %vm455_vm0, %v516_v55, %v517_v15  ;;  %v524_v3 = vrot.slane %v3325_v12, 1  ;;  %v526_v5 = vrot.slane %v3329_v11, 1  ;;  %v520_v63 = vsel %vm455_vm0, %v517_v15, %v519_v56 }
  0x56   : > { %v527_v51 = vrot.slane %v3333_v4, 1  ;;  %v529_v6 = vrot.slane %v3337_v18, 1  ;;  %v531_v21 = vrot.slane %v3341_v13, 1  ;;  %v523_v24 = vsel %vm455_vm0, %v521_v62, %v522_v32 }
  0x57   : > { %v525_v23 = vsel %vm455_vm0, %v522_v32, %v524_v3  ;;  %v532_v22 = vrot.slane %v3345_v59, 1  ;;  %v534_v31 = vrot.slane %v3349_v43, 1  ;;  %v3449_v36 = vadd.f32 %v3360_v34, %v2907_v19  ;;  %v6656_v34 = vld [vmem:[#allocation24_spill] sm:$0xff] }
  0x58   : > { %v528_v12 = vsel %vm455_vm0, %v526_v5, %v527_v51  ;;  %v530_v11 = vsel %vm455_vm0, %v527_v51, %v529_v6  ;;  %v3453_v18 = vadd.f32 %v3363_v9, %v2911_v20  ;;  %v3459_v59 = vadd.f32 %v3368_v28, %v2932_v26  ;;  %v6658_v9 = vld [vmem:[#allocation27_spill] sm:$0xff]  ;;  %v6662_v28 = vld [vmem:[#allocation32_spill] sm:$0xff] }
  0x59   : > { %v533_v13 = vsel %vm455_vm0, %v531_v21, %v532_v22  ;;  %v535_v4 = vsel %vm455_vm0, %v532_v22, %v534_v31  ;;  %v3463_v43 = vadd.f32 %v3371_v29, %v2936_v27  ;;  %v3467_v19 = vadd.f32 %v3374_v35, %v2957_v33  ;;  %v6664_v29 = vld [vmem:[#allocation33_spill] sm:$0xff] }
  0x5a   : > { %6652 = vst [vmem:[#allocation86_spill] sm:$0xff] %v3453_v18  ;;  %6653 = vst [vmem:[#allocation87_spill] sm:$0xff] %v3459_v59  ;;  %v3471_v20 = vadd.f32 %v3378_v41, %v6656_v34  ;;  %v3475_v14 = vadd.f32 %v3384_v16, %v6658_v9  ;;  %v3479_v26 = vadd.f32 %v3390_v49, %v6660_v17  ;;  %v6666_v33 = vld [vmem:[#allocation37_spill] sm:$0xff]  ;;  %v6668_v41 = vld [vmem:[#allocation38_spill] sm:$0xff] }
  0x5b   : > { %6654 = vst [vmem:[#allocation88_spill] sm:$0xff] %v3463_v43  ;;  %6655 = vst [vmem:[#allocation89_spill] sm:$0xff] %v3467_v19  ;;  %v3483_v27 = vadd.f32 %v3393_v54, %v6662_v28  ;;  %v3486_v10 = vadd.f32 %v480_v60, %v6664_v29  ;;  %v3489_v35 = vadd.f32 %v483_v61, %v6666_v33  ;;  %v6674_v49 = vld [vmem:[#allocation46_spill] sm:$0xff]  ;;  %v6676_v54 = vld [vmem:[#allocation47_spill] sm:$0xff] }
  0x5c   : > { %6657 = vst [vmem:[#allocation24_spill] sm:$0xff] %v3471_v20  ;;  %6659 = vst [vmem:[#allocation27_spill] sm:$0xff] %v3475_v14  ;;  %v3492_v42 = vadd.f32 %v485_v44, %v6668_v41  ;;  %v3495_v16 = vadd.f32 %v488_v38, %v6670_v46  ;;  %v3498_v40 = vadd.f32 %v490_v45, %v6672_v30  ;;  %v6678_v60 = vld [vmem:[#allocation51_spill] sm:$0xff]  ;;  %v6680_v61 = vld [vmem:[#allocation52_spill] sm:$0xff] }
  0x5d   : > { %6661 = vst [vmem:[#allocation28_spill] sm:$0xff] %v3479_v26  ;;  %6663 = vst [vmem:[#allocation32_spill] sm:$0xff] %v3483_v27  ;;  %v3501_v48 = vadd.f32 %v493_v50, %v6674_v49  ;;  %v3504_v39 = vadd.f32 %v495_v52, %v6676_v54  ;;  %v3507_v25 = vadd.f32 %v498_v57, %v6678_v60  ;;  %v6682_v44 = vld [vmem:[#allocation55_spill] sm:$0xff]  ;;  %v6684_v38 = vld [vmem:[#allocation56_spill] sm:$0xff] }
  0x5e   : > { %6665 = vst [vmem:[#allocation33_spill] sm:$0xff] %v3486_v10  ;;  %6667 = vst [vmem:[#allocation37_spill] sm:$0xff] %v3489_v35  ;;  %v3510_v55 = vadd.f32 %v500_v7, %v6680_v61  ;;  %v3513_v15 = vadd.f32 %v503_v2, %v6682_v44  ;;  %v3516_v56 = vadd.f32 %v505_v58, %v6684_v38  ;;  %v6686_v45 = vld [vmem:[#allocation60_spill] sm:$0xff]  ;;  %v6688_v50 = vld [vmem:[#allocation61_spill] sm:$0xff] }
  0x5f   : > { %6669 = vst [vmem:[#allocation38_spill] sm:$0xff] %v3492_v42  ;;  %6671 = vst [vmem:[#allocation41_spill] sm:$0xff] %v3495_v16  ;;  %v3519_v62 = vadd.f32 %v508_v1, %v6686_v45  ;;  %v3522_v32 = vadd.f32 %v510_v0, %v6688_v50  ;;  %v6690_v52 = vld [vmem:[#allocation65_spill] sm:$0xff]  ;;  %v6692_v57 = vld [vmem:[#allocation66_spill] sm:$0xff] }
  0x60   : > { %6673 = vst [vmem:[#allocation42_spill] sm:$0xff] %v3498_v40  ;;  %6675 = vst [vmem:[#allocation46_spill] sm:$0xff] %v3501_v48  ;;  %v3525_v3 = vadd.f32 %v513_v47, %v6690_v52  ;;  %v3528_v5 = vadd.f32 %v515_v8, %v6692_v57  ;;  %v6694_v7 = vld [vmem:[#allocation70_spill] sm:$0xff]  ;;  %v6696_v2 = vld [vmem:[#allocation71_spill] sm:$0xff] }
  0x61   : > { %6677 = vst [vmem:[#allocation47_spill] sm:$0xff] %v3504_v39  ;;  %6679 = vst [vmem:[#allocation51_spill] sm:$0xff] %v3507_v25  ;;  %v3531_v51 = vadd.f32 %v518_v37, %v6694_v7  ;;  %v3534_v6 = vadd.f32 %v520_v63, %v6696_v2  ;;  %v6698_v58 = vld [vmem:[#allocation75_spill] sm:$0xff]  ;;  %v6700_v1 = vld [vmem:[#allocation76_spill] sm:$0xff] }
  0x62   : > { %6681 = vst [vmem:[#allocation52_spill] sm:$0xff] %v3510_v55  ;;  %6683 = vst [vmem:[#allocation55_spill] sm:$0xff] %v3513_v15  ;;  %v3537_v21 = vadd.f32 %v523_v24, %v6698_v58  ;;  %v3540_v22 = vadd.f32 %v525_v23, %v6700_v1  ;;  %v6702_v0 = vld [vmem:[#allocation80_spill] sm:$0xff]  ;;  %v6704_v47 = vld [vmem:[#allocation81_spill] sm:$0xff] }
  0x63   : > { %6685 = vst [vmem:[#allocation56_spill] sm:$0xff] %v3516_v56  ;;  %6687 = vst [vmem:[#allocation60_spill] sm:$0xff] %v3519_v62  ;;  %v3543_v31 = vadd.f32 %v528_v12, %v6702_v0  ;;  %v3546_v34 = vadd.f32 %v530_v11, %v6704_v47  ;;  %v6706_v8 = vld [vmem:[#allocation83_spill] sm:$0xff]  ;;  %v6708_v37 = vld [vmem:[#allocation84_spill] sm:$0xff] }
  0x64   : > { %6689 = vst [vmem:[#allocation61_spill] sm:$0xff] %v3522_v32  ;;  %6691 = vst [vmem:[#allocation65_spill] sm:$0xff] %v3525_v3  ;;  %v3549_v9 = vadd.f32 %v533_v13, %v6706_v8  ;;  %v3552_v17 = vadd.f32 %v535_v4, %v6708_v37  ;;  %v6710_v63 = vld [vmem:[#allocation9_spill] sm:$0xff]  ;;  %v6711_v28 = vld [vmem:[#allocation12_spill] sm:$0xff] }
  0x65   : > { %6693 = vst [vmem:[#allocation66_spill] sm:$0xff] %v3528_v5  ;;  %6695 = vst [vmem:[#allocation70_spill] sm:$0xff] %v3531_v51  ;;  %v604_v29 = vmul.f32 %v6711_v28, %v6710_v63  ;;  %v6712_v24 = vld [vmem:[#allocation10_spill] sm:$0xff]  ;;  %v6713_v23 = vld [vmem:[#allocation11_spill] sm:$0xff] }
  0x66   : > { %6697 = vst [vmem:[#allocation71_spill] sm:$0xff] %v3534_v6  ;;  %6699 = vst [vmem:[#allocation75_spill] sm:$0xff] %v3537_v21  ;;  %v605_v33 = vmul.f32 %v6711_v28, %v6712_v24  ;;  %v606_v41 = vmul.f32 %v6711_v28, %v6713_v23  ;;  %v6714_v12 = vld [vmem:[#allocation15_spill] sm:$0xff]  ;;  %v6715_v11 = vld [vmem:[#allocation16_spill] sm:$0xff] }
  0x67   : > { %6701 = vst [vmem:[#allocation76_spill] sm:$0xff] %v3540_v22  ;;  %6703 = vst [vmem:[#allocation80_spill] sm:$0xff] %v3543_v31  ;;  %v607_v46 = vmul.f32 %v6711_v28, %v6714_v12  ;;  %v608_v30 = vmul.f32 %v6711_v28, %v6715_v11  ;;  %v6716_v13 = vld [vmem:[#allocation17_spill] sm:$0xff]  ;;  %v6717_v4 = vld [vmem:[#allocation18_spill] sm:$0xff]  ;;  %v701_v10 = vrot.slane %v604_v29, 2 }
  0x68   : > { %6705 = vst [vmem:[#allocation81_spill] sm:$0xff] %v3546_v34  ;;  %6707 = vst [vmem:[#allocation83_spill] sm:$0xff] %v3549_v9  ;;  %v609_v49 = vmul.f32 %v6711_v28, %v6716_v13  ;;  %v610_v54 = vmul.f32 %v6711_v28, %v6717_v4  ;;  %v6718_v60 = vld [vmem:[#allocation19_spill] sm:$0xff]  ;;  %v6719_v44 = vld [vmem:[#allocation20_spill] sm:$0xff]  ;;  %v702_v27 = vrot.slane %v605_v33, 2 }
  0x69   : > { %6709 = vst [vmem:[#allocation84_spill] sm:$0xff] %v3552_v17  ;;  %v611_v61 = vmul.f32 %v6711_v28, %v6718_v60  ;;  %v612_v38 = vmul.f32 %v6711_v28, %v6719_v44  ;;  %v6720_v45 = vld [vmem:[#allocation21_spill] sm:$0xff]  ;;  %v6721_v52 = vld [vmem:[#allocation22_spill] sm:$0xff]  ;;  %v6722_v7 = vld [vmem:[#allocation23_spill] sm:$0xff]  ;;  %v706_v26 = vrot.slane %v607_v46, 2  ;;  %v707_v14 = vrot.slane %v608_v30, 2 }
  0x6a   : > { %v613_v50 = vmul.f32 %v6711_v28, %v6720_v45  ;;  %v3576_v57 = vmul.f32 %v6711_v28, %v6721_v52  ;;  %v3580_v2 = vmul.f32 %v6711_v28, %v6722_v7  ;;  %v6723_v58 = vld [vmem:[#allocation25_spill] sm:$0xff]  ;;  %v6724_v0 = vld [vmem:[#allocation26_spill] sm:$0xff]  ;;  %v6727_v23 = vld [vmem:[#allocation31_spill] sm:$0xff]  ;;  %v709_v20 = vrot.slane %v609_v49, 2 }
  0x6b   : > { %v3584_v1 = vmul.f32 %v6711_v28, %v6723_v58  ;;  %v3588_v47 = vmul.f32 %v6711_v28, %v6724_v0  ;;  %v6725_v8 = vld [vmem:[#allocation29_spill] sm:$0xff]  ;;  %v6726_v63 = vld [vmem:[#allocation30_spill] sm:$0xff]  ;;  %v3600_v13 = vmul.f32 %v6711_v28, %v6727_v23  ;;  %v6729_v58 = vld [vmem:[#allocation35_spill] sm:$0xff]  ;;  %v712_v19 = vrot.slane %v611_v61, 2 }
  0x6c   : > { %v3592_v37 = vmul.f32 %v6711_v28, %v6725_v8  ;;  %v3596_v24 = vmul.f32 %v6711_v28, %v6726_v63  ;;  %v6728_v44 = vld [vmem:[#allocation34_spill] sm:$0xff]  ;;  %v3608_v0 = vmul.f32 %v6711_v28, %v6729_v58  ;;  %v6730_v52 = vld [vmem:[#allocation36_spill] sm:$0xff]  ;;  %v6731_v45 = vld [vmem:[#allocation43_spill] sm:$0xff]  ;;  %v3727_v43 = vsel %vm700_vm1, %v701_v10, %v702_v27 }
  0x6d   : > { %v3604_v7 = vmul.f32 %v6711_v28, %v6728_v44  ;;  %v3612_v8 = vmul.f32 %v6711_v28, %v6730_v52  ;;  %v3616_v63 = vmul.f32 %v6711_v28, %v6731_v45  ;;  %v6732_v60 = vld [vmem:[#allocation39_spill] sm:$0xff]  ;;  %v6733_v4 = vld [vmem:[#allocation40_spill] sm:$0xff]  ;;  %v6736_v17 = vld [vmem:[#allocation45_spill] sm:$0xff]  ;;  %v716_v59 = vrot.slane %v613_v50, 2 }
  0x6e   : > { %v3620_v23 = vmul.f32 %v6711_v28, %v6732_v60  ;;  %v3624_v44 = vmul.f32 %v6711_v28, %v6733_v4  ;;  %v6734_v11 = vld [vmem:[#allocation48_spill] sm:$0xff]  ;;  %v3636_v45 = vmul.f32 %v6711_v28, %v6736_v17  ;;  %v6737_v9 = vld [vmem:[#allocation57_spill] sm:$0xff]  ;;  %v6739_v31 = vld [vmem:[#allocation50_spill] sm:$0xff]  ;;  %v3733_v18 = vsel %vm700_vm1, %v706_v26, %v707_v14 }
  0x6f   : > { %v3628_v58 = vmul.f32 %v6711_v28, %v6734_v11  ;;  %v6735_v12 = vld [vmem:[#allocation44_spill] sm:$0xff]  ;;  %v3640_v60 = vmul.f32 %v6711_v28, %v6737_v9  ;;  %v6738_v34 = vld [vmem:[#allocation49_spill] sm:$0xff]  ;;  %v3648_v11 = vmul.f32 %v6711_v28, %v6739_v31  ;;  %v6740_v22 = vld [vmem:[#allocation62_spill] sm:$0xff]  ;;  %v717_v29 = vrot.slane %v3576_v57, 2 }
  0x70   : > { %v3632_v52 = vmul.f32 %v6711_v28, %v6735_v12  ;;  %v3644_v4 = vmul.f32 %v6711_v28, %v6738_v34  ;;  %v3652_v12 = vmul.f32 %v6711_v28, %v6740_v22  ;;  %v6741_v21 = vld [vmem:[#allocation53_spill] sm:$0xff]  ;;  %v6742_v6 = vld [vmem:[#allocation54_spill] sm:$0xff]  ;;  %v6743_v51 = vld [vmem:[#allocation67_spill] sm:$0xff]  ;;  %v719_v10 = vrot.slane %v3580_v2, 2 }
  0x71   : > { %v3656_v17 = vmul.f32 %v6711_v28, %v6741_v21  ;;  %v3660_v9 = vmul.f32 %v6711_v28, %v6742_v6  ;;  %v3664_v34 = vmul.f32 %v6711_v28, %v6743_v51  ;;  %v6744_v5 = vld [vmem:[#allocation58_spill] sm:$0xff]  ;;  %v6745_v3 = vld [vmem:[#allocation59_spill] sm:$0xff]  ;;  %v6746_v32 = vld [vmem:[#allocation72_spill] sm:$0xff]  ;;  %v3749_v26 = vsel %vm700_vm1, %v716_v59, %v717_v29 }
  0x72   : > { %v3668_v31 = vmul.f32 %v6711_v28, %v6744_v5  ;;  %v3672_v22 = vmul.f32 %v6711_v28, %v6745_v3  ;;  %v3676_v21 = vmul.f32 %v6711_v28, %v6746_v32  ;;  %v6747_v62 = vld [vmem:[#allocation63_spill] sm:$0xff]  ;;  %v6748_v56 = vld [vmem:[#allocation64_spill] sm:$0xff]  ;;  %v6749_v15 = vld [vmem:[#allocation77_spill] sm:$0xff]  ;;  %v3755_v46 = vsel %vm700_vm1, %v717_v29, %v719_v10 }
  0x73   : > { %v3680_v6 = vmul.f32 %v6711_v28, %v6747_v62  ;;  %v3684_v51 = vmul.f32 %v6711_v28, %v6748_v56  ;;  %v3688_v5 = vmul.f32 %v6711_v28, %v6749_v15  ;;  %v6750_v55 = vld [vmem:[#allocation68_spill] sm:$0xff]  ;;  %v6751_v25 = vld [vmem:[#allocation69_spill] sm:$0xff]  ;;  %v6752_v39 = vld [vmem:[#allocation82_spill] sm:$0xff]  ;;  %v731_v30 = vrot.slane %v3608_v0, 2 }
  0x74   : > { %v3692_v3 = vmul.f32 %v6711_v28, %v6750_v55  ;;  %v3696_v32 = vmul.f32 %v6711_v28, %v6751_v25  ;;  %v3700_v62 = vmul.f32 %v6711_v28, %v6752_v39  ;;  %v6753_v48 = vld [vmem:[#allocation73_spill] sm:$0xff]  ;;  %v6754_v40 = vld [vmem:[#allocation74_spill] sm:$0xff]  ;;  %v6757_v35 = vld [vmem:[#allocation79_spill] sm:$0xff]  ;;  %v734_v61 = vrot.slane %v3616_v63, 2 }
  0x75   : > { %v3704_v56 = vmul.f32 %v6711_v28, %v6753_v48  ;;  %v3708_v15 = vmul.f32 %v6711_v28, %v6754_v40  ;;  %v6755_v16 = vld [vmem:[#allocation85_spill] sm:$0xff]  ;;  %v6756_v42 = vld [vmem:[#allocation78_spill] sm:$0xff]  ;;  %v3720_v39 = vmul.f32 %v6711_v28, %v6757_v35  ;;  %v3724_v48 = vmul.f32 %v6711_v28, %v3285_v53 }
  0x76   : > { %v3712_v55 = vmul.f32 %v6711_v28, %v6755_v16  ;;  %v3716_v25 = vmul.f32 %v6711_v28, %v6756_v42  ;;  %v704_v40 = vrot.slane %v606_v41, 2  ;;  %v711_v16 = vrot.slane %v610_v54, 2 }
  0x77   : > { %v714_v35 = vrot.slane %v612_v38, 2  ;;  %v3736_v53 = vsel %vm700_vm1, %v707_v14, %v709_v20  ;;  %v724_v20 = vrot.slane %v3592_v37, 2  ;;  %v726_v14 = vrot.slane %v3596_v24, 2 }
  0x78   : > { %v3730_v42 = vsel %vm700_vm1, %v702_v27, %v704_v40  ;;  %v3739_v28 = vsel %vm700_vm1, %v711_v16, %v712_v19  ;;  %v721_v27 = vrot.slane %v3584_v1, 2  ;;  %v722_v40 = vrot.slane %v3588_v47, 2 }
  0x79   : > { %v3743_v33 = vsel %vm700_vm1, %v712_v19, %v714_v35  ;;  %v727_v41 = vrot.slane %v3600_v13, 2  ;;  %v729_v35 = vrot.slane %v3604_v7, 2  ;;  %v732_v54 = vrot.slane %v3612_v8, 2 }
  0x7a   : > { %v3758_v19 = vsel %vm700_vm1, %v721_v27, %v722_v40  ;;  %v725_v49 = vsel %vm700_vm1, %v722_v40, %v724_v20  ;;  %v736_v50 = vrot.slane %v3620_v23, 2  ;;  %v737_v57 = vrot.slane %v3624_v44, 2 }
  0x7b   : > { %v728_v59 = vsel %vm700_vm1, %v726_v14, %v727_v41  ;;  %v730_v38 = vsel %vm700_vm1, %v727_v41, %v729_v35  ;;  %v739_v2 = vrot.slane %v3628_v58, 2  ;;  %v733_v1 = vsel %vm700_vm1, %v731_v30, %v732_v54 }
  0x7c   : > { %v735_v0 = vsel %vm700_vm1, %v732_v54, %v734_v61  ;;  %v741_v47 = vrot.slane %v3632_v52, 2  ;;  %v742_v37 = vrot.slane %v3636_v45, 2  ;;  %v738_v24 = vsel %vm700_vm1, %v736_v50, %v737_v57 }
  0x7d   : > { %v740_v63 = vsel %vm700_vm1, %v737_v57, %v739_v2  ;;  %v744_v13 = vrot.slane %v3640_v60, 2  ;;  %v746_v23 = vrot.slane %v3644_v4, 2  ;;  %v747_v58 = vrot.slane %v3648_v11, 2  ;;  %v6759_v57 = vld [vmem:[#allocation87_spill] sm:$0xff] }
  0x7e   : > { %v743_v7 = vsel %vm700_vm1, %v741_v47, %v742_v37  ;;  %v749_v8 = vrot.slane %v3652_v12, 2  ;;  %v751_v44 = vrot.slane %v3656_v17, 2  ;;  %v752_v45 = vrot.slane %v3660_v9, 2  ;;  %v6761_v47 = vld [vmem:[#allocation89_spill] sm:$0xff] }
  0x7f   : > { %v745_v52 = vsel %vm700_vm1, %v742_v37, %v744_v13  ;;  %v754_v16 = vrot.slane %v3664_v34, 2  ;;  %v756_v29 = vrot.slane %v3668_v31, 2  ;;  %v748_v60 = vsel %vm700_vm1, %v746_v23, %v747_v58  ;;  %v6763_v37 = vld [vmem:[#allocation27_spill] sm:$0xff]  ;;  %v6764_v23 = vld [vmem:[#allocation28_spill] sm:$0xff] }
  0x80   : > { %v750_v4 = vsel %vm700_vm1, %v747_v58, %v749_v8  ;;  %v757_v10 = vrot.slane %v3672_v22, 2  ;;  %v759_v11 = vrot.slane %v3676_v21, 2  ;;  %v753_v12 = vsel %vm700_vm1, %v751_v44, %v752_v45  ;;  %v6765_v58 = vld [vmem:[#allocation32_spill] sm:$0xff]  ;;  %v6766_v8 = vld [vmem:[#allocation33_spill] sm:$0xff] }
  0x81   : > { %v755_v17 = vsel %vm700_vm1, %v752_v45, %v754_v16  ;;  %v761_v27 = vrot.slane %v3680_v6, 2  ;;  %v762_v9 = vrot.slane %v3684_v51, 2  ;;  %v764_v40 = vrot.slane %v3688_v5, 2 }
  0x82   : > { %v758_v34 = vsel %vm700_vm1, %v756_v29, %v757_v10  ;;  %v760_v31 = vsel %vm700_vm1, %v757_v10, %v759_v11  ;;  %v766_v20 = vrot.slane %v3692_v3, 2  ;;  %v767_v21 = vrot.slane %v3696_v32, 2  ;;  %v6769_v29 = vld [vmem:[#allocation41_spill] sm:$0xff]  ;;  %v6770_v10 = vld [vmem:[#allocation42_spill] sm:$0xff] }
  0x83   : > { %v763_v22 = vsel %vm700_vm1, %v761_v27, %v762_v9  ;;  %v769_v14 = vrot.slane %v3700_v62, 2  ;;  %v771_v41 = vrot.slane %v3704_v56, 2  ;;  %v765_v6 = vsel %vm700_vm1, %v762_v9, %v764_v40 }
  0x84   : > { %v772_v51 = vrot.slane %v3708_v15, 2  ;;  %v774_v35 = vrot.slane %v3712_v55, 2  ;;  %v776_v30 = vrot.slane %v3716_v25, 2  ;;  %v768_v5 = vsel %vm700_vm1, %v766_v20, %v767_v21  ;;  %v6758_v15 = vld [vmem:[#allocation86_spill] sm:$0xff] }
  0x85   : > { %v770_v3 = vsel %vm700_vm1, %v767_v21, %v769_v14  ;;  %v777_v54 = vrot.slane %v3720_v39, 2  ;;  %v779_v32 = vrot.slane %v3724_v48, 2  ;;  %v3814_v61 = vadd.f32 %v3727_v43, %v3449_v36  ;;  %v6760_v48 = vld [vmem:[#allocation88_spill] sm:$0xff] }
  0x86   : > { %v773_v62 = vsel %vm700_vm1, %v771_v41, %v772_v51  ;;  %v775_v56 = vsel %vm700_vm1, %v772_v51, %v774_v35  ;;  %v3818_v55 = vadd.f32 %v3730_v42, %v6758_v15  ;;  %v3824_v39 = vadd.f32 %v3733_v18, %v6759_v57  ;;  %v6762_v43 = vld [vmem:[#allocation24_spill] sm:$0xff] }
  0x87   : > { %v778_v25 = vsel %vm700_vm1, %v776_v30, %v777_v54  ;;  %v780_v50 = vsel %vm700_vm1, %v777_v54, %v779_v32  ;;  %v3828_v2 = vadd.f32 %v3736_v53, %v6760_v48  ;;  %v3832_v36 = vadd.f32 %v3739_v28, %v6761_v47  ;;  %v6767_v28 = vld [vmem:[#allocation37_spill] sm:$0xff] }
  0x88   : > { %v3836_v42 = vadd.f32 %v3743_v33, %v6762_v43  ;;  %v3840_v13 = vadd.f32 %v3749_v26, %v6763_v37  ;;  %v3844_v18 = vadd.f32 %v3755_v46, %v6764_v23  ;;  %v3848_v53 = vadd.f32 %v3758_v19, %v6765_v58  ;;  %v6768_v33 = vld [vmem:[#allocation38_spill] sm:$0xff]  ;;  %v6772_v19 = vld [vmem:[#allocation47_spill] sm:$0xff]  ;;  %v6798_v23 = vld [vmem:[#allocation13_spill] sm:$0xff] }
  0x89   : > { %v3851_v44 = vadd.f32 %v725_v49, %v6766_v8  ;;  %v3854_v45 = vadd.f32 %v728_v59, %v6767_v28  ;;  %v3857_v16 = vadd.f32 %v730_v38, %v6768_v33  ;;  %v3860_v26 = vadd.f32 %v733_v1, %v6769_v29  ;;  %v6771_v46 = vld [vmem:[#allocation46_spill] sm:$0xff]  ;;  %v6773_v49 = vld [vmem:[#allocation51_spill] sm:$0xff]  ;;  %v6774_v59 = vld [vmem:[#allocation52_spill] sm:$0xff] }
  0x8a   : > { %v3863_v11 = vadd.f32 %v735_v0, %v6770_v10  ;;  %v3866_v27 = vadd.f32 %v738_v24, %v6771_v46  ;;  %v3869_v9 = vadd.f32 %v740_v63, %v6772_v19  ;;  %v3872_v40 = vadd.f32 %v743_v7, %v6773_v49  ;;  %v6775_v38 = vld [vmem:[#allocation55_spill] sm:$0xff]  ;;  %v6776_v1 = vld [vmem:[#allocation56_spill] sm:$0xff]  ;;  %v6778_v24 = vld [vmem:[#allocation61_spill] sm:$0xff] }
  0x8b   : > { %v3875_v20 = vadd.f32 %v745_v52, %v6774_v59  ;;  %v3878_v21 = vadd.f32 %v748_v60, %v6775_v38  ;;  %v3881_v14 = vadd.f32 %v750_v4, %v6776_v1  ;;  %v6777_v0 = vld [vmem:[#allocation60_spill] sm:$0xff]  ;;  %v3887_v51 = vadd.f32 %v755_v17, %v6778_v24  ;;  %v6779_v63 = vld [vmem:[#allocation65_spill] sm:$0xff]  ;;  %v6780_v7 = vld [vmem:[#allocation66_spill] sm:$0xff] }
  0x8c   : > { %v3884_v41 = vadd.f32 %v753_v12, %v6777_v0  ;;  %v3890_v35 = vadd.f32 %v758_v34, %v6779_v63  ;;  %v3893_v30 = vadd.f32 %v760_v31, %v6780_v7  ;;  %v6781_v52 = vld [vmem:[#allocation70_spill] sm:$0xff]  ;;  %v6783_v60 = vld [vmem:[#allocation71_spill] sm:$0xff]  ;;  %v6787_v12 = vld [vmem:[#allocation76_spill] sm:$0xff] }
  0x8d   : > { %v3896_v54 = vadd.f32 %v763_v22, %v6781_v52  ;;  %v3899_v32 = vadd.f32 %v765_v6, %v6783_v60  ;;  %v6785_v4 = vld [vmem:[#allocation75_spill] sm:$0xff]  ;;  %v3905_v57 = vadd.f32 %v770_v3, %v6787_v12  ;;  %v6789_v17 = vld [vmem:[#allocation80_spill] sm:$0xff]  ;;  %v6791_v34 = vld [vmem:[#allocation81_spill] sm:$0xff] }
  0x8e   : > { %v3902_v15 = vadd.f32 %v768_v5, %v6785_v4  ;;  %v3908_v48 = vadd.f32 %v773_v62, %v6789_v17  ;;  %v3911_v47 = vadd.f32 %v775_v56, %v6791_v34  ;;  %v6793_v31 = vld [vmem:[#allocation83_spill] sm:$0xff]  ;;  %v6795_v22 = vld [vmem:[#allocation84_spill] sm:$0xff]  ;;  %v6800_v8 = vld [vmem:[#allocation18_spill] sm:$0xff] }
  0x8f   : > { %6782 = vst [vmem:[#allocation9_spill] sm:$0xff] %v3896_v54  ;;  %6784 = vst [vmem:[#allocation12_spill] sm:$0xff] %v3899_v32  ;;  %v3914_v43 = vadd.f32 %v778_v25, %v6793_v31  ;;  %v3917_v37 = vadd.f32 %v780_v50, %v6795_v22  ;;  %v6797_v6 = vld [vmem:[#allocation15_spill] sm:$0xff]  ;;  %v6799_v5 = vld [vmem:[#allocation16_spill] sm:$0xff]  ;;  %v900_v62 = vmul.f32 %v6798_v23, %v6800_v8 }
  0x90   : > { %6786 = vst [vmem:[#allocation10_spill] sm:$0xff] %v3902_v15  ;;  %6788 = vst [vmem:[#allocation11_spill] sm:$0xff] %v3905_v57  ;;  %v898_v58 = vmul.f32 %v6798_v23, %v6797_v6  ;;  %v899_v3 = vmul.f32 %v6798_v23, %v6799_v5  ;;  %v6801_v28 = vld [vmem:[#allocation19_spill] sm:$0xff]  ;;  %v6802_v33 = vld [vmem:[#allocation21_spill] sm:$0xff] }
  0x91   : > { %6790 = vst [vmem:[#allocation17_spill] sm:$0xff] %v3908_v48  ;;  %6792 = vst [vmem:[#allocation20_spill] sm:$0xff] %v3911_v47  ;;  %v901_v56 = vmul.f32 %v6798_v23, %v6801_v28  ;;  %v902_v25 = vmul.f32 %v6798_v23, %v6802_v33  ;;  %v6803_v29 = vld [vmem:[#allocation22_spill] sm:$0xff]  ;;  %v6804_v10 = vld [vmem:[#allocation25_spill] sm:$0xff] }
  0x92   : > { %6794 = vst [vmem:[#allocation23_spill] sm:$0xff] %v3914_v43  ;;  %6796 = vst [vmem:[#allocation29_spill] sm:$0xff] %v3917_v37  ;;  %v903_v50 = vmul.f32 %v6798_v23, %v6803_v29  ;;  %v904_v46 = vmul.f32 %v6798_v23, %v6804_v10  ;;  %v6805_v19 = vld [vmem:[#allocation26_spill] sm:$0xff]  ;;  %v6807_v1 = vld [vmem:[#allocation31_spill] sm:$0xff] }
  0x93   : > { %v905_v49 = vmul.f32 %v6798_v23, %v6805_v19  ;;  %v6806_v59 = vld [vmem:[#allocation30_spill] sm:$0xff]  ;;  %v907_v0 = vmul.f32 %v6798_v23, %v6807_v1  ;;  %v6808_v24 = vld [vmem:[#allocation35_spill] sm:$0xff]  ;;  %v6809_v7 = vld [vmem:[#allocation36_spill] sm:$0xff] }
  0x94   : > { %v906_v38 = vmul.f32 %v6798_v23, %v6806_v59  ;;  %v908_v63 = vmul.f32 %v6798_v23, %v6808_v24  ;;  %v909_v52 = vmul.f32 %v6798_v23, %v6809_v7  ;;  %v6810_v60 = vld [vmem:[#allocation39_spill] sm:$0xff]  ;;  %v6811_v12 = vld [vmem:[#allocation40_spill] sm:$0xff]  ;;  %v6813_v22 = vld [vmem:[#allocation45_spill] sm:$0xff] }
  0x95   : > { %v910_v4 = vmul.f32 %v6798_v23, %v6810_v60  ;;  %v911_v17 = vmul.f32 %v6798_v23, %v6811_v12  ;;  %v6812_v34 = vld [vmem:[#allocation44_spill] sm:$0xff]  ;;  %v913_v59 = vmul.f32 %v6798_v23, %v6813_v22  ;;  %v6816_v24 = vld [vmem:[#allocation49_spill] sm:$0xff]  ;;  %v6817_v7 = vld [vmem:[#allocation50_spill] sm:$0xff] }
  0x96   : > { %v912_v31 = vmul.f32 %v6798_v23, %v6812_v34  ;;  %v3952_v19 = vld [vmem:[%s2875_s9 + $0x180] sm:$0xff]  ;;  %v3955_v1 = vld [vmem:[%s2875_s9 + $0x188] sm:$0xff]  ;;  %v914_v10 = vmul.f32 %v6798_v23, %v6816_v24  ;;  %v915_v29 = vmul.f32 %v6798_v23, %v6817_v7  ;;  %v6819_v12 = vld [vmem:[#allocation54_spill] sm:$0xff] }
  0x97   : > { %6814 = vst [vmem:[#allocation34_spill] sm:$0xff] %v3952_v19  ;;  %6815 = vst [vmem:[#allocation43_spill] sm:$0xff] %v3955_v1  ;;  %v6818_v60 = vld [vmem:[#allocation53_spill] sm:$0xff]  ;;  %v917_v28 = vmul.f32 %v6798_v23, %v6819_v12  ;;  %v6820_v34 = vld [vmem:[#allocation58_spill] sm:$0xff] }
  0x98   : > { %v916_v33 = vmul.f32 %v6798_v23, %v6818_v60  ;;  %v918_v8 = vmul.f32 %v6798_v23, %v6820_v34  ;;  %v6821_v22 = vld [vmem:[#allocation59_spill] sm:$0xff]  ;;  %v6823_v43 = vld [vmem:[#allocation64_spill] sm:$0xff]  ;;  %v6825_v48 = vld [vmem:[#allocation69_spill] sm:$0xff] }
  0x99   : > { %v919_v5 = vmul.f32 %v6798_v23, %v6821_v22  ;;  %v6822_v6 = vld [vmem:[#allocation63_spill] sm:$0xff]  ;;  %v921_v24 = vmul.f32 %v6798_v23, %v6823_v43  ;;  %v6824_v47 = vld [vmem:[#allocation68_spill] sm:$0xff]  ;;  %v923_v60 = vmul.f32 %v6798_v23, %v6825_v48  ;;  %v6826_v57 = vld [vmem:[#allocation73_spill] sm:$0xff]  ;;  %v928_v43 = vmul.f32 %v3952_v19, %v6798_v23 }
  0x9a   : > { %v920_v37 = vmul.f32 %v6798_v23, %v6822_v6  ;;  %v922_v7 = vmul.f32 %v6798_v23, %v6824_v47  ;;  %v924_v12 = vmul.f32 %v6798_v23, %v6826_v57  ;;  %v6827_v15 = vld [vmem:[#allocation74_spill] sm:$0xff]  ;;  %v6829_v54 = vld [vmem:[#allocation79_spill] sm:$0xff]  ;;  %v929_v47 = vmul.f32 %v3955_v1, %v6798_v23 }
  0x9b   : > { %v925_v34 = vmul.f32 %v6798_v23, %v6827_v15  ;;  %v6828_v32 = vld [vmem:[#allocation78_spill] sm:$0xff]  ;;  %v927_v6 = vmul.f32 %v6798_v23, %v6829_v54  ;;  %v3990_v48 = vadd.f32 %v898_v58, %v3814_v61  ;;  %v3993_v57 = vadd.f32 %v899_v3, %v3818_v55  ;;  %v6851_v58 = vld [vmem:[#allocation9_spill] sm:$0xff]  ;;  %v6853_v3 = vld [vmem:[#allocation12_spill] sm:$0xff] }
  0x9c   : > { %v926_v22 = vmul.f32 %v6798_v23, %v6828_v32  ;;  %v3996_v15 = vadd.f32 %v900_v62, %v3824_v39  ;;  %v3999_v32 = vadd.f32 %v901_v56, %v3828_v2  ;;  %v4002_v54 = vadd.f32 %v902_v25, %v3832_v36  ;;  %v6863_v56 = vld [vmem:[#allocation20_spill] sm:$0xff]  ;;  %v6865_v25 = vld [vmem:[#allocation23_spill] sm:$0xff] }
  0x9d   : > { %v4005_v19 = vadd.f32 %v903_v50, %v3836_v42  ;;  %v4008_v23 = vadd.f32 %v904_v46, %v3840_v13  ;;  %v4011_v61 = vadd.f32 %v905_v49, %v3844_v18  ;;  %v4014_v55 = vadd.f32 %v906_v38, %v3848_v53  ;;  %v6867_v50 = vld [vmem:[#allocation29_spill] sm:$0xff]  ;;  %v4098_v46 = vld [vmem:[%s2875_s9 + $0x88] sm:$0x3]  ;;  %v6870_v49 = vld [vmem:[#allocation15_spill] sm:$0xff] }
  0x9e   : > { %v4017_v39 = vadd.f32 %v907_v0, %v3851_v44  ;;  %v4020_v2 = vadd.f32 %v908_v63, %v3854_v45  ;;  %v4023_v36 = vadd.f32 %v909_v52, %v3857_v16  ;;  %v4026_v42 = vadd.f32 %v910_v4, %v3860_v26  ;;  %6869 = vst [vmem:[#allocation70_spill] sm:$0xff] %v4098_v46  ;;  %v6872_v0 = vld [vmem:[#allocation16_spill] sm:$0xff]  ;;  %v6876_v4 = vld [vmem:[#allocation21_spill] sm:$0xff] }
  0x9f   : > { %6830 = vst [vmem:[#allocation48_spill] sm:$0xff] %v4005_v19  ;;  %6831 = vst [vmem:[#allocation57_spill] sm:$0xff] %v4008_v23  ;;  %v4029_v13 = vadd.f32 %v911_v17, %v3863_v11  ;;  %v4032_v18 = vadd.f32 %v912_v31, %v3866_v27  ;;  %v4035_v53 = vadd.f32 %v913_v59, %v3869_v9  ;;  %v4050_v11 = vld [vmem:[%s2875_s9 + $0x28] sm:$0x3]  ;;  %v6871_v59 = vld [vmem:[#allocation14_spill] sm:$0xff] }
  0xa0   : > { %6832 = vst [vmem:[#allocation62_spill] sm:$0xff] %v4011_v61  ;;  %6833 = vst [vmem:[#allocation67_spill] sm:$0xff] %v4014_v55  ;;  %v4038_v44 = vadd.f32 %v914_v10, %v3872_v40  ;;  %v4041_v45 = vadd.f32 %v915_v29, %v3875_v20  ;;  %v4044_v16 = vadd.f32 %v916_v33, %v3878_v21  ;;  %v4065_v21 = vld [vmem:[%s2875_s9 + $0x40] sm:$0x3]  ;;  %v6877_v17 = vld [vmem:[#allocation22_spill] sm:$0xff] }
  0xa1   : > { %6834 = vst [vmem:[#allocation72_spill] sm:$0xff] %v4017_v39  ;;  %6835 = vst [vmem:[#allocation77_spill] sm:$0xff] %v4020_v2  ;;  %v4047_v26 = vadd.f32 %v917_v28, %v3881_v14  ;;  %v4053_v27 = vadd.f32 %v918_v8, %v3884_v41  ;;  %v4056_v9 = vadd.f32 %v919_v5, %v3887_v51  ;;  %v6855_v41 = vld [vmem:[#allocation10_spill] sm:$0xff]  ;;  %v6857_v51 = vld [vmem:[#allocation11_spill] sm:$0xff] }
  0xa2   : > { %6836 = vst [vmem:[#allocation82_spill] sm:$0xff] %v4023_v36  ;;  %6837 = vst [vmem:[#allocation85_spill] sm:$0xff] %v4026_v42  ;;  %v4059_v40 = vadd.f32 %v920_v37, %v3890_v35  ;;  %v4062_v20 = vadd.f32 %v921_v24, %v3893_v30  ;;  %v4068_v14 = vadd.f32 %v922_v7, %v6851_v58  ;;  %v4080_v35 = vld [vmem:[%s2875_s9 + $0x58] sm:$0x3]  ;;  %v4083_v30 = vld [vmem:[%s2875_s9 + $0x70] sm:$0x3] }
  0xa3   : > { %6838 = vst [vmem:[#allocation86_spill] sm:$0xff] %v4029_v13  ;;  %6839 = vst [vmem:[#allocation87_spill] sm:$0xff] %v4032_v18  ;;  %v4071_v62 = vadd.f32 %v923_v60, %v6853_v3  ;;  %v4074_v8 = vadd.f32 %v924_v12, %v6855_v41  ;;  %v4077_v5 = vadd.f32 %v925_v34, %v6857_v51  ;;  %v6861_v37 = vld [vmem:[#allocation17_spill] sm:$0xff]  ;;  %v6875_v7 = vld [vmem:[#allocation19_spill] sm:$0xff] }
  0xa4   : > { %6840 = vst [vmem:[#allocation88_spill] sm:$0xff] %v4035_v53  ;;  %6841 = vst [vmem:[#allocation89_spill] sm:$0xff] %v4038_v44  ;;  %v4086_v28 = vadd.f32 %v926_v22, %v6861_v37  ;;  %v4089_v33 = vadd.f32 %v927_v6, %v6863_v56  ;;  %v4092_v29 = vadd.f32 %v928_v43, %v6865_v25  ;;  %v6873_v43 = vld [vmem:[#allocation18_spill] sm:$0xff]  ;;  %v4139_v22 = vld [vmem:[%s2875_s9 + $0xd0] sm:$0x3] }
  0xa5   : > { %6842 = vst [vmem:[#allocation24_spill] sm:$0xff] %v4041_v45  ;;  %6843 = vst [vmem:[#allocation27_spill] sm:$0xff] %v4044_v16  ;;  %v4095_v10 = vadd.f32 %v929_v47, %v6867_v50  ;;  %v4102_v38 = vmul.f32 %v6871_v59, %v6870_v49  ;;  %v4106_v24 = vmul.f32 %v6871_v59, %v6872_v0  ;;  %v4117_v47 = vld [vmem:[%s2875_s9 + $0xa0] sm:$0x3]  ;;  %v4136_v31 = vld [vmem:[%s2875_s9 + $0xb8] sm:$0x3] }
  0xa6   : > { %6844 = vst [vmem:[#allocation28_spill] sm:$0xff] %v4047_v26  ;;  %6845 = vst [vmem:[#allocation32_spill] sm:$0xff] %v4050_v11  ;;  %v4110_v6 = vmul.f32 %v4050_v11, %v6871_v59  ;;  %v4114_v63 = vmul.f32 %v6871_v59, %v6873_v43  ;;  %v4121_v52 = vmul.f32 %v6871_v59, %v6875_v7  ;;  %v6880_v3 = vld [vmem:[#allocation25_spill] sm:$0xff]  ;;  %v6881_v51 = vld [vmem:[#allocation26_spill] sm:$0xff] }
  0xa7   : > { %6846 = vst [vmem:[#allocation33_spill] sm:$0xff] %v4053_v27  ;;  %6847 = vst [vmem:[#allocation37_spill] sm:$0xff] %v4056_v9  ;;  %v4125_v60 = vmul.f32 %v4065_v21, %v6871_v59  ;;  %v4129_v12 = vmul.f32 %v6871_v59, %v6876_v4  ;;  %v4133_v34 = vmul.f32 %v6871_v59, %v6877_v17  ;;  %v4158_v25 = vld [vmem:[%s2875_s9 + $0xe8] sm:$0x3]  ;;  %v6883_v50 = vld [vmem:[#allocation30_spill] sm:$0xff]  ;;  %v1062_v39 = vrot.slane %v4102_v38, 1 }
  0xa8   : > { %6848 = vst [vmem:[#allocation38_spill] sm:$0xff] %v4059_v40  ;;  %6849 = vst [vmem:[#allocation41_spill] sm:$0xff] %v4062_v20  ;;  %v4143_v58 = vmul.f32 %v4080_v35, %v6871_v59  ;;  %v4147_v41 = vmul.f32 %v6871_v59, %v6880_v3  ;;  %v4151_v37 = vmul.f32 %v6871_v59, %v6881_v51  ;;  %v6884_v0 = vld [vmem:[#allocation31_spill] sm:$0xff]  ;;  %v6887_v51 = vld [vmem:[#allocation36_spill] sm:$0xff]  ;;  %v1065_v55 = vrot.slane %v4110_v6, 1 }
  0xa9   : > { %6850 = vst [vmem:[#allocation42_spill] sm:$0xff] %v4065_v21  ;;  %6852 = vst [vmem:[#allocation46_spill] sm:$0xff] %v4068_v14  ;;  %v4155_v56 = vmul.f32 %v4083_v30, %v6871_v59  ;;  %v4162_v49 = vmul.f32 %v6871_v59, %v6883_v50  ;;  %v4166_v43 = vmul.f32 %v6871_v59, %v6884_v0  ;;  %v6885_v4 = vld [vmem:[#allocation35_spill] sm:$0xff]  ;;  %v4199_v11 = vld [vmem:[%s2875_s9 + $0x130] sm:$0x3]  ;;  %v1068_v61 = vrot.slane %v4121_v52, 1 }
  0xaa   : > { %6854 = vst [vmem:[#allocation47_spill] sm:$0xff] %v4071_v62  ;;  %6856 = vst [vmem:[#allocation51_spill] sm:$0xff] %v4074_v8  ;;  %v4170_v7 = vmul.f32 %v4098_v46, %v6871_v59  ;;  %v4174_v17 = vmul.f32 %v6871_v59, %v6885_v4  ;;  %v4177_v3 = vld [vmem:[%s2875_s9 + $0x100] sm:$0x3]  ;;  %v4185_v50 = vmul.f32 %v4117_v47, %v6871_v59  ;;  %v6889_v46 = vld [vmem:[#allocation40_spill] sm:$0xff]  ;;  %v1072_v23 = vrot.slane %v4129_v12, 1 }
  0xab   : > { %6858 = vst [vmem:[#allocation52_spill] sm:$0xff] %v4077_v5  ;;  %6859 = vst [vmem:[#allocation55_spill] sm:$0xff] %v4080_v35  ;;  %v6888_v0 = vld [vmem:[#allocation39_spill] sm:$0xff]  ;;  %v4193_v21 = vmul.f32 %v6871_v59, %v6889_v46  ;;  %v4196_v4 = vld [vmem:[%s2875_s9 + $0x118] sm:$0x3]  ;;  %v4215_v46 = vmul.f32 %v4139_v22, %v6871_v59  ;;  %v1075_v38 = vrot.slane %v4143_v58, 1 }
  0xac   : > { %6860 = vst [vmem:[#allocation56_spill] sm:$0xff] %v4083_v30  ;;  %6862 = vst [vmem:[#allocation60_spill] sm:$0xff] %v4086_v28  ;;  %v4181_v30 = vmul.f32 %v6871_v59, %v6887_v51  ;;  %v4189_v35 = vmul.f32 %v6871_v59, %v6888_v0  ;;  %v4203_v51 = vmul.f32 %v4136_v31, %v6871_v59  ;;  %v6893_v0 = vld [vmem:[#allocation45_spill] sm:$0xff]  ;;  %v6899_v14 = vld [vmem:[#allocation54_spill] sm:$0xff]  ;;  %v1082_v12 = vrot.slane %v4162_v49, 1 }
  0xad   : > { %6864 = vst [vmem:[#allocation61_spill] sm:$0xff] %v4089_v33  ;;  %6866 = vst [vmem:[#allocation65_spill] sm:$0xff] %v4092_v29  ;;  %v4211_v29 = vmul.f32 %v6871_v59, %v6893_v0  ;;  %v4218_v33 = vld [vmem:[%s2875_s9 + $0x148] sm:$0x3]  ;;  %v6895_v28 = vld [vmem:[#allocation49_spill] sm:$0xff]  ;;  %v4241_v20 = vmul.f32 %v6871_v59, %v6899_v14  ;;  %v4263_v14 = vmul.f32 %v4196_v4, %v6871_v59 }
  0xae   : > { %6868 = vst [vmem:[#allocation66_spill] sm:$0xff] %v4095_v10  ;;  %6874 = vst [vmem:[#allocation71_spill] sm:$0xff] %v4117_v47  ;;  %v6892_v47 = vld [vmem:[#allocation44_spill] sm:$0xff]  ;;  %v4222_v5 = vmul.f32 %v6871_v59, %v6895_v28  ;;  %v6897_v0 = vld [vmem:[#allocation53_spill] sm:$0xff]  ;;  %v4245_v28 = vmul.f32 %v4177_v3, %v6871_v59 }
  0xaf   : > { %6878 = vst [vmem:[#allocation75_spill] sm:$0xff] %v4136_v31  ;;  %6879 = vst [vmem:[#allocation76_spill] sm:$0xff] %v4139_v22  ;;  %v4207_v10 = vmul.f32 %v6871_v59, %v6892_v47  ;;  %v6896_v31 = vld [vmem:[#allocation50_spill] sm:$0xff]  ;;  %v4230_v47 = vmul.f32 %v4158_v25, %v6871_v59  ;;  %v4234_v62 = vmul.f32 %v6871_v59, %v6897_v0  ;;  %v4237_v22 = vld [vmem:[%s2875_s9 + $0x160] sm:$0x3] }
  0xb0   : > { %6882 = vst [vmem:[#allocation80_spill] sm:$0xff] %v4158_v25  ;;  %6886 = vst [vmem:[#allocation81_spill] sm:$0xff] %v4177_v3  ;;  %v4226_v8 = vmul.f32 %v6871_v59, %v6896_v31  ;;  %v6900_v31 = vld [vmem:[#allocation58_spill] sm:$0xff]  ;;  %v6901_v25 = vld [vmem:[#allocation59_spill] sm:$0xff] }
  0xb1   : > { %6890 = vst [vmem:[#allocation83_spill] sm:$0xff] %v4196_v4  ;;  %6891 = vst [vmem:[#allocation84_spill] sm:$0xff] %v4199_v11  ;;  %v4249_v40 = vmul.f32 %v6871_v59, %v6900_v31  ;;  %v4253_v9 = vmul.f32 %v6871_v59, %v6901_v25  ;;  %v4256_v0 = vld [vmem:[%s2875_s9 + $0x178] sm:$0x3]  ;;  %v4259_v27 = vld [vmem:[%s2875_s9 + $0x190] sm:$0x3]  ;;  %v4275_v25 = vmul.f32 %v4199_v11, %v6871_v59 }
  0xb2   : > { %6894 = vst [vmem:[#allocation13_spill] sm:$0xff] %v4218_v33  ;;  %6898 = vst [vmem:[#allocation9_spill] sm:$0xff] %v4237_v22  ;;  %v6903_v26 = vld [vmem:[#allocation63_spill] sm:$0xff]  ;;  %v6904_v16 = vld [vmem:[#allocation64_spill] sm:$0xff] }
  0xb3   : > { %6902 = vst [vmem:[#allocation12_spill] sm:$0xff] %v4256_v0  ;;  %v4267_v3 = vmul.f32 %v6871_v59, %v6903_v26  ;;  %v4271_v31 = vmul.f32 %v6871_v59, %v6904_v16  ;;  %v6905_v45 = vld [vmem:[#allocation68_spill] sm:$0xff]  ;;  %v6906_v53 = vld [vmem:[#allocation69_spill] sm:$0xff]  ;;  %v4287_v26 = vmul.f32 %v4218_v33, %v6871_v59  ;;  %v6908_v13 = vld [vmem:[#allocation74_spill] sm:$0xff] }
  0xb4   : > { %v4279_v44 = vmul.f32 %v6871_v59, %v6905_v45  ;;  %v4283_v4 = vmul.f32 %v6871_v59, %v6906_v53  ;;  %v6907_v18 = vld [vmem:[#allocation73_spill] sm:$0xff]  ;;  %v4295_v11 = vmul.f32 %v6871_v59, %v6908_v13  ;;  %v4299_v45 = vmul.f32 %v4237_v22, %v6871_v59  ;;  %v6909_v42 = vld [vmem:[#allocation78_spill] sm:$0xff]  ;;  %v6910_v36 = vld [vmem:[#allocation79_spill] sm:$0xff] }
  0xb5   : > { %v4291_v16 = vmul.f32 %v6871_v59, %v6907_v18  ;;  %v4303_v53 = vmul.f32 %v6871_v59, %v6909_v42  ;;  %v4307_v33 = vmul.f32 %v6871_v59, %v6910_v36  ;;  %v4311_v18 = vmul.f32 %v4256_v0, %v6871_v59  ;;  %v6911_v2 = vld [vmem:[#allocation34_spill] sm:$0xff] }
  0xb6   : > { %v4315_v13 = vmul.f32 %v6911_v2, %v6871_v59  ;;  %v4319_v22 = vmul.f32 %v3955_v1, %v6871_v59  ;;  %v4323_v42 = vmul.f32 %v4259_v27, %v6871_v59  ;;  %v1063_v36 = vrot.slane %v4106_v24, 1 }
  0xb7   : > { %v1067_v0 = vrot.slane %v4114_v63, 1  ;;  %v1070_v2 = vrot.slane %v4125_v60, 1  ;;  %v1073_v1 = vrot.slane %v4133_v34, 1  ;;  %v1077_v24 = vrot.slane %v4147_v41, 1 }
  0xb8   : > { %v4334_v19 = vsel %vm455_vm0, %v1062_v39, %v1063_v36  ;;  %v4337_v59 = vsel %vm455_vm0, %v1063_v36, %v1065_v55  ;;  %v1078_v60 = vrot.slane %v4151_v37, 1  ;;  %v1080_v55 = vrot.slane %v4155_v56, 1 }
  0xb9   : > { %v4342_v6 = vsel %vm455_vm0, %v1067_v0, %v1068_v61  ;;  %v4345_v63 = vsel %vm455_vm0, %v1068_v61, %v1070_v2  ;;  %v4348_v52 = vsel %vm455_vm0, %v1072_v23, %v1073_v1  ;;  %v4352_v39 = vsel %vm455_vm0, %v1073_v1, %v1075_v38 }
  0xba   : > { %v1083_v34 = vrot.slane %v4166_v43, 1  ;;  %v4358_v58 = vsel %vm455_vm0, %v1077_v24, %v1078_v60  ;;  %v1085_v61 = vrot.slane %v4170_v7, 1  ;;  %v1087_v2 = vrot.slane %v4174_v17, 1 }
  0xbb   : > { %v1088_v23 = vrot.slane %v4181_v30, 1  ;;  %v4364_v41 = vsel %vm455_vm0, %v1078_v60, %v1080_v55  ;;  %v1090_v37 = vrot.slane %v4185_v50, 1  ;;  %v1092_v56 = vrot.slane %v4189_v35, 1 }
  0xbc   : > { %v4367_v1 = vsel %vm455_vm0, %v1082_v12, %v1083_v34  ;;  %v1086_v49 = vsel %vm455_vm0, %v1083_v34, %v1085_v61  ;;  %v1093_v7 = vrot.slane %v4193_v21, 1  ;;  %v1095_v17 = vrot.slane %v4203_v51, 1 }
  0xbd   : > { %v1089_v43 = vsel %vm455_vm0, %v1087_v2, %v1088_v23  ;;  %v1091_v30 = vsel %vm455_vm0, %v1088_v23, %v1090_v37  ;;  %v1097_v0 = vrot.slane %v4207_v10, 1  ;;  %v1098_v36 = vrot.slane %v4211_v29, 1 }
  0xbe   : > { %v1100_v38 = vrot.slane %v4215_v46, 1  ;;  %v1094_v50 = vsel %vm455_vm0, %v1092_v56, %v1093_v7  ;;  %v1096_v35 = vsel %vm455_vm0, %v1093_v7, %v1095_v17  ;;  %v1102_v24 = vrot.slane %v4222_v5, 1 }
  0xbf   : > { %v1103_v60 = vrot.slane %v4226_v8, 1  ;;  %v1099_v21 = vsel %vm455_vm0, %v1097_v0, %v1098_v36  ;;  %v1105_v55 = vrot.slane %v4230_v47, 1  ;;  %v1107_v10 = vrot.slane %v4234_v62, 1 }
  0xc0   : > { %v1101_v51 = vsel %vm455_vm0, %v1098_v36, %v1100_v38  ;;  %v1108_v46 = vrot.slane %v4241_v20, 1  ;;  %v1110_v12 = vrot.slane %v4245_v28, 1  ;;  %v1112_v34 = vrot.slane %v4249_v40, 1 }
  0xc1   : > { %v1104_v29 = vsel %vm455_vm0, %v1102_v24, %v1103_v60  ;;  %v1106_v5 = vsel %vm455_vm0, %v1103_v60, %v1105_v55  ;;  %v1113_v8 = vrot.slane %v4253_v9, 1  ;;  %v1115_v61 = vrot.slane %v4263_v14, 1 }
  0xc2   : > { %v1117_v2 = vrot.slane %v4267_v3, 1  ;;  %v1109_v47 = vsel %vm455_vm0, %v1107_v10, %v1108_v46  ;;  %v1111_v62 = vsel %vm455_vm0, %v1108_v46, %v1110_v12  ;;  %v1118_v23 = vrot.slane %v4271_v31, 1  ;;  %v6916_v10 = vld [vmem:[#allocation62_spill] sm:$0xff] }
  0xc3   : > { %v1120_v20 = vrot.slane %v4275_v25, 1  ;;  %v1114_v28 = vsel %vm455_vm0, %v1112_v34, %v1113_v8  ;;  %v1116_v40 = vsel %vm455_vm0, %v1113_v8, %v1115_v61  ;;  %v1122_v37 = vrot.slane %v4279_v44, 1  ;;  %v6926_v34 = vld [vmem:[#allocation85_spill] sm:$0xff]  ;;  %v6928_v8 = vld [vmem:[#allocation86_spill] sm:$0xff] }
  0xc4   : > { %v1123_v9 = vrot.slane %v4283_v4, 1  ;;  %v1119_v14 = vsel %vm455_vm0, %v1117_v2, %v1118_v23  ;;  %v1125_v56 = vrot.slane %v4287_v26, 1  ;;  %v1127_v7 = vrot.slane %v4291_v16, 1 }
  0xc5   : > { %v1121_v3 = vsel %vm455_vm0, %v1118_v23, %v1120_v20  ;;  %v1128_v25 = vrot.slane %v4295_v11, 1  ;;  %v1130_v17 = vrot.slane %v4299_v45, 1  ;;  %v1132_v0 = vrot.slane %v4303_v53, 1 }
  0xc6   : > { %v1124_v31 = vsel %vm455_vm0, %v1122_v37, %v1123_v9  ;;  %v1126_v44 = vsel %vm455_vm0, %v1123_v9, %v1125_v56  ;;  %v1133_v4 = vrot.slane %v4307_v33, 1  ;;  %v1135_v36 = vrot.slane %v4311_v18, 1  ;;  %v6945_v56 = vld [vmem:[#allocation37_spill] sm:$0xff] }
  0xc7   : > { %v1137_v38 = vrot.slane %v4315_v13, 1  ;;  %v1129_v26 = vsel %vm455_vm0, %v1127_v7, %v1128_v25  ;;  %v1131_v16 = vsel %vm455_vm0, %v1128_v25, %v1130_v17  ;;  %v1138_v24 = vrot.slane %v4319_v22, 1  ;;  %v6947_v7 = vld [vmem:[#allocation38_spill] sm:$0xff]  ;;  %v6949_v25 = vld [vmem:[#allocation41_spill] sm:$0xff] }
  0xc8   : > { %v1140_v11 = vrot.slane %v4323_v42, 1  ;;  %v1134_v45 = vsel %vm455_vm0, %v1132_v0, %v1133_v4  ;;  %v1136_v53 = vsel %vm455_vm0, %v1133_v4, %v1135_v36  ;;  %v4423_v60 = vadd.f32 %v4334_v19, %v3990_v48  ;;  %v6912_v19 = vld [vmem:[#allocation48_spill] sm:$0xff]  ;;  %v6951_v17 = vld [vmem:[#allocation46_spill] sm:$0xff]  ;;  %v6953_v4 = vld [vmem:[#allocation47_spill] sm:$0xff] }
  0xc9   : > { %v4427_v33 = vadd.f32 %v4337_v59, %v3993_v57  ;;  %v1139_v18 = vsel %vm455_vm0, %v1137_v38, %v1138_v24  ;;  %v4433_v22 = vadd.f32 %v4342_v6, %v3996_v15  ;;  %v4437_v42 = vadd.f32 %v4345_v63, %v3999_v32  ;;  %v6914_v59 = vld [vmem:[#allocation57_spill] sm:$0xff]  ;;  %v6918_v6 = vld [vmem:[#allocation67_spill] sm:$0xff]  ;;  %v6920_v63 = vld [vmem:[#allocation72_spill] sm:$0xff] }
  0xca   : > { %v1141_v13 = vsel %vm455_vm0, %v1138_v24, %v1140_v11  ;;  %v4441_v48 = vadd.f32 %v4348_v52, %v4002_v54  ;;  %v4445_v57 = vadd.f32 %v4352_v39, %v6912_v19  ;;  %v4449_v55 = vadd.f32 %v4358_v58, %v6914_v59  ;;  %v6922_v54 = vld [vmem:[#allocation77_spill] sm:$0xff]  ;;  %v6924_v39 = vld [vmem:[#allocation82_spill] sm:$0xff]  ;;  %v6955_v38 = vld [vmem:[#allocation51_spill] sm:$0xff] }
  0xcb   : > { %v4453_v15 = vadd.f32 %v4364_v41, %v6916_v10  ;;  %v4457_v32 = vadd.f32 %v4367_v1, %v6918_v6  ;;  %v4460_v46 = vadd.f32 %v1086_v49, %v6920_v63  ;;  %v4463_v52 = vadd.f32 %v1089_v43, %v6922_v54  ;;  %v6930_v41 = vld [vmem:[#allocation87_spill] sm:$0xff]  ;;  %v6932_v1 = vld [vmem:[#allocation88_spill] sm:$0xff]  ;;  %v6934_v49 = vld [vmem:[#allocation89_spill] sm:$0xff] }
  0xcc   : > { %6913 = vst [vmem:[#allocation10_spill] sm:$0xff] %v4445_v57  ;;  %6915 = vst [vmem:[#allocation11_spill] sm:$0xff] %v4449_v55  ;;  %v4466_v12 = vadd.f32 %v1091_v30, %v6924_v39  ;;  %v4469_v58 = vadd.f32 %v1094_v50, %v6926_v34  ;;  %v4472_v61 = vadd.f32 %v1096_v35, %v6928_v8  ;;  %v6936_v43 = vld [vmem:[#allocation24_spill] sm:$0xff]  ;;  %v6938_v30 = vld [vmem:[#allocation27_spill] sm:$0xff] }
  0xcd   : > { %6917 = vst [vmem:[#allocation17_spill] sm:$0xff] %v4453_v15  ;;  %6919 = vst [vmem:[#allocation20_spill] sm:$0xff] %v4457_v32  ;;  %v4475_v2 = vadd.f32 %v1099_v21, %v6930_v41  ;;  %v4478_v23 = vadd.f32 %v1101_v51, %v6932_v1  ;;  %v4481_v20 = vadd.f32 %v1104_v29, %v6934_v49  ;;  %v6940_v50 = vld [vmem:[#allocation28_spill] sm:$0xff]  ;;  %v6943_v51 = vld [vmem:[#allocation33_spill] sm:$0xff] }
  0xce   : > { %6921 = vst [vmem:[#allocation23_spill] sm:$0xff] %v4460_v46  ;;  %6923 = vst [vmem:[#allocation29_spill] sm:$0xff] %v4463_v52  ;;  %v4484_v37 = vadd.f32 %v1106_v5, %v6936_v43  ;;  %v4487_v9 = vadd.f32 %v1109_v47, %v6938_v30  ;;  %v4490_v35 = vadd.f32 %v1111_v62, %v6940_v50  ;;  %v4495_v21 = vld [vmem:[%s6387_s1 + $0x8] ss:$0 sm:$0xff]  ;;  %v6961_v19 = vld [vmem:[#allocation61_spill] sm:$0xff] }
  0xcf   : > { %6925 = vst [vmem:[#allocation15_spill] sm:$0xff] %v4466_v12  ;;  %6927 = vst [vmem:[#allocation14_spill] sm:$0xff] %v4469_v58  ;;  %v4498_v29 = vadd.f32 %v1114_v28, %v6943_v51  ;;  %v4501_v5 = vadd.f32 %v1116_v40, %v6945_v56  ;;  %v4504_v47 = vadd.f32 %v1119_v14, %v6947_v7  ;;  %v6957_v24 = vld [vmem:[#allocation52_spill] sm:$0xff]  ;;  %v6963_v59 = vld [vmem:[#allocation65_spill] sm:$0xff] }
  0xd0   : > { %6929 = vst [vmem:[#allocation16_spill] sm:$0xff] %v4472_v61  ;;  %6931 = vst [vmem:[#allocation18_spill] sm:$0xff] %v4475_v2  ;;  %v4507_v62 = vadd.f32 %v1121_v3, %v6949_v25  ;;  %v4510_v0 = vadd.f32 %v1124_v31, %v6951_v17  ;;  %v4513_v36 = vadd.f32 %v1126_v44, %v6953_v4  ;;  %v6959_v11 = vld [vmem:[#allocation60_spill] sm:$0xff]  ;;  %v6965_v10 = vld [vmem:[#allocation66_spill] sm:$0xff] }
  0xd1   : > { %6933 = vst [vmem:[#allocation19_spill] sm:$0xff] %v4478_v23  ;;  %6935 = vst [vmem:[#allocation21_spill] sm:$0xff] %v4481_v20  ;;  %v4516_v28 = vadd.f32 %v1129_v26, %v6955_v38  ;;  %v4519_v40 = vadd.f32 %v1131_v16, %v6957_v24  ;;  %v4522_v14 = vadd.f32 %v1134_v45, %v6959_v11  ;;  %v4534_v6 = vld [vmem:[%s2875_s9 + $0x30] sm:$0xff]  ;;  %v4537_v26 = vld [vmem:[%s2875_s9 + $0x40] sm:$0x3] }
  0xd2   : > { %6937 = vst [vmem:[#allocation22_spill] sm:$0xff] %v4484_v37  ;;  %6939 = vst [vmem:[#allocation25_spill] sm:$0xff] %v4487_v9  ;;  %v4525_v3 = vadd.f32 %v1136_v53, %v6961_v19  ;;  %v4528_v31 = vadd.f32 %v1139_v18, %v6963_v59  ;;  %v4531_v44 = vadd.f32 %v1141_v13, %v6965_v10  ;;  %v6969_v63 = vld [vmem:[#allocation8_spill] sm:$0xff]  ;;  %v4541_v54 = vld [vmem:[%s2875_s9 + $0x38] sm:$0xff] }
  0xd3   : > { %6941 = vst [vmem:[#allocation26_spill] sm:$0xff] %v4490_v35  ;;  %6942 = vst [vmem:[#allocation30_spill] sm:$0xff] %v4495_v21  ;;  %v1208_v16 = vsub.s32 5, %v6969_v63  ;;  %v4544_v45 = vld [vmem:[%s2875_s9 + $0x48] sm:$0xff]  ;;  %v4547_v53 = vld [vmem:[%s2875_s9 + $0x50] sm:$0xff]  ;;  %v1501_v18 = vsub.s32 6, %v6969_v63  ;;  %v4553_v39 = vmul.f32 %v4495_v21, %v4534_v6  ;;  %v4563_v41 = vmul.f32 %v4495_v21, %v4541_v54 }
  0xd4   : > { %6944 = vst [vmem:[#allocation31_spill] sm:$0xff] %v4498_v29  ;;  %6946 = vst [vmem:[#allocation35_spill] sm:$0xff] %v4501_v5  ;;  %v1569_v13 = vsub.s32 7, %v6969_v63  ;;  %v4556_v34 = vld [vmem:[%s2875_s9 + $0x58] sm:$0x3]  ;;  %v4559_v8 = vld [vmem:[%s2875_s9 + $0x60] sm:$0xff]  ;;  %v4567_v1 = vmul.f32 %v4495_v21, %v4537_v26  ;;  %v4571_v49 = vmul.f32 %v4495_v21, %v4544_v45  ;;  %v4575_v43 = vmul.f32 %v4495_v21, %v4547_v53 }
  0xd5   : > { %6948 = vst [vmem:[#allocation36_spill] sm:$0xff] %v4504_v47  ;;  %6950 = vst [vmem:[#allocation39_spill] sm:$0xff] %v4507_v62  ;;  %v2630_v30 = vld [vmem:[%s6387_s1] sm:$0xff]  ;;  %v4583_v51 = vld [vmem:[%s2875_s9 + $0x68] sm:$0xff]  ;;  %v4597_v4 = vmul.f32 %v4495_v21, %v4556_v34  ;;  %v4601_v38 = vmul.f32 %v4495_v21, %v4559_v8 }
  0xd6   : > { %6952 = vst [vmem:[#allocation40_spill] sm:$0xff] %v4510_v0  ;;  %6954 = vst [vmem:[#allocation44_spill] sm:$0xff] %v4513_v36  ;;  %v4580_v50 = vrot.slane %v2630_v30, %v1208_v16  ;;  %v4586_v56 = vld [vmem:[%s2875_s9 + $0x70] sm:$0x3]  ;;  %v4589_v7 = vld [vmem:[%s2875_s9 + $0x78] sm:$0xff]  ;;  %v4591_v25 = vrot.slane %v2630_v30, %v1501_v18  ;;  %v4593_v17 = vrot.slane %v2630_v30, %v1569_v13 }
  0xd7   : > { %6956 = vst [vmem:[#allocation45_spill] sm:$0xff] %v4516_v28  ;;  %6958 = vst [vmem:[#allocation49_spill] sm:$0xff] %v4519_v40  ;;  %v4605_v24 = vmul.f32 %v4495_v21, %v4583_v51  ;;  %v4609_v11 = vmul.f32 %v4495_v21, %v4586_v56  ;;  %v4613_v19 = vmul.f32 %v4495_v21, %v4589_v7  ;;  %v2631_v59 = vld [vmem:[%s2875_s9 + $0x18] sm:$0xff]  ;;  %v2632_v63 = vld [vmem:[%s2875_s9 + $0x20] sm:$0xff] }
  0xd8   : > { %6960 = vst [vmem:[#allocation50_spill] sm:$0xff] %v4522_v14  ;;  %6962 = vst [vmem:[#allocation53_spill] sm:$0xff] %v4525_v3  ;;  %v4617_v10 = vmul.f32 %v2631_v59, %v4580_v50  ;;  %v4621_v16 = vmul.f32 %v2632_v63, %v4580_v50  ;;  %v6990_v18 = vld [vmem:[#allocation32_spill] sm:$0xff]  ;;  %v2633_v30 = vld [vmem:[%s2875_s9 + $0x30] sm:$0xff] }
  0xd9   : > { %6964 = vst [vmem:[#allocation54_spill] sm:$0xff] %v4528_v31  ;;  %6966 = vst [vmem:[#allocation58_spill] sm:$0xff] %v4531_v44  ;;  %v4625_v13 = vmul.f32 %v6990_v18, %v4580_v50  ;;  %v6991_v59 = vld [vmem:[#allocation42_spill] sm:$0xff]  ;;  %v2635_v63 = vld [vmem:[%s2875_s9 + $0x48] sm:$0xff] }
  0xda   : > { %6967 = vst [vmem:[#allocation59_spill] sm:$0xff] %v4534_v6  ;;  %6968 = vst [vmem:[#allocation63_spill] sm:$0xff] %v4537_v26  ;;  %v2636_v18 = vld [vmem:[%s2875_s9 + $0x50] sm:$0xff]  ;;  %v2658_v20 = vld [vmem:[%s2875_s9 + $0x158] sm:$0xff]  ;;  %v1306_v46 = vrot.slane %v4617_v10, 2 }
  0xdb   : > { %6970 = vst [vmem:[#allocation64_spill] sm:$0xff] %v4541_v54  ;;  %6971 = vst [vmem:[#allocation68_spill] sm:$0xff] %v4544_v45  ;;  %v2657_v37 = vld [vmem:[%s2875_s9 + $0x150] sm:$0xff]  ;;  %v2659_v2 = vld [vmem:[%s2875_s9 + $0x168] sm:$0xff]  ;;  %v1309_v32 = vrot.slane %v4625_v13, 2 }
  0xdc   : > { %6972 = vst [vmem:[#allocation69_spill] sm:$0xff] %v4547_v53  ;;  %6973 = vst [vmem:[#allocation73_spill] sm:$0xff] %v4553_v39  ;;  %v7003_v23 = vld [vmem:[#allocation9_spill] sm:$0xff]  ;;  %v7004_v58 = vld [vmem:[#allocation12_spill] sm:$0xff] }
  0xdd   : > { %6974 = vst [vmem:[#allocation74_spill] sm:$0xff] %v4556_v34  ;;  %6975 = vst [vmem:[#allocation78_spill] sm:$0xff] %v4559_v8  ;;  %v2660_v61 = vld [vmem:[%s2875_s9 + $0x170] sm:$0xff]  ;;  %v7006_v52 = vld [vmem:[#allocation43_spill] sm:$0xff] }
  0xde   : > { %6976 = vst [vmem:[#allocation79_spill] sm:$0xff] %v4563_v41  ;;  %6977 = vst [vmem:[#allocation48_spill] sm:$0xff] %v4567_v1  ;;  %v7005_v12 = vld [vmem:[#allocation34_spill] sm:$0xff] }
  0xdf   : > { %6978 = vst [vmem:[#allocation57_spill] sm:$0xff] %v4571_v49  ;;  %6979 = vst [vmem:[#allocation62_spill] sm:$0xff] %v4575_v43  ;;  %v4645_v43 = vmul.f32 %v2636_v18, %v4580_v50  ;;  %v2639_v18 = vld [vmem:[%s2875_s9 + $0x78] sm:$0xff] }
  0xe0   : > { %6980 = vst [vmem:[#allocation67_spill] sm:$0xff] %v4583_v51  ;;  %6981 = vst [vmem:[#allocation72_spill] sm:$0xff] %v4586_v56  ;;  %v4665_v21 = vmul.f32 %v2639_v18, %v4580_v50  ;;  %v6995_v18 = vld [vmem:[#allocation71_spill] sm:$0xff] }
  0xe1   : > { %6982 = vst [vmem:[#allocation77_spill] sm:$0xff] %v4589_v7  ;;  %6983 = vst [vmem:[#allocation82_spill] sm:$0xff] %v4591_v25  ;;  %v4685_v7 = vmul.f32 %v6995_v18, %v4580_v50  ;;  %v2646_v18 = vld [vmem:[%s2875_s9 + $0xc8] sm:$0xff] }
  0xe2   : > { %6984 = vst [vmem:[#allocation85_spill] sm:$0xff] %v4593_v17  ;;  %6985 = vst [vmem:[#allocation86_spill] sm:$0xff] %v4597_v4  ;;  %v4641_v4 = vmul.f32 %v2635_v63, %v4580_v50  ;;  %v6993_v63 = vld [vmem:[#allocation56_spill] sm:$0xff]  ;;  %v4705_v54 = vmul.f32 %v2646_v18, %v4580_v50  ;;  %v2649_v18 = vld [vmem:[%s2875_s9 + $0xf0] sm:$0xff] }
  0xe3   : > { %6986 = vst [vmem:[#allocation87_spill] sm:$0xff] %v4601_v38  ;;  %6987 = vst [vmem:[#allocation88_spill] sm:$0xff] %v4605_v24  ;;  %v4637_v38 = vmul.f32 %v6991_v59, %v4580_v50  ;;  %v2638_v59 = vld [vmem:[%s2875_s9 + $0x68] sm:$0xff]  ;;  %v4661_v39 = vmul.f32 %v6993_v63, %v4580_v50  ;;  %v2642_v63 = vld [vmem:[%s2875_s9 + $0x98] sm:$0xff]  ;;  %v4725_v3 = vmul.f32 %v2649_v18, %v4580_v50 }
  0xe4   : > { %6988 = vst [vmem:[#allocation89_spill] sm:$0xff] %v4609_v11  ;;  %6989 = vst [vmem:[#allocation24_spill] sm:$0xff] %v4613_v19  ;;  %v4629_v11 = vmul.f32 %v2633_v30, %v4580_v50  ;;  %v2634_v19 = vld [vmem:[%s2875_s9 + $0x38] sm:$0xff]  ;;  %v4657_v41 = vmul.f32 %v2638_v59, %v4580_v50  ;;  %v2641_v59 = vld [vmem:[%s2875_s9 + $0x90] sm:$0xff]  ;;  %v4681_v17 = vmul.f32 %v2642_v63, %v4580_v50  ;;  %v1316_v55 = vrot.slane %v4641_v4, 2 }
  0xe5   : > { %v4633_v24 = vmul.f32 %v2634_v19, %v4580_v50  ;;  %v6992_v30 = vld [vmem:[#allocation55_spill] sm:$0xff]  ;;  %v4677_v26 = vmul.f32 %v2641_v59, %v4580_v50 }
  0xe6   : > { %v4649_v49 = vmul.f32 %v6992_v30, %v4580_v50  ;;  %v2637_v19 = vld [vmem:[%s2875_s9 + $0x60] sm:$0xff] }
  0xe7   : > { %v4653_v1 = vmul.f32 %v2637_v19, %v4580_v50  ;;  %v2640_v30 = vld [vmem:[%s2875_s9 + $0x80] sm:$0xff]  ;;  %v6994_v19 = vld [vmem:[#allocation70_spill] sm:$0xff]  ;;  %v1312_v15 = vrot.slane %v4633_v24, 2 }
  0xe8   : > { %v4669_v56 = vmul.f32 %v2640_v30, %v4580_v50  ;;  %v4673_v34 = vmul.f32 %v6994_v19, %v4580_v50  ;;  %v2643_v30 = vld [vmem:[%s2875_s9 + $0xa8] sm:$0xff]  ;;  %v2644_v19 = vld [vmem:[%s2875_s9 + $0xb0] sm:$0xff]  ;;  %v6996_v59 = vld [vmem:[#allocation75_spill] sm:$0xff] }
  0xe9   : > { %v4689_v51 = vmul.f32 %v2643_v30, %v4580_v50  ;;  %v4693_v8 = vmul.f32 %v2644_v19, %v4580_v50  ;;  %v4697_v53 = vmul.f32 %v6996_v59, %v4580_v50  ;;  %v2645_v63 = vld [vmem:[%s2875_s9 + $0xc0] sm:$0xff]  ;;  %v2647_v19 = vld [vmem:[%s2875_s9 + $0xd8] sm:$0xff]  ;;  %v1321_v10 = vrot.slane %v4653_v1, 2 }
  0xea   : > { %v4701_v45 = vmul.f32 %v2645_v63, %v4580_v50  ;;  %v6997_v30 = vld [vmem:[#allocation76_spill] sm:$0xff]  ;;  %v4713_v25 = vmul.f32 %v2647_v19, %v4580_v50  ;;  %v6999_v19 = vld [vmem:[#allocation81_spill] sm:$0xff]  ;;  %v7000_v18 = vld [vmem:[#allocation83_spill] sm:$0xff]  ;;  %v1327_v1 = vrot.slane %v4669_v56, 2 }
  0xeb   : > { %v4709_v6 = vmul.f32 %v6997_v30, %v4580_v50  ;;  %v2648_v59 = vld [vmem:[%s2875_s9 + $0xe0] sm:$0xff]  ;;  %v2650_v30 = vld [vmem:[%s2875_s9 + $0xf8] sm:$0xff]  ;;  %v4733_v40 = vmul.f32 %v6999_v19, %v4580_v50  ;;  %v4745_v0 = vmul.f32 %v7000_v18, %v4580_v50  ;;  %v2654_v19 = vld [vmem:[%s2875_s9 + $0x128] sm:$0xff] }
  0xec   : > { %v4717_v44 = vmul.f32 %v2648_v59, %v4580_v50  ;;  %v6998_v63 = vld [vmem:[#allocation80_spill] sm:$0xff]  ;;  %v4729_v14 = vmul.f32 %v2650_v30, %v4580_v50  ;;  %v4753_v47 = vmul.f32 %v2654_v19, %v4580_v50  ;;  %v4773_v19 = vmul.f32 %v2657_v37, %v4580_v50 }
  0xed   : > { %v4721_v31 = vmul.f32 %v6998_v63, %v4580_v50  ;;  %v2651_v59 = vld [vmem:[%s2875_s9 + $0x108] sm:$0xff]  ;;  %v2652_v63 = vld [vmem:[%s2875_s9 + $0x110] sm:$0xff]  ;;  %v2653_v30 = vld [vmem:[%s2875_s9 + $0x120] sm:$0xff]  ;;  %v4793_v37 = vmul.f32 %v7004_v58, %v4580_v50  ;;  %v1311_v58 = vrot.slane %v4629_v11, 2  ;;  %v1341_v13 = vrot.slane %v4701_v45, 2 }
  0xee   : > { %v4737_v28 = vmul.f32 %v2651_v59, %v4580_v50  ;;  %v4741_v36 = vmul.f32 %v2652_v63, %v4580_v50  ;;  %v4749_v62 = vmul.f32 %v2653_v30, %v4580_v50  ;;  %v7001_v59 = vld [vmem:[#allocation84_spill] sm:$0xff]  ;;  %v2655_v63 = vld [vmem:[%s2875_s9 + $0x138] sm:$0xff]  ;;  %v7002_v30 = vld [vmem:[#allocation13_spill] sm:$0xff]  ;;  %v1351_v45 = vrot.slane %v4725_v3, 2 }
  0xef   : > { %v4757_v5 = vmul.f32 %v7001_v59, %v4580_v50  ;;  %v4761_v29 = vmul.f32 %v2655_v63, %v4580_v50  ;;  %v2656_v18 = vld [vmem:[%s2875_s9 + $0x140] sm:$0xff]  ;;  %v4769_v9 = vmul.f32 %v7002_v30, %v4580_v50  ;;  %v4777_v59 = vmul.f32 %v2658_v20, %v4580_v50 }
  0xf0   : > { %v4765_v35 = vmul.f32 %v2656_v18, %v4580_v50  ;;  %v4781_v63 = vmul.f32 %v7003_v23, %v4580_v50  ;;  %v4785_v18 = vmul.f32 %v2659_v2, %v4580_v50  ;;  %v4789_v30 = vmul.f32 %v2660_v61, %v4580_v50 }
  0xf1   : > { %v4797_v20 = vmul.f32 %v7005_v12, %v4580_v50  ;;  %v4801_v23 = vmul.f32 %v7006_v52, %v4580_v50  ;;  %v4805_v2 = vmul.f32 %v4259_v27, %v4580_v50  ;;  %v1307_v61 = vrot.slane %v4621_v16, 2 }
  0xf2   : > { %v1314_v12 = vrot.slane %v4637_v38, 2  ;;  %v1317_v52 = vrot.slane %v4645_v43, 2  ;;  %v1319_v50 = vrot.slane %v4649_v49, 2  ;;  %v4824_v11 = vsel %vm700_vm1, %v1311_v58, %v1312_v15 }
  0xf3   : > { %v4816_v57 = vsel %vm700_vm1, %v1306_v46, %v1307_v61  ;;  %v4819_v27 = vsel %vm700_vm1, %v1307_v61, %v1309_v32  ;;  %v1322_v43 = vrot.slane %v4657_v41, 2  ;;  %v1324_v32 = vrot.slane %v4661_v39, 2 }
  0xf4   : > { %v4827_v24 = vsel %vm700_vm1, %v1312_v15, %v1314_v12  ;;  %v4830_v4 = vsel %vm700_vm1, %v1316_v55, %v1317_v52  ;;  %v4834_v46 = vsel %vm700_vm1, %v1317_v52, %v1319_v50  ;;  %v1326_v49 = vrot.slane %v4665_v21, 2 }
  0xf5   : > { %v4840_v38 = vsel %vm700_vm1, %v1321_v10, %v1322_v43  ;;  %v1329_v15 = vrot.slane %v4673_v34, 2  ;;  %v1331_v12 = vrot.slane %v4677_v26, 2  ;;  %v1332_v55 = vrot.slane %v4681_v17, 2 }
  0xf6   : > { %v4846_v41 = vsel %vm700_vm1, %v1322_v43, %v1324_v32  ;;  %v4849_v52 = vsel %vm700_vm1, %v1326_v49, %v1327_v1  ;;  %v1334_v39 = vrot.slane %v4685_v7, 2  ;;  %v1336_v21 = vrot.slane %v4689_v51, 2 }
  0xf7   : > { %v1330_v56 = vsel %vm700_vm1, %v1327_v1, %v1329_v15  ;;  %v1333_v16 = vsel %vm700_vm1, %v1331_v12, %v1332_v55  ;;  %v1337_v34 = vrot.slane %v4693_v8, 2  ;;  %v1339_v26 = vrot.slane %v4697_v53, 2 }
  0xf8   : > { %v1335_v17 = vsel %vm700_vm1, %v1332_v55, %v1334_v39  ;;  %v1342_v61 = vrot.slane %v4705_v54, 2  ;;  %v1344_v58 = vrot.slane %v4709_v6, 2  ;;  %v1346_v50 = vrot.slane %v4713_v25, 2 }
  0xf9   : > { %v1338_v7 = vsel %vm700_vm1, %v1336_v21, %v1337_v34  ;;  %v1340_v51 = vsel %vm700_vm1, %v1337_v34, %v1339_v26  ;;  %v1347_v10 = vrot.slane %v4717_v44, 2  ;;  %v1349_v43 = vrot.slane %v4721_v31, 2 }
  0xfa   : > { %v1343_v8 = vsel %vm700_vm1, %v1341_v13, %v1342_v61  ;;  %v1345_v53 = vsel %vm700_vm1, %v1342_v61, %v1344_v58  ;;  %v1352_v6 = vrot.slane %v4729_v14, 2  ;;  %v1354_v32 = vrot.slane %v4733_v40, 2 }
  0xfb   : > { %v1348_v54 = vsel %vm700_vm1, %v1346_v50, %v1347_v10  ;;  %v1356_v49 = vrot.slane %v4737_v28, 2  ;;  %v1350_v25 = vsel %vm700_vm1, %v1347_v10, %v1349_v43  ;;  %v1357_v44 = vrot.slane %v4741_v36, 2  ;;  %v7009_v43 = vld [vmem:[#allocation17_spill] sm:$0xff] }
  0xfc   : > { %v1359_v1 = vrot.slane %v4745_v0, 2  ;;  %v1361_v15 = vrot.slane %v4749_v62, 2  ;;  %v1353_v31 = vsel %vm700_vm1, %v1351_v45, %v1352_v6  ;;  %v1355_v3 = vsel %vm700_vm1, %v1352_v6, %v1354_v32  ;;  %v7013_v45 = vld [vmem:[#allocation15_spill] sm:$0xff]  ;;  %v7014_v6 = vld [vmem:[#allocation14_spill] sm:$0xff] }
  0xfd   : > { %v1362_v12 = vrot.slane %v4753_v47, 2  ;;  %v1364_v14 = vrot.slane %v4757_v5, 2  ;;  %v1358_v40 = vsel %vm700_vm1, %v1356_v49, %v1357_v44  ;;  %v1366_v55 = vrot.slane %v4761_v29, 2 }
  0xfe   : > { %v1360_v28 = vsel %vm700_vm1, %v1357_v44, %v1359_v1  ;;  %v1367_v36 = vrot.slane %v4765_v35, 2  ;;  %v1369_v39 = vrot.slane %v4769_v9, 2  ;;  %v1371_v21 = vrot.slane %v4773_v19, 2  ;;  %v7017_v1 = vld [vmem:[#allocation19_spill] sm:$0xff] }
  0xff   : > { %v1363_v0 = vsel %vm700_vm1, %v1361_v15, %v1362_v12  ;;  %v1365_v62 = vsel %vm700_vm1, %v1362_v12, %v1364_v14  ;;  %v1372_v5 = vrot.slane %v4777_v59, 2  ;;  %v1374_v34 = vrot.slane %v4781_v63, 2  ;;  %v7018_v15 = vld [vmem:[#allocation21_spill] sm:$0xff]  ;;  %v7019_v12 = vld [vmem:[#allocation22_spill] sm:$0xff] }
 0x100   : > { %v1368_v47 = vsel %vm700_vm1, %v1366_v55, %v1367_v36  ;;  %v1376_v26 = vrot.slane %v4785_v18, 2  ;;  %v1370_v29 = vsel %vm700_vm1, %v1367_v36, %v1369_v39  ;;  %v1377_v35 = vrot.slane %v4789_v30, 2  ;;  %v7020_v14 = vld [vmem:[#allocation25_spill] sm:$0xff] }
 0x101   : > { %v1379_v13 = vrot.slane %v4793_v37, 2  ;;  %v1381_v61 = vrot.slane %v4797_v20, 2  ;;  %v1373_v9 = vsel %vm700_vm1, %v1371_v21, %v1372_v5  ;;  %v1375_v19 = vsel %vm700_vm1, %v1372_v5, %v1374_v34  ;;  %v7024_v21 = vld [vmem:[#allocation36_spill] sm:$0xff]  ;;  %v7025_v5 = vld [vmem:[#allocation39_spill] sm:$0xff] }
 0x102   : > { %v1382_v58 = vrot.slane %v4801_v23, 2  ;;  %v1384_v59 = vrot.slane %v4805_v2, 2  ;;  %v1378_v63 = vsel %vm700_vm1, %v1376_v26, %v1377_v35  ;;  %v4905_v50 = vadd.f32 %v4816_v57, %v4423_v60  ;;  %v7007_v57 = vld [vmem:[#allocation10_spill] sm:$0xff]  ;;  %v4987_v34 = vld [vmem:[%s2875_s9 + $0x80] sm:$0xff] }
 0x103   : > { %v1380_v18 = vsel %vm700_vm1, %v1377_v35, %v1379_v13  ;;  %v4909_v30 = vadd.f32 %v4819_v27, %v4427_v33  ;;  %v4915_v23 = vadd.f32 %v4824_v11, %v4433_v22  ;;  %v4919_v2 = vadd.f32 %v4827_v24, %v4437_v42  ;;  %v7008_v27 = vld [vmem:[#allocation11_spill] sm:$0xff]  ;;  %v7010_v11 = vld [vmem:[#allocation20_spill] sm:$0xff]  ;;  %7026 = vst [vmem:[#allocation27_spill] sm:$0xff] %v4987_v34  ;;  %v7033_v35 = vld [vmem:[#allocation45_spill] sm:$0xff] }
 0x104   : > { %v1383_v37 = vsel %vm700_vm1, %v1381_v61, %v1382_v58  ;;  %v1385_v20 = vsel %vm700_vm1, %v1382_v58, %v1384_v59  ;;  %v4923_v60 = vadd.f32 %v4830_v4, %v4441_v48  ;;  %v4927_v33 = vadd.f32 %v4834_v46, %v7007_v57  ;;  %v7011_v24 = vld [vmem:[#allocation23_spill] sm:$0xff]  ;;  %v7012_v4 = vld [vmem:[#allocation29_spill] sm:$0xff]  ;;  %v7031_v26 = vld [vmem:[#allocation44_spill] sm:$0xff] }
 0x105   : > { %v4931_v10 = vadd.f32 %v4840_v38, %v7008_v27  ;;  %v4935_v22 = vadd.f32 %v4846_v41, %v7009_v43  ;;  %v4939_v42 = vadd.f32 %v4849_v52, %v7010_v11  ;;  %v4942_v48 = vadd.f32 %v1330_v56, %v7011_v24  ;;  %v7015_v41 = vld [vmem:[#allocation16_spill] sm:$0xff]  ;;  %v7016_v52 = vld [vmem:[#allocation18_spill] sm:$0xff]  ;;  %v7035_v13 = vld [vmem:[#allocation49_spill] sm:$0xff] }
 0x106   : > { %v4945_v46 = vadd.f32 %v1333_v16, %v7012_v4  ;;  %v4948_v38 = vadd.f32 %v1335_v17, %v7013_v45  ;;  %v4951_v32 = vadd.f32 %v1338_v7, %v7014_v6  ;;  %v4954_v49 = vadd.f32 %v1340_v51, %v7015_v41  ;;  %v7021_v51 = vld [vmem:[#allocation26_spill] sm:$0xff]  ;;  %v5008_v58 = vld [vmem:[%s2875_s9 + $0xa8] sm:$0xff]  ;;  %v5014_v57 = vld [vmem:[%s2875_s9 + $0xc0] sm:$0xff] }
 0x107   : > { %v4957_v44 = vadd.f32 %v1343_v8, %v7016_v52  ;;  %v4960_v56 = vadd.f32 %v1345_v53, %v7017_v1  ;;  %v4963_v16 = vadd.f32 %v1348_v54, %v7018_v15  ;;  %v4966_v17 = vadd.f32 %v1350_v25, %v7019_v12  ;;  %v7022_v8 = vld [vmem:[#allocation31_spill] sm:$0xff]  ;;  %7037 = vst [vmem:[#allocation47_spill] sm:$0xff] %v5008_v58  ;;  %v5011_v59 = vld [vmem:[%s2875_s9 + $0xb0] sm:$0xff]  ;;  %v5029_v4 = vld [vmem:[%s2875_s9 + $0xc8] sm:$0xff] }
 0x108   : > { %v4969_v7 = vadd.f32 %v1353_v31, %v7020_v14  ;;  %v4972_v55 = vadd.f32 %v1355_v3, %v7021_v51  ;;  %v4975_v36 = vadd.f32 %v1358_v40, %v7022_v8  ;;  %v7023_v53 = vld [vmem:[#allocation35_spill] sm:$0xff]  ;;  %v4981_v54 = vadd.f32 %v1363_v0, %v7024_v21  ;;  %v4990_v31 = vld [vmem:[%s2875_s9 + $0x90] sm:$0xff]  ;;  %v7029_v40 = vld [vmem:[#allocation40_spill] sm:$0xff]  ;;  %7038 = vst [vmem:[#allocation51_spill] sm:$0xff] %v5011_v59 }
 0x109   : > { %v4978_v39 = vadd.f32 %v1360_v28, %v7023_v53  ;;  %v4984_v25 = vadd.f32 %v1365_v62, %v7025_v5  ;;  %7027 = vst [vmem:[#allocation28_spill] sm:$0xff] %v4990_v31  ;;  %v4993_v3 = vld [vmem:[%s2875_s9 + $0x98] sm:$0xff]  ;;  %v4996_v28 = vadd.f32 %v1368_v47, %v7029_v40  ;;  %v4999_v0 = vadd.f32 %v1370_v29, %v7031_v26  ;;  %v7042_v43 = vld [vmem:[#allocation53_spill] sm:$0xff]  ;;  %v5035_v6 = vld [vmem:[%s2875_s9 + $0xe0] sm:$0xff] }
 0x10a   : > { %7028 = vst [vmem:[#allocation33_spill] sm:$0xff] %v4993_v3  ;;  %v5002_v62 = vadd.f32 %v1373_v9, %v7033_v35  ;;  %v5005_v61 = vadd.f32 %v1375_v19, %v7035_v13  ;;  %7039 = vst [vmem:[#allocation52_spill] sm:$0xff] %v5014_v57  ;;  %v7040_v27 = vld [vmem:[#allocation50_spill] sm:$0xff]  ;;  %v5020_v29 = vadd.f32 %v1380_v18, %v7042_v43  ;;  %v5044_v18 = vld [vmem:[%s2875_s9 + $0x108] sm:$0xff] }
 0x10b   : > { %7030 = vst [vmem:[#allocation37_spill] sm:$0xff] %v4996_v28  ;;  %7032 = vst [vmem:[#allocation38_spill] sm:$0xff] %v4999_v0  ;;  %v5017_v47 = vadd.f32 %v1378_v63, %v7040_v27  ;;  %v7044_v9 = vld [vmem:[#allocation54_spill] sm:$0xff]  ;;  %v7055_v52 = vld [vmem:[#allocation59_spill] sm:$0xff] }
 0x10c   : > { %7034 = vst [vmem:[#allocation41_spill] sm:$0xff] %v5002_v62  ;;  %7036 = vst [vmem:[#allocation46_spill] sm:$0xff] %v5005_v61  ;;  %v5023_v11 = vadd.f32 %v1383_v37, %v7044_v9  ;;  %v7046_v19 = vld [vmem:[#allocation58_spill] sm:$0xff]  ;;  %v7057_v12 = vld [vmem:[#allocation68_spill] sm:$0xff] }
 0x10d   : > { %7041 = vst [vmem:[#allocation60_spill] sm:$0xff] %v5017_v47  ;;  %7043 = vst [vmem:[#allocation61_spill] sm:$0xff] %v5020_v29  ;;  %v5026_v24 = vadd.f32 %v1385_v20, %v7046_v19  ;;  %v5032_v45 = vld [vmem:[%s2875_s9 + $0xd8] sm:$0xff]  ;;  %v5038_v63 = vld [vmem:[%s2875_s9 + $0xf0] sm:$0xff] }
 0x10e   : > { %7045 = vst [vmem:[#allocation65_spill] sm:$0xff] %v5023_v11  ;;  %7048 = vst [vmem:[#allocation8_spill] sm:$0xff] %v5029_v4  ;;  %v5041_v41 = vld [vmem:[%s2875_s9 + $0xf8] sm:$0xff]  ;;  %v7056_v20 = vld [vmem:[#allocation64_spill] sm:$0xff] }
 0x10f   : > { %7047 = vst [vmem:[#allocation66_spill] sm:$0xff] %v5026_v24  ;;  %7049 = vst [vmem:[#allocation32_spill] sm:$0xff] %v5032_v45  ;;  %v7054_v37 = vld [vmem:[#allocation82_spill] sm:$0xff]  ;;  %v7058_v51 = vld [vmem:[#allocation69_spill] sm:$0xff] }
 0x110   : > { %7050 = vst [vmem:[#allocation42_spill] sm:$0xff] %v5035_v6  ;;  %7051 = vst [vmem:[#allocation55_spill] sm:$0xff] %v5038_v63  ;;  %v1503_v1 = vmul.f32 %v7055_v52, %v7054_v37  ;;  %v1504_v15 = vmul.f32 %v7056_v20, %v7054_v37  ;;  %v1505_v14 = vmul.f32 %v7057_v12, %v7054_v37  ;;  %v5055_v53 = vld [vmem:[%s2875_s9 + $0x110] sm:$0xff]  ;;  %v5058_v21 = vld [vmem:[%s2875_s9 + $0x120] sm:$0xff] }
 0x111   : > { %7052 = vst [vmem:[#allocation56_spill] sm:$0xff] %v5041_v41  ;;  %7053 = vst [vmem:[#allocation70_spill] sm:$0xff] %v5044_v18  ;;  %v1506_v8 = vmul.f32 %v7058_v51, %v7054_v37  ;;  %v5061_v5 = vld [vmem:[%s2875_s9 + $0x128] sm:$0xff]  ;;  %v7062_v40 = vld [vmem:[#allocation78_spill] sm:$0xff]  ;;  %v1510_v9 = vmul.f32 %v4987_v34, %v7054_v37  ;;  %v1514_v20 = vmul.f32 %v5011_v59, %v7054_v37 }
 0x112   : > { %7059 = vst [vmem:[#allocation71_spill] sm:$0xff] %v5055_v53  ;;  %7060 = vst [vmem:[#allocation75_spill] sm:$0xff] %v5058_v21  ;;  %v1507_v26 = vmul.f32 %v7062_v40, %v7054_v37  ;;  %v7063_v35 = vld [vmem:[#allocation67_spill] sm:$0xff]  ;;  %v7064_v27 = vld [vmem:[#allocation77_spill] sm:$0xff]  ;;  %v1511_v40 = vmul.f32 %v4990_v31, %v7054_v37  ;;  %v1515_v11 = vmul.f32 %v5014_v57, %v7054_v37 }
 0x113   : > { %7061 = vst [vmem:[#allocation76_spill] sm:$0xff] %v5061_v5  ;;  %v1508_v13 = vmul.f32 %v7063_v35, %v7054_v37  ;;  %v1509_v43 = vmul.f32 %v7064_v27, %v7054_v37  ;;  %v5072_v19 = vld [vmem:[%s2875_s9 + $0x138] sm:$0xff]  ;;  %v5075_v51 = vld [vmem:[%s2875_s9 + $0x140] sm:$0xff]  ;;  %v5078_v12 = vld [vmem:[%s2875_s9 + $0x150] sm:$0xff]  ;;  %v1512_v35 = vmul.f32 %v4993_v3, %v7054_v37  ;;  %v1513_v27 = vmul.f32 %v5008_v58, %v7054_v37 }
 0x114   : > { %7065 = vst [vmem:[#allocation80_spill] sm:$0xff] %v5072_v19  ;;  %7066 = vst [vmem:[#allocation81_spill] sm:$0xff] %v5075_v51  ;;  %v5089_v34 = vld [vmem:[%s2875_s9 + $0x158] sm:$0xff]  ;;  %v5092_v52 = vld [vmem:[%s2875_s9 + $0x168] sm:$0xff]  ;;  %v1516_v31 = vmul.f32 %v5029_v4, %v7054_v37  ;;  %v1517_v3 = vmul.f32 %v5032_v45, %v7054_v37  ;;  %v1518_v58 = vmul.f32 %v5035_v6, %v7054_v37 }
 0x115   : > { %7067 = vst [vmem:[#allocation83_spill] sm:$0xff] %v5078_v12  ;;  %7068 = vst [vmem:[#allocation84_spill] sm:$0xff] %v5089_v34  ;;  %v5095_v24 = vld [vmem:[%s2875_s9 + $0x170] sm:$0xff]  ;;  %v5106_v29 = vld [vmem:[%s2875_s9 + $0x198] sm:$0xff]  ;;  %v1519_v47 = vmul.f32 %v5038_v63, %v7054_v37  ;;  %v1520_v61 = vmul.f32 %v5041_v41, %v7054_v37  ;;  %v1521_v57 = vmul.f32 %v5044_v18, %v7054_v37 }
 0x116   : > { %7069 = vst [vmem:[#allocation13_spill] sm:$0xff] %v5092_v52  ;;  %7070 = vst [vmem:[#allocation9_spill] sm:$0xff] %v5095_v24  ;;  %v5109_v59 = vld [vmem:[%s2875_s9 + $0x1a0] sm:$0xff]  ;;  %v1522_v4 = vmul.f32 %v5055_v53, %v7054_v37  ;;  %v1523_v45 = vmul.f32 %v5058_v21, %v7054_v37  ;;  %v1524_v6 = vmul.f32 %v5061_v5, %v7054_v37  ;;  %v7073_v5 = vld [vmem:[#allocation34_spill] sm:$0xff] }
 0x117   : > { %7071 = vst [vmem:[#allocation12_spill] sm:$0xff] %v5106_v29  ;;  %7072 = vst [vmem:[#allocation10_spill] sm:$0xff] %v5109_v59  ;;  %v1525_v62 = vmul.f32 %v5072_v19, %v7054_v37  ;;  %v1526_v63 = vmul.f32 %v5075_v51, %v7054_v37  ;;  %v1527_v41 = vmul.f32 %v5078_v12, %v7054_v37  ;;  %v7074_v19 = vld [vmem:[#allocation43_spill] sm:$0xff] }
 0x118   : > { %v1528_v18 = vmul.f32 %v5089_v34, %v7054_v37  ;;  %v1529_v53 = vmul.f32 %v5092_v52, %v7054_v37  ;;  %v1530_v21 = vmul.f32 %v5095_v24, %v7054_v37  ;;  %v1531_v0 = vmul.f32 %v7073_v5, %v7054_v37 }
 0x119   : > { %v1532_v28 = vmul.f32 %v7074_v19, %v7054_v37  ;;  %v1533_v51 = vmul.f32 %v5106_v29, %v7054_v37  ;;  %v1534_v12 = vmul.f32 %v5109_v59, %v7054_v37  ;;  %v5144_v34 = vadd.f32 %v1503_v1, %v4905_v50  ;;  %v7114_v1 = vld [vmem:[#allocation64_spill] sm:$0xff] }
 0x11a   : > { %v5147_v52 = vadd.f32 %v1504_v15, %v4909_v30  ;;  %v5150_v24 = vadd.f32 %v1505_v14, %v4915_v23  ;;  %v5153_v5 = vadd.f32 %v1506_v8, %v4919_v2  ;;  %v5156_v19 = vadd.f32 %v1507_v26, %v4923_v60  ;;  %v7116_v15 = vld [vmem:[#allocation68_spill] sm:$0xff] }
 0x11b   : > { %v5159_v29 = vadd.f32 %v1508_v13, %v4927_v33  ;;  %v5162_v37 = vadd.f32 %v1509_v43, %v4931_v10  ;;  %v5165_v50 = vadd.f32 %v1510_v9, %v4935_v22  ;;  %v5168_v30 = vadd.f32 %v1511_v40, %v4939_v42  ;;  %v7120_v40 = vld [vmem:[#allocation78_spill] sm:$0xff]  ;;  %v5284_v43 = vld [vmem:[%s2875_s9 + $0xe8] sm:$0x3] }
 0x11c   : > { %v5171_v23 = vadd.f32 %v1512_v35, %v4942_v48  ;;  %v5174_v2 = vadd.f32 %v1513_v27, %v4945_v46  ;;  %v5177_v60 = vadd.f32 %v1514_v20, %v4948_v38  ;;  %v5180_v33 = vadd.f32 %v1515_v11, %v4951_v32  ;;  %v7121_v35 = vld [vmem:[#allocation67_spill] sm:$0xff]  ;;  %v5281_v27 = vld [vmem:[%s2875_s9 + $0xd0] sm:$0x3]  ;;  %v7124_v9 = vld [vmem:[#allocation72_spill] sm:$0xff] }
 0x11d   : > { %7075 = vst [vmem:[#allocation11_spill] sm:$0xff] %v5159_v29  ;;  %7076 = vst [vmem:[#allocation17_spill] sm:$0xff] %v5162_v37  ;;  %v5183_v10 = vadd.f32 %v1516_v31, %v4954_v49  ;;  %v5186_v22 = vadd.f32 %v1517_v3, %v4957_v44  ;;  %v5189_v42 = vadd.f32 %v1518_v58, %v4960_v56 }
 0x11e   : > { %7077 = vst [vmem:[#allocation20_spill] sm:$0xff] %v5165_v50  ;;  %7078 = vst [vmem:[#allocation23_spill] sm:$0xff] %v5168_v30  ;;  %v5192_v48 = vadd.f32 %v1519_v47, %v4963_v16  ;;  %v5195_v46 = vadd.f32 %v1520_v61, %v4966_v17  ;;  %v5198_v38 = vadd.f32 %v1521_v57, %v4969_v7  ;;  %v7094_v17 = vld [vmem:[#allocation37_spill] sm:$0xff]  ;;  %v7096_v7 = vld [vmem:[#allocation38_spill] sm:$0xff] }
 0x11f   : > { %7079 = vst [vmem:[#allocation29_spill] sm:$0xff] %v5171_v23  ;;  %7080 = vst [vmem:[#allocation15_spill] sm:$0xff] %v5174_v2  ;;  %v5201_v32 = vadd.f32 %v1522_v4, %v4972_v55  ;;  %v5204_v49 = vadd.f32 %v1523_v45, %v4975_v36  ;;  %v5207_v44 = vadd.f32 %v1524_v6, %v4978_v39  ;;  %v7098_v55 = vld [vmem:[#allocation41_spill] sm:$0xff]  ;;  %v7100_v36 = vld [vmem:[#allocation46_spill] sm:$0xff] }
 0x120   : > { %7081 = vst [vmem:[#allocation14_spill] sm:$0xff] %v5177_v60  ;;  %7082 = vst [vmem:[#allocation16_spill] sm:$0xff] %v5180_v33  ;;  %v5210_v56 = vadd.f32 %v1525_v62, %v4981_v54  ;;  %v5213_v16 = vadd.f32 %v1526_v63, %v4984_v25  ;;  %v5216_v31 = vadd.f32 %v1527_v41, %v7094_v17  ;;  %v5228_v39 = vld [vmem:[%s2875_s9 + $0x88] sm:$0x3]  ;;  %v7105_v25 = vld [vmem:[#allocation61_spill] sm:$0xff] }
 0x121   : > { %7083 = vst [vmem:[#allocation18_spill] sm:$0xff] %v5183_v10  ;;  %7084 = vst [vmem:[#allocation19_spill] sm:$0xff] %v5186_v22  ;;  %v5219_v3 = vadd.f32 %v1528_v18, %v7096_v7  ;;  %v5222_v61 = vadd.f32 %v1529_v53, %v7098_v55  ;;  %v5225_v58 = vadd.f32 %v1530_v21, %v7100_v36  ;;  %v7103_v54 = vld [vmem:[#allocation60_spill] sm:$0xff]  ;;  %v7107_v47 = vld [vmem:[#allocation65_spill] sm:$0xff] }
 0x122   : > { %7085 = vst [vmem:[#allocation21_spill] sm:$0xff] %v5189_v42  ;;  %7086 = vst [vmem:[#allocation22_spill] sm:$0xff] %v5192_v48  ;;  %v5231_v62 = vadd.f32 %v1531_v0, %v7103_v54  ;;  %v5234_v57 = vadd.f32 %v1532_v28, %v7105_v25  ;;  %v5237_v11 = vadd.f32 %v1533_v51, %v7107_v47  ;;  %v7109_v4 = vld [vmem:[#allocation66_spill] sm:$0xff]  ;;  %v5243_v6 = vld [vmem:[%s2875_s9 + $0xa0] sm:$0x3] }
 0x123   : > { %7087 = vst [vmem:[#allocation25_spill] sm:$0xff] %v5195_v46  ;;  %7088 = vst [vmem:[#allocation26_spill] sm:$0xff] %v5198_v38  ;;  %v5240_v45 = vadd.f32 %v1534_v12, %v7109_v4  ;;  %v7112_v63 = vld [vmem:[#allocation85_spill] sm:$0xff]  ;;  %v7113_v41 = vld [vmem:[#allocation59_spill] sm:$0xff] }
 0x124   : > { %7089 = vst [vmem:[#allocation31_spill] sm:$0xff] %v5201_v32  ;;  %7090 = vst [vmem:[#allocation35_spill] sm:$0xff] %v5204_v49  ;;  %v5247_v18 = vmul.f32 %v7113_v41, %v7112_v63  ;;  %v5251_v0 = vmul.f32 %v7114_v1, %v7112_v63  ;;  %v7115_v28 = vld [vmem:[#allocation63_spill] sm:$0xff]  ;;  %v5259_v14 = vmul.f32 %v7116_v15, %v7112_v63  ;;  %v5262_v12 = vld [vmem:[%s2875_s9 + $0xb8] sm:$0x3] }
 0x125   : > { %7091 = vst [vmem:[#allocation36_spill] sm:$0xff] %v5207_v44  ;;  %7092 = vst [vmem:[#allocation39_spill] sm:$0xff] %v5210_v56  ;;  %v5255_v20 = vmul.f32 %v7115_v28, %v7112_v63  ;;  %v7118_v51 = vld [vmem:[#allocation69_spill] sm:$0xff]  ;;  %v7119_v53 = vld [vmem:[#allocation74_spill] sm:$0xff]  ;;  %v5274_v26 = vmul.f32 %v7120_v40, %v7112_v63  ;;  %v5278_v13 = vmul.f32 %v7121_v35, %v7112_v63 }
 0x126   : > { %7093 = vst [vmem:[#allocation40_spill] sm:$0xff] %v5213_v16  ;;  %7095 = vst [vmem:[#allocation44_spill] sm:$0xff] %v5216_v31  ;;  %v5266_v8 = vmul.f32 %v7118_v51, %v7112_v63  ;;  %v5270_v21 = vmul.f32 %v7119_v53, %v7112_v63  ;;  %v5288_v17 = vmul.f32 %v7124_v9, %v7112_v63  ;;  %v7125_v7 = vld [vmem:[#allocation77_spill] sm:$0xff]  ;;  %v7126_v36 = vld [vmem:[#allocation27_spill] sm:$0xff]  ;;  %v1667_v23 = vrot.slane %v5247_v18, 1 }
 0x127   : > { %7097 = vst [vmem:[#allocation45_spill] sm:$0xff] %v5219_v3  ;;  %7099 = vst [vmem:[#allocation49_spill] sm:$0xff] %v5222_v61  ;;  %v5292_v55 = vmul.f32 %v7125_v7, %v7112_v63  ;;  %v5296_v54 = vmul.f32 %v7126_v36, %v7112_v63  ;;  %v5300_v25 = vmul.f32 %v5228_v39, %v7112_v63  ;;  %v5303_v47 = vld [vmem:[%s2875_s9 + $0x100] sm:$0x3]  ;;  %v7128_v4 = vld [vmem:[#allocation28_spill] sm:$0xff]  ;;  %v1670_v30 = vrot.slane %v5255_v20, 1 }
 0x128   : > { %7101 = vst [vmem:[#allocation50_spill] sm:$0xff] %v5225_v58  ;;  %7102 = vst [vmem:[#allocation53_spill] sm:$0xff] %v5228_v39  ;;  %v5307_v41 = vmul.f32 %v7128_v4, %v7112_v63  ;;  %v7129_v1 = vld [vmem:[#allocation33_spill] sm:$0xff]  ;;  %v5315_v15 = vmul.f32 %v5243_v6, %v7112_v63  ;;  %v7130_v51 = vld [vmem:[#allocation47_spill] sm:$0xff]  ;;  %v5330_v7 = vmul.f32 %v5262_v12, %v7112_v63  ;;  %v1673_v50 = vrot.slane %v5266_v8, 1 }
 0x129   : > { %7104 = vst [vmem:[#allocation54_spill] sm:$0xff] %v5231_v62  ;;  %7106 = vst [vmem:[#allocation58_spill] sm:$0xff] %v5234_v57  ;;  %v5311_v28 = vmul.f32 %v7129_v1, %v7112_v63  ;;  %v5319_v53 = vmul.f32 %v7130_v51, %v7112_v63  ;;  %v5322_v40 = vld [vmem:[%s2875_s9 + $0x118] sm:$0x3]  ;;  %v7132_v35 = vld [vmem:[#allocation51_spill] sm:$0xff]  ;;  %v5470_v2 = vmul.f32 %v5109_v59, %v7112_v63  ;;  %v1677_v37 = vrot.slane %v5274_v26, 1 }
 0x12a   : > { %7108 = vst [vmem:[#allocation82_spill] sm:$0xff] %v5237_v11  ;;  %7110 = vst [vmem:[#allocation34_spill] sm:$0xff] %v5240_v45  ;;  %v5326_v9 = vmul.f32 %v7132_v35, %v7112_v63  ;;  %v7133_v1 = vld [vmem:[#allocation52_spill] sm:$0xff]  ;;  %v5341_v51 = vld [vmem:[%s2875_s9 + $0x130] sm:$0x3]  ;;  %v5348_v35 = vmul.f32 %v5281_v27, %v7112_v63  ;;  %v1678_v59 = vrot.slane %v5278_v13, 1 }
 0x12b   : > { %7111 = vst [vmem:[#allocation43_spill] sm:$0xff] %v5243_v6  ;;  %7117 = vst [vmem:[#allocation37_spill] sm:$0xff] %v5262_v12  ;;  %v5334_v4 = vmul.f32 %v7133_v1, %v7112_v63  ;;  %v7134_v6 = vld [vmem:[#allocation8_spill] sm:$0xff]  ;;  %v7138_v1 = vld [vmem:[#allocation42_spill] sm:$0xff]  ;;  %v1680_v18 = vrot.slane %v5288_v17, 1  ;;  %v1688_v26 = vrot.slane %v5311_v28, 1 }
 0x12c   : > { %7122 = vst [vmem:[#allocation38_spill] sm:$0xff] %v5281_v27  ;;  %7123 = vst [vmem:[#allocation41_spill] sm:$0xff] %v5284_v43  ;;  %v5338_v39 = vmul.f32 %v7134_v6, %v7112_v63  ;;  %v5344_v36 = vld [vmem:[%s2875_s9 + $0x148] sm:$0x3]  ;;  %v5356_v11 = vmul.f32 %v7138_v1, %v7112_v63  ;;  %v5360_v6 = vmul.f32 %v5284_v43, %v7112_v63  ;;  %v5363_v57 = vld [vmem:[%s2875_s9 + $0x160] sm:$0x3] }
 0x12d   : > { %7127 = vst [vmem:[#allocation46_spill] sm:$0xff] %v5303_v47  ;;  %7131 = vst [vmem:[#allocation60_spill] sm:$0xff] %v5322_v40  ;;  %v7137_v12 = vld [vmem:[#allocation32_spill] sm:$0xff]  ;;  %v7140_v62 = vld [vmem:[#allocation55_spill] sm:$0xff]  ;;  %v5499_v8 = vsel %vm455_vm0, %v1677_v37, %v1678_v59  ;;  %v1693_v37 = vrot.slane %v5326_v9, 1  ;;  %v1695_v17 = vrot.slane %v5330_v7, 1 }
 0x12e   : > { %7135 = vst [vmem:[#allocation61_spill] sm:$0xff] %v5341_v51  ;;  %7136 = vst [vmem:[#allocation65_spill] sm:$0xff] %v5344_v36  ;;  %v5352_v45 = vmul.f32 %v7137_v12, %v7112_v63  ;;  %v5367_v58 = vmul.f32 %v7140_v62, %v7112_v63  ;;  %v7141_v27 = vld [vmem:[#allocation56_spill] sm:$0xff]  ;;  %v5375_v12 = vmul.f32 %v5303_v47, %v7112_v63  ;;  %v7142_v1 = vld [vmem:[#allocation70_spill] sm:$0xff]  ;;  %v1700_v28 = vrot.slane %v5348_v35, 1 }
 0x12f   : > { %7139 = vst [vmem:[#allocation66_spill] sm:$0xff] %v5363_v57  ;;  %v5371_v61 = vmul.f32 %v7141_v27, %v7112_v63  ;;  %v5379_v3 = vmul.f32 %v7142_v1, %v7112_v63  ;;  %v5382_v43 = vld [vmem:[%s2875_s9 + $0x178] sm:$0x3]  ;;  %v7144_v31 = vld [vmem:[#allocation71_spill] sm:$0xff]  ;;  %v5390_v62 = vmul.f32 %v5322_v40, %v7112_v63  ;;  %v7146_v47 = vld [vmem:[#allocation76_spill] sm:$0xff]  ;;  %v1703_v9 = vrot.slane %v5356_v11, 1 }
 0x130   : > { %7143 = vst [vmem:[#allocation85_spill] sm:$0xff] %v5382_v43  ;;  %v5386_v16 = vmul.f32 %v7144_v31, %v7112_v63  ;;  %v7145_v27 = vld [vmem:[#allocation75_spill] sm:$0xff]  ;;  %v5398_v1 = vmul.f32 %v7146_v47, %v7112_v63  ;;  %v5401_v44 = vld [vmem:[%s2875_s9 + $0x190] sm:$0x3]  ;;  %v5404_v49 = vld [vmem:[%s2875_s9 + $0x1a8] sm:$0x3]  ;;  %v5408_v31 = vmul.f32 %v5341_v51, %v7112_v63  ;;  %v5420_v47 = vmul.f32 %v5344_v36, %v7112_v63 }
 0x131   : > { %v5394_v56 = vmul.f32 %v7145_v27, %v7112_v63  ;;  %7147 = vst [vmem:[#allocation59_spill] sm:$0xff] %v5401_v44  ;;  %v7148_v40 = vld [vmem:[#allocation80_spill] sm:$0xff]  ;;  %v7149_v27 = vld [vmem:[#allocation81_spill] sm:$0xff]  ;;  %v7150_v46 = vld [vmem:[#allocation83_spill] sm:$0xff] }
 0x132   : > { %v5412_v32 = vmul.f32 %v7148_v40, %v7112_v63  ;;  %v5416_v38 = vmul.f32 %v7149_v27, %v7112_v63  ;;  %v5424_v48 = vmul.f32 %v7150_v46, %v7112_v63  ;;  %v7151_v42 = vld [vmem:[#allocation84_spill] sm:$0xff]  ;;  %v5432_v40 = vmul.f32 %v5363_v57, %v7112_v63  ;;  %v7152_v22 = vld [vmem:[#allocation13_spill] sm:$0xff] }
 0x133   : > { %v5428_v51 = vmul.f32 %v7151_v42, %v7112_v63  ;;  %v5436_v27 = vmul.f32 %v7152_v22, %v7112_v63  ;;  %v7153_v10 = vld [vmem:[#allocation9_spill] sm:$0xff]  ;;  %v5444_v46 = vmul.f32 %v5382_v43, %v7112_v63  ;;  %v5447_v33 = vld [vmem:[%s2875_s9 + $0x180] sm:$0xff] }
 0x134   : > { %v5440_v36 = vmul.f32 %v7153_v10, %v7112_v63  ;;  %7154 = vst [vmem:[#allocation64_spill] sm:$0xff] %v5447_v33  ;;  %v5451_v42 = vmul.f32 %v5447_v33, %v7112_v63  ;;  %v5454_v57 = vld [vmem:[%s2875_s9 + $0x188] sm:$0xff]  ;;  %v5462_v10 = vmul.f32 %v5401_v44, %v7112_v63  ;;  %v5474_v33 = vmul.f32 %v5404_v49, %v7112_v63  ;;  %s2274_s9 = scalar_lea.sflag [#allocation3], %s6262_s26 }
 0x135   : > { %7155 = vst [vmem:[#allocation63_spill] sm:$0xff] %v5454_v57  ;;  %v5458_v22 = vmul.f32 %v5454_v57, %v7112_v63  ;;  %v7156_v60 = vld [vmem:[#allocation12_spill] sm:$0xff]  ;;  %v1668_v57 = vrot.slane %v5251_v0, 1  ;;  %v1672_v44 = vrot.slane %v5259_v14, 1  ;;  %v1682_v0 = vrot.slane %v5292_v55, 1 }
 0x136   : > { %v5466_v43 = vmul.f32 %v7156_v60, %v7112_v63  ;;  %v1675_v60 = vrot.slane %v5270_v21, 1  ;;  %v1683_v21 = vrot.slane %v5296_v54, 1  ;;  %v1697_v55 = vrot.slane %v5334_v4, 1 }
 0x137   : > { %v5485_v29 = vsel %vm455_vm0, %v1667_v23, %v1668_v57  ;;  %v5488_v63 = vsel %vm455_vm0, %v1668_v57, %v1670_v30  ;;  %v5493_v20 = vsel %vm455_vm0, %v1672_v44, %v1673_v50  ;;  %v5503_v23 = vsel %vm455_vm0, %v1678_v59, %v1680_v18 }
 0x138   : > { %v5496_v14 = vsel %vm455_vm0, %v1673_v50, %v1675_v60  ;;  %v1685_v30 = vrot.slane %v5300_v25, 1  ;;  %v1687_v57 = vrot.slane %v5307_v41, 1  ;;  %v5509_v44 = vsel %vm455_vm0, %v1682_v0, %v1683_v21 }
 0x139   : > { %v1690_v50 = vrot.slane %v5315_v15, 1  ;;  %v1692_v60 = vrot.slane %v5319_v53, 1  ;;  %v1698_v41 = vrot.slane %v5338_v39, 1  ;;  %v1696_v15 = vsel %vm455_vm0, %v1693_v37, %v1695_v17 }
 0x13a   : > { %v5515_v13 = vsel %vm455_vm0, %v1683_v21, %v1685_v30  ;;  %v5518_v59 = vsel %vm455_vm0, %v1687_v57, %v1688_v26  ;;  %v1702_v53 = vrot.slane %v5352_v45, 1  ;;  %v1705_v18 = vrot.slane %v5360_v6, 1 }
 0x13b   : > { %v1691_v54 = vsel %vm455_vm0, %v1688_v26, %v1690_v50  ;;  %v1694_v25 = vsel %vm455_vm0, %v1692_v60, %v1693_v37  ;;  %v1699_v7 = vsel %vm455_vm0, %v1697_v55, %v1698_v41  ;;  %v1701_v4 = vsel %vm455_vm0, %v1698_v41, %v1700_v28 }
 0x13c   : > { %v1707_v0 = vrot.slane %v5367_v58, 1  ;;  %v1708_v21 = vrot.slane %v5371_v61, 1  ;;  %v1704_v39 = vsel %vm455_vm0, %v1702_v53, %v1703_v9  ;;  %v1706_v35 = vsel %vm455_vm0, %v1703_v9, %v1705_v18 }
 0x13d   : > { %v1710_v30 = vrot.slane %v5375_v12, 1  ;;  %v1712_v45 = vrot.slane %v5379_v3, 1  ;;  %v1713_v6 = vrot.slane %v5386_v16, 1  ;;  %v1715_v57 = vrot.slane %v5390_v62, 1 }
 0x13e   : > { %v1709_v11 = vsel %vm455_vm0, %v1707_v0, %v1708_v21  ;;  %v1717_v26 = vrot.slane %v5394_v56, 1  ;;  %v1718_v61 = vrot.slane %v5398_v1, 1  ;;  %v1720_v50 = vrot.slane %v5408_v31, 1 }
 0x13f   : > { %v1711_v58 = vsel %vm455_vm0, %v1708_v21, %v1710_v30  ;;  %v1722_v60 = vrot.slane %v5412_v32, 1  ;;  %v1714_v12 = vsel %vm455_vm0, %v1712_v45, %v1713_v6  ;;  %v1716_v3 = vsel %vm455_vm0, %v1713_v6, %v1715_v57  ;;  %v7159_v45 = vld [vmem:[#allocation20_spill] sm:$0xff] }
 0x140   : > { %v1723_v37 = vrot.slane %v5416_v38, 1  ;;  %v1725_v16 = vrot.slane %v5420_v47, 1  ;;  %v1719_v62 = vsel %vm455_vm0, %v1717_v26, %v1718_v61  ;;  %v1721_v56 = vsel %vm455_vm0, %v1718_v61, %v1720_v50  ;;  %v7169_v26 = vld [vmem:[#allocation16_spill] sm:$0xff]  ;;  %v7171_v61 = vld [vmem:[#allocation18_spill] sm:$0xff] }
 0x141   : > { %v1727_v17 = vrot.slane %v5424_v48, 1  ;;  %v1728_v1 = vrot.slane %v5428_v51, 1  ;;  %v1730_v55 = vrot.slane %v5432_v40, 1  ;;  %v1732_v41 = vrot.slane %v5436_v27, 1 }
 0x142   : > { %v1724_v31 = vsel %vm455_vm0, %v1722_v60, %v1723_v37  ;;  %v1726_v32 = vsel %vm455_vm0, %v1723_v37, %v1725_v16  ;;  %v1733_v47 = vrot.slane %v5440_v36, 1  ;;  %v1735_v28 = vrot.slane %v5444_v46, 1 }
 0x143   : > { %v1729_v38 = vsel %vm455_vm0, %v1727_v17, %v1728_v1  ;;  %v1737_v53 = vrot.slane %v5451_v42, 1  ;;  %v1731_v48 = vsel %vm455_vm0, %v1728_v1, %v1730_v55  ;;  %v1738_v51 = vrot.slane %v5458_v22, 1 }
 0x144   : > { %v1740_v9 = vrot.slane %v5462_v10, 1  ;;  %v1742_v18 = vrot.slane %v5466_v43, 1  ;;  %v1734_v40 = vsel %vm455_vm0, %v1732_v41, %v1733_v47  ;;  %v1736_v27 = vsel %vm455_vm0, %v1733_v47, %v1735_v28 }
 0x145   : > { %v1743_v0 = vrot.slane %v5470_v2, 1  ;;  %v1745_v36 = vrot.slane %v5474_v33, 1  ;;  %v1739_v46 = vsel %vm455_vm0, %v1737_v53, %v1738_v51  ;;  %v5574_v21 = vadd.f32 %v5485_v29, %v5144_v34  ;;  %v7157_v29 = vld [vmem:[#allocation11_spill] sm:$0xff] }
 0x146   : > { %v1741_v42 = vsel %vm455_vm0, %v1738_v51, %v1740_v9  ;;  %v5578_v10 = vadd.f32 %v5488_v63, %v5147_v52  ;;  %v5584_v2 = vadd.f32 %v5493_v20, %v5150_v24  ;;  %v5588_v33 = vadd.f32 %v5496_v14, %v5153_v5  ;;  %v7158_v63 = vld [vmem:[#allocation17_spill] sm:$0xff]  ;;  %v7161_v20 = vld [vmem:[#allocation23_spill] sm:$0xff] }
 0x147   : > { %v1744_v22 = vsel %vm455_vm0, %v1742_v18, %v1743_v0  ;;  %v1746_v43 = vsel %vm455_vm0, %v1743_v0, %v1745_v36  ;;  %v5592_v34 = vadd.f32 %v5499_v8, %v5156_v19  ;;  %v5596_v52 = vadd.f32 %v5503_v23, %v7157_v29  ;;  %v7163_v14 = vld [vmem:[#allocation29_spill] sm:$0xff]  ;;  %v7165_v19 = vld [vmem:[#allocation15_spill] sm:$0xff]  ;;  %v7167_v23 = vld [vmem:[#allocation14_spill] sm:$0xff] }
 0x148   : > { %v5600_v30 = vadd.f32 %v5509_v44, %v7158_v63  ;;  %v5604_v24 = vadd.f32 %v5515_v13, %v7159_v45  ;;  %v5608_v5 = vadd.f32 %v5518_v59, %v7161_v20  ;;  %v5611_v6 = vadd.f32 %v1691_v54, %v7163_v14  ;;  %v7173_v13 = vld [vmem:[#allocation19_spill] sm:$0xff]  ;;  %v7175_v59 = vld [vmem:[#allocation21_spill] sm:$0xff]  ;;  %v7177_v54 = vld [vmem:[#allocation22_spill] sm:$0xff] }
 0x149   : > { %v5614_v8 = vadd.f32 %v1694_v25, %v7165_v19  ;;  %v5617_v57 = vadd.f32 %v1696_v15, %v7167_v23  ;;  %v5620_v44 = vadd.f32 %v1699_v7, %v7169_v26  ;;  %v5623_v50 = vadd.f32 %v1701_v4, %v7171_v61  ;;  %v7179_v25 = vld [vmem:[#allocation25_spill] sm:$0xff]  ;;  %v7181_v15 = vld [vmem:[#allocation26_spill] sm:$0xff]  ;;  %v7183_v7 = vld [vmem:[#allocation31_spill] sm:$0xff] }
 0x14a   : > { %7160 = vst [vmem:[#allocation68_spill] sm:$0xff] %v5604_v24  ;;  %7162 = vst [vmem:[#allocation69_spill] sm:$0xff] %v5608_v5  ;;  %v5626_v60 = vadd.f32 %v1704_v39, %v7173_v13  ;;  %v5629_v37 = vadd.f32 %v1706_v35, %v7175_v59  ;;  %v5632_v16 = vadd.f32 %v1709_v11, %v7177_v54  ;;  %v7185_v4 = vld [vmem:[#allocation35_spill] sm:$0xff]  ;;  %v7187_v39 = vld [vmem:[#allocation36_spill] sm:$0xff] }
 0x14b   : > { %7164 = vst [vmem:[#allocation74_spill] sm:$0xff] %v5611_v6  ;;  %7166 = vst [vmem:[#allocation78_spill] sm:$0xff] %v5614_v8  ;;  %v5635_v17 = vadd.f32 %v1711_v58, %v7179_v25  ;;  %v5638_v1 = vadd.f32 %v1714_v12, %v7181_v15  ;;  %v5641_v55 = vadd.f32 %v1716_v3, %v7183_v7  ;;  %v7189_v35 = vld [vmem:[#allocation39_spill] sm:$0xff]  ;;  %v7191_v11 = vld [vmem:[#allocation40_spill] sm:$0xff] }
 0x14c   : > { %7168 = vst [vmem:[#allocation67_spill] sm:$0xff] %v5617_v57  ;;  %7170 = vst [vmem:[#allocation72_spill] sm:$0xff] %v5620_v44  ;;  %v5644_v41 = vadd.f32 %v1719_v62, %v7185_v4  ;;  %v5647_v47 = vadd.f32 %v1721_v56, %v7187_v39  ;;  %v5650_v28 = vadd.f32 %v1724_v31, %v7189_v35  ;;  %v7193_v58 = vld [vmem:[#allocation44_spill] sm:$0xff]  ;;  %v7195_v12 = vld [vmem:[#allocation45_spill] sm:$0xff] }
 0x14d   : > { %7172 = vst [vmem:[#allocation77_spill] sm:$0xff] %v5623_v50  ;;  %7174 = vst [vmem:[#allocation11_spill] sm:$0xff] %v5626_v60  ;;  %v5653_v53 = vadd.f32 %v1726_v32, %v7191_v11  ;;  %v5656_v51 = vadd.f32 %v1729_v38, %v7193_v58  ;;  %v5659_v9 = vadd.f32 %v1731_v48, %v7195_v12  ;;  %v7197_v3 = vld [vmem:[#allocation49_spill] sm:$0xff]  ;;  %v7199_v62 = vld [vmem:[#allocation50_spill] sm:$0xff] }
 0x14e   : > { %7176 = vst [vmem:[#allocation17_spill] sm:$0xff] %v5629_v37  ;;  %7178 = vst [vmem:[#allocation20_spill] sm:$0xff] %v5632_v16  ;;  %v5662_v18 = vadd.f32 %v1734_v40, %v7197_v3  ;;  %v5665_v0 = vadd.f32 %v1736_v27, %v7199_v62  ;;  %v7201_v56 = vld [vmem:[#allocation54_spill] sm:$0xff]  ;;  %v7209_v48 = vld [vmem:[#allocation27_spill] sm:$0xff] }
 0x14f   : > { %7180 = vst [vmem:[#allocation23_spill] sm:$0xff] %v5635_v17  ;;  %7182 = vst [vmem:[#allocation29_spill] sm:$0xff] %v5638_v1  ;;  %v5668_v36 = vadd.f32 %v1739_v46, %v7201_v56  ;;  %v7203_v31 = vld [vmem:[#allocation58_spill] sm:$0xff]  ;;  %v7211_v40 = vld [vmem:[#allocation53_spill] sm:$0xff] }
 0x150   : > { %7184 = vst [vmem:[#allocation15_spill] sm:$0xff] %v5641_v55  ;;  %7186 = vst [vmem:[#allocation14_spill] sm:$0xff] %v5644_v41  ;;  %v5671_v29 = vadd.f32 %v1741_v42, %v7203_v31  ;;  %v7205_v32 = vld [vmem:[#allocation82_spill] sm:$0xff]  ;;  %v7212_v19 = vld [vmem:[#allocation28_spill] sm:$0xff] }
 0x151   : > { %7188 = vst [vmem:[#allocation16_spill] sm:$0xff] %v5647_v47  ;;  %7190 = vst [vmem:[#allocation18_spill] sm:$0xff] %v5650_v28  ;;  %v5674_v63 = vadd.f32 %v1744_v22, %v7205_v32  ;;  %v7207_v38 = vld [vmem:[#allocation34_spill] sm:$0xff]  ;;  %v7213_v23 = vld [vmem:[#allocation33_spill] sm:$0xff] }
 0x152   : > { %7192 = vst [vmem:[#allocation19_spill] sm:$0xff] %v5653_v53  ;;  %7194 = vst [vmem:[#allocation21_spill] sm:$0xff] %v5656_v51  ;;  %v5677_v45 = vadd.f32 %v1746_v43, %v7207_v38  ;;  %v7210_v20 = vld [vmem:[#allocation30_spill] sm:$0xff]  ;;  %v7214_v22 = vld [vmem:[#allocation43_spill] sm:$0xff] }
 0x153   : > { %7196 = vst [vmem:[#allocation22_spill] sm:$0xff] %v5659_v9  ;;  %7198 = vst [vmem:[#allocation25_spill] sm:$0xff] %v5662_v18  ;;  %v5681_v14 = vmul.f32 %v7210_v20, %v7209_v48  ;;  %v1826_v27 = vmul.f32 %v7210_v20, %v7211_v40  ;;  %v5687_v46 = vmul.f32 %v7210_v20, %v7212_v19  ;;  %v7215_v43 = vld [vmem:[#allocation47_spill] sm:$0xff]  ;;  %v7217_v54 = vld [vmem:[#allocation37_spill] sm:$0xff] }
 0x154   : > { %7200 = vst [vmem:[#allocation26_spill] sm:$0xff] %v5665_v0  ;;  %7202 = vst [vmem:[#allocation31_spill] sm:$0xff] %v5668_v36  ;;  %v5691_v42 = vmul.f32 %v7210_v20, %v7213_v23  ;;  %v5695_v26 = vmul.f32 %v7210_v20, %v7214_v22  ;;  %v5699_v61 = vmul.f32 %v7210_v20, %v7215_v43  ;;  %v7216_v13 = vld [vmem:[#allocation51_spill] sm:$0xff]  ;;  %v7218_v15 = vld [vmem:[#allocation52_spill] sm:$0xff] }
 0x155   : > { %7204 = vst [vmem:[#allocation35_spill] sm:$0xff] %v5671_v29  ;;  %7206 = vst [vmem:[#allocation36_spill] sm:$0xff] %v5674_v63  ;;  %v5703_v59 = vmul.f32 %v7210_v20, %v7216_v13  ;;  %v5707_v25 = vmul.f32 %v7210_v20, %v7217_v54  ;;  %v5711_v7 = vmul.f32 %v7210_v20, %v7218_v15  ;;  %v7219_v4 = vld [vmem:[#allocation8_spill] sm:$0xff]  ;;  %v7220_v35 = vld [vmem:[#allocation38_spill] sm:$0xff] }
 0x156   : > { %7208 = vst [vmem:[#allocation39_spill] sm:$0xff] %v5677_v45  ;;  %v5715_v39 = vmul.f32 %v7210_v20, %v7219_v4  ;;  %v5719_v11 = vmul.f32 %v7210_v20, %v7220_v35  ;;  %v7221_v58 = vld [vmem:[#allocation32_spill] sm:$0xff]  ;;  %v7222_v3 = vld [vmem:[#allocation42_spill] sm:$0xff]  ;;  %v7223_v56 = vld [vmem:[#allocation41_spill] sm:$0xff] }
 0x157   : > { %v5723_v12 = vmul.f32 %v7210_v20, %v7221_v58  ;;  %v5727_v62 = vmul.f32 %v7210_v20, %v7222_v3  ;;  %v5731_v31 = vmul.f32 %v7210_v20, %v7223_v56  ;;  %v7224_v32 = vld [vmem:[#allocation55_spill] sm:$0xff]  ;;  %v7225_v48 = vld [vmem:[#allocation56_spill] sm:$0xff]  ;;  %v7226_v19 = vld [vmem:[#allocation46_spill] sm:$0xff] }
 0x158   : > { %v5735_v38 = vmul.f32 %v7210_v20, %v7224_v32  ;;  %v5739_v40 = vmul.f32 %v7210_v20, %v7225_v48  ;;  %v5743_v23 = vmul.f32 %v7210_v20, %v7226_v19  ;;  %v7227_v22 = vld [vmem:[#allocation70_spill] sm:$0xff]  ;;  %v7228_v13 = vld [vmem:[#allocation71_spill] sm:$0xff]  ;;  %v7229_v15 = vld [vmem:[#allocation60_spill] sm:$0xff] }
 0x159   : > { %v5747_v43 = vmul.f32 %v7210_v20, %v7227_v22  ;;  %v5751_v54 = vmul.f32 %v7210_v20, %v7228_v13  ;;  %v5755_v4 = vmul.f32 %v7210_v20, %v7229_v15  ;;  %v7230_v35 = vld [vmem:[#allocation75_spill] sm:$0xff]  ;;  %v7231_v3 = vld [vmem:[#allocation76_spill] sm:$0xff]  ;;  %v7232_v32 = vld [vmem:[#allocation61_spill] sm:$0xff] }
 0x15a   : > { %v5759_v58 = vmul.f32 %v7210_v20, %v7230_v35  ;;  %v5763_v56 = vmul.f32 %v7210_v20, %v7231_v3  ;;  %v5767_v48 = vmul.f32 %v7210_v20, %v7232_v32  ;;  %v7233_v19 = vld [vmem:[#allocation80_spill] sm:$0xff]  ;;  %v7234_v13 = vld [vmem:[#allocation81_spill] sm:$0xff]  ;;  %v7236_v63 = vld [vmem:[#allocation83_spill] sm:$0xff] }
 0x15b   : > { %v5771_v22 = vmul.f32 %v7210_v20, %v7233_v19  ;;  %v5775_v15 = vmul.f32 %v7210_v20, %v7234_v13  ;;  %v7235_v45 = vld [vmem:[#allocation65_spill] sm:$0xff]  ;;  %v5783_v3 = vmul.f32 %v7210_v20, %v7236_v63  ;;  %v7237_v29 = vld [vmem:[#allocation84_spill] sm:$0xff]  ;;  %v7238_v36 = vld [vmem:[#allocation66_spill] sm:$0xff] }
 0x15c   : > { %v5779_v35 = vmul.f32 %v7210_v20, %v7235_v45  ;;  %v5787_v32 = vmul.f32 %v7210_v20, %v7237_v29  ;;  %v5791_v19 = vmul.f32 %v7210_v20, %v7238_v36  ;;  %v7239_v0 = vld [vmem:[#allocation13_spill] sm:$0xff]  ;;  %v7242_v51 = vld [vmem:[#allocation64_spill] sm:$0xff]  ;;  %v7243_v53 = vld [vmem:[#allocation63_spill] sm:$0xff] }
 0x15d   : > { %v5795_v13 = vmul.f32 %v7210_v20, %v7239_v0  ;;  %v7240_v18 = vld [vmem:[#allocation9_spill] sm:$0xff]  ;;  %v5807_v29 = vmul.f32 %v7242_v51, %v7210_v20  ;;  %v5811_v36 = vmul.f32 %v7243_v53, %v7210_v20  ;;  %v7244_v28 = vld [vmem:[#allocation59_spill] sm:$0xff]  ;;  %v7245_v47 = vld [vmem:[#allocation12_spill] sm:$0xff]  ;;  %v5827_v51 = vmul.f32 %v7210_v20, %v5404_v49 }
 0x15e   : > { %v5799_v45 = vmul.f32 %v7210_v20, %v7240_v18  ;;  %v7241_v9 = vld [vmem:[#allocation85_spill] sm:$0xff]  ;;  %v5815_v0 = vmul.f32 %v7210_v20, %v7244_v28  ;;  %v5819_v18 = vmul.f32 %v7210_v20, %v7245_v47  ;;  %v7246_v41 = vld [vmem:[#allocation10_spill] sm:$0xff]  ;;  %v7248_v53 = vld [vmem:[#allocation79_spill] sm:$0xff] }
 0x15f   : > { %v5803_v63 = vmul.f32 %v7210_v20, %v7241_v9  ;;  %v5823_v9 = vmul.f32 %v7210_v20, %v7246_v41  ;;  %v7247_v55 = vld [vmem:[#allocation73_spill] sm:$0xff]  ;;  %v1912_v17 = vrot.slane %v7248_v53, 2  ;;  %v7249_v16 = vld [vmem:[#allocation48_spill] sm:$0xff]  ;;  %v7251_v50 = vld [vmem:[#allocation62_spill] sm:$0xff] }
 0x160   : > { %v1911_v1 = vrot.slane %v7247_v55, 2  ;;  %v1914_v37 = vrot.slane %v7249_v16, 2  ;;  %v7250_v28 = vld [vmem:[#allocation57_spill] sm:$0xff]  ;;  %v1917_v44 = vrot.slane %v7251_v50, 2  ;;  %v7252_v47 = vld [vmem:[#allocation86_spill] sm:$0xff]  ;;  %v7253_v41 = vld [vmem:[#allocation87_spill] sm:$0xff] }
 0x161   : > { %v1916_v60 = vrot.slane %v7250_v28, 2  ;;  %v1919_v57 = vrot.slane %v7252_v47, 2  ;;  %v1921_v6 = vrot.slane %v7253_v41, 2  ;;  %v7254_v5 = vld [vmem:[#allocation88_spill] sm:$0xff]  ;;  %v7255_v20 = vld [vmem:[#allocation89_spill] sm:$0xff]  ;;  %v1929_v41 = vrot.slane %v1826_v27, 2 }
 0x162   : > { %v5836_v8 = vsel %vm700_vm1, %v1911_v1, %v1912_v17  ;;  %v1922_v49 = vrot.slane %v7254_v5, 2  ;;  %v1924_v24 = vrot.slane %v7255_v20, 2  ;;  %v5842_v55 = vsel %vm700_vm1, %v1912_v17, %v1914_v37  ;;  %v7256_v50 = vld [vmem:[#allocation24_spill] sm:$0xff] }
 0x163   : > { %v5845_v16 = vsel %vm700_vm1, %v1916_v60, %v1917_v44  ;;  %v5848_v53 = vsel %vm700_vm1, %v1917_v44, %v1919_v57  ;;  %v1926_v28 = vrot.slane %v7256_v50, 2  ;;  %v1927_v5 = vrot.slane %v5681_v14, 2 }
 0x164   : > { %v5852_v1 = vsel %vm700_vm1, %v1921_v6, %v1922_v49  ;;  %v5855_v47 = vsel %vm700_vm1, %v1922_v49, %v1924_v24  ;;  %v1931_v37 = vrot.slane %v5687_v46, 2  ;;  %v1932_v17 = vrot.slane %v5691_v42, 2 }
 0x165   : > { %v1934_v60 = vrot.slane %v5695_v26, 2  ;;  %v1936_v57 = vrot.slane %v5699_v61, 2  ;;  %v5863_v44 = vsel %vm700_vm1, %v1926_v28, %v1927_v5  ;;  %v5866_v6 = vsel %vm700_vm1, %v1927_v5, %v1929_v41 }
 0x166   : > { %v1937_v24 = vrot.slane %v5703_v59, 2  ;;  %v1939_v49 = vrot.slane %v5707_v25, 2  ;;  %v1933_v14 = vsel %vm700_vm1, %v1931_v37, %v1932_v17  ;;  %v1941_v46 = vrot.slane %v5711_v7, 2 }
 0x167   : > { %v1935_v27 = vsel %vm700_vm1, %v1932_v17, %v1934_v60  ;;  %v1942_v42 = vrot.slane %v5715_v39, 2  ;;  %v1944_v20 = vrot.slane %v5719_v11, 2  ;;  %v1946_v50 = vrot.slane %v5723_v12, 2 }
 0x168   : > { %v1938_v26 = vsel %vm700_vm1, %v1936_v57, %v1937_v24  ;;  %v1940_v61 = vsel %vm700_vm1, %v1937_v24, %v1939_v49  ;;  %v1947_v25 = vrot.slane %v5727_v62, 2  ;;  %v1949_v28 = vrot.slane %v5731_v31, 2 }
 0x169   : > { %v1943_v59 = vsel %vm700_vm1, %v1941_v46, %v1942_v42  ;;  %v1951_v5 = vrot.slane %v5735_v38, 2  ;;  %v1945_v7 = vsel %vm700_vm1, %v1942_v42, %v1944_v20  ;;  %v1952_v39 = vrot.slane %v5739_v40, 2 }
 0x16a   : > { %v1954_v41 = vrot.slane %v5743_v23, 2  ;;  %v1956_v37 = vrot.slane %v5747_v43, 2  ;;  %v1948_v11 = vsel %vm700_vm1, %v1946_v50, %v1947_v25  ;;  %v1950_v12 = vsel %vm700_vm1, %v1947_v25, %v1949_v28 }
 0x16b   : > { %v1957_v17 = vrot.slane %v5751_v54, 2  ;;  %v1959_v62 = vrot.slane %v5755_v4, 2  ;;  %v1953_v31 = vsel %vm700_vm1, %v1951_v5, %v1952_v39  ;;  %v1961_v60 = vrot.slane %v5759_v58, 2 }
 0x16c   : > { %v1955_v38 = vsel %vm700_vm1, %v1952_v39, %v1954_v41  ;;  %v1962_v40 = vrot.slane %v5763_v56, 2  ;;  %v1964_v57 = vrot.slane %v5767_v48, 2  ;;  %v1966_v24 = vrot.slane %v5771_v22, 2 }
 0x16d   : > { %v1958_v23 = vsel %vm700_vm1, %v1956_v37, %v1957_v17  ;;  %v1960_v43 = vsel %vm700_vm1, %v1957_v17, %v1959_v62  ;;  %v1967_v4 = vrot.slane %v5775_v15, 2  ;;  %v1969_v49 = vrot.slane %v5779_v35, 2  ;;  %v7261_v17 = vld [vmem:[#allocation67_spill] sm:$0xff] }
 0x16e   : > { %v1963_v54 = vsel %vm700_vm1, %v1961_v60, %v1962_v40  ;;  %v1971_v46 = vrot.slane %v5783_v3, 2  ;;  %v1965_v58 = vsel %vm700_vm1, %v1962_v40, %v1964_v57  ;;  %v1972_v56 = vrot.slane %v5787_v32, 2 }
 0x16f   : > { %v1974_v42 = vrot.slane %v5791_v19, 2  ;;  %v1976_v20 = vrot.slane %v5795_v13, 2  ;;  %v1968_v48 = vsel %vm700_vm1, %v1966_v24, %v1967_v4  ;;  %v1970_v22 = vsel %vm700_vm1, %v1967_v4, %v1969_v49 }
 0x170   : > { %v1977_v50 = vrot.slane %v5799_v45, 2  ;;  %v1979_v15 = vrot.slane %v5803_v63, 2  ;;  %v1973_v35 = vsel %vm700_vm1, %v1971_v46, %v1972_v56  ;;  %v1981_v25 = vrot.slane %v5807_v29, 2 }
 0x171   : > { %v1975_v3 = vsel %vm700_vm1, %v1972_v56, %v1974_v42  ;;  %v1982_v32 = vrot.slane %v5811_v36, 2  ;;  %v1984_v28 = vrot.slane %v5815_v0, 2  ;;  %v1986_v5 = vrot.slane %v5819_v18, 2 }
 0x172   : > { %v1978_v19 = vsel %vm700_vm1, %v1976_v20, %v1977_v50  ;;  %v1980_v13 = vsel %vm700_vm1, %v1977_v50, %v1979_v15  ;;  %v1987_v63 = vrot.slane %v5823_v9, 2  ;;  %v1989_v39 = vrot.slane %v5827_v51, 2  ;;  %v7257_v51 = vld [vmem:[#allocation68_spill] sm:$0xff] }
 0x173   : > { %v1983_v45 = vsel %vm700_vm1, %v1981_v25, %v1982_v32  ;;  %v5923_v41 = vadd.f32 %v5836_v8, %v5574_v21  ;;  %v1985_v29 = vsel %vm700_vm1, %v1982_v32, %v1984_v28  ;;  %v5928_v36 = vadd.f32 %v5842_v55, %v5578_v10  ;;  %v7258_v55 = vld [vmem:[#allocation69_spill] sm:$0xff]  ;;  %v7280_v32 = vld [vmem:[#allocation36_spill] sm:$0xff] }
 0x174   : > { %v5932_v0 = vadd.f32 %v5845_v16, %v5584_v2  ;;  %v5936_v18 = vadd.f32 %v5848_v53, %v5588_v33  ;;  %v1988_v9 = vsel %vm700_vm1, %v1986_v5, %v1987_v63  ;;  %v1990_v21 = vsel %vm700_vm1, %v1987_v63, %v1989_v39  ;;  %v7259_v53 = vld [vmem:[#allocation74_spill] sm:$0xff]  ;;  %v7281_v5 = vld [vmem:[#allocation39_spill] sm:$0xff] }
 0x175   : > { %v5942_v8 = vadd.f32 %v5852_v1, %v5592_v34  ;;  %v5946_v10 = vadd.f32 %v5855_v47, %v5596_v52  ;;  %v5950_v2 = vadd.f32 %v5863_v44, %v5600_v30  ;;  %v5954_v33 = vadd.f32 %v5866_v6, %v7257_v51  ;;  %v7260_v34 = vld [vmem:[#allocation78_spill] sm:$0xff]  ;;  %v7262_v47 = vld [vmem:[#allocation72_spill] sm:$0xff]  ;;  %v7263_v30 = vld [vmem:[#allocation77_spill] sm:$0xff]  ;;  %2056 = vst.msk [vmem:[%s6014_s24] sm:$0xff] %vm2055_vm2, %v5923_v41 }
 0x176   : > { %v5957_v16 = vadd.f32 %v1933_v14, %v7258_v55  ;;  %v5960_v37 = vadd.f32 %v1935_v27, %v7259_v53  ;;  %v5963_v1 = vadd.f32 %v1938_v26, %v7260_v34  ;;  %v5966_v52 = vadd.f32 %v1940_v61, %v7261_v17  ;;  %v7264_v6 = vld [vmem:[#allocation11_spill] sm:$0xff]  ;;  %v7265_v14 = vld [vmem:[#allocation17_spill] sm:$0xff]  ;;  %v7266_v27 = vld [vmem:[#allocation20_spill] sm:$0xff]  ;;  %2057 = vst.msk [vmem:[%s6014_s24 + $0x8] sm:$0xff] %vm2055_vm2, %v5928_v36 }
 0x177   : > { %v5969_v62 = vadd.f32 %v1943_v59, %v7262_v47  ;;  %v5972_v44 = vadd.f32 %v1945_v7, %v7263_v30  ;;  %v5976_v60 = vadd.f32 %v1948_v11, %v7264_v6  ;;  %v5979_v40 = vadd.f32 %v1950_v12, %v7265_v14  ;;  %v7267_v26 = vld [vmem:[#allocation23_spill] sm:$0xff]  ;;  %v7268_v61 = vld [vmem:[#allocation29_spill] sm:$0xff]  ;;  %v7270_v7 = vld [vmem:[#allocation14_spill] sm:$0xff]  ;;  %2058 = vst.msk [vmem:[%s6014_s24 + $0x10] sm:$0xff] %vm2055_vm2, %v5932_v0 }
 0x178   : > { %v5982_v57 = vadd.f32 %v1953_v31, %v7266_v27  ;;  %v5985_v24 = vadd.f32 %v1955_v38, %v7267_v26  ;;  %v5988_v4 = vadd.f32 %v1958_v23, %v7268_v61  ;;  %v7269_v59 = vld [vmem:[#allocation15_spill] sm:$0xff]  ;;  %v5994_v46 = vadd.f32 %v1963_v54, %v7270_v7  ;;  %v7271_v11 = vld [vmem:[#allocation16_spill] sm:$0xff]  ;;  %v7272_v12 = vld [vmem:[#allocation18_spill] sm:$0xff]  ;;  %2059 = vst.msk [vmem:[%s6014_s24 + $0x18] sm:$0xff] %vm2055_vm2, %v5936_v18 }
 0x179   : > { %v5991_v49 = vadd.f32 %v1960_v43, %v7269_v59  ;;  %v5997_v56 = vadd.f32 %v1965_v58, %v7271_v11  ;;  %v6000_v42 = vadd.f32 %v1968_v48, %v7272_v12  ;;  %v7273_v31 = vld [vmem:[#allocation19_spill] sm:$0xff]  ;;  %v7274_v38 = vld [vmem:[#allocation21_spill] sm:$0xff]  ;;  %v7275_v23 = vld [vmem:[#allocation22_spill] sm:$0xff]  ;;  %v6029_v28 = vadd.f32 %v1988_v9, %v7280_v32  ;;  %2060 = vst.msk [vmem:[%s6014_s24 + $0x20] sm:$0xff] %vm2055_vm2, %v5942_v8 }
 0x17a   : > { %v6003_v20 = vadd.f32 %v1970_v22, %v7273_v31  ;;  %v6006_v50 = vadd.f32 %v1973_v35, %v7274_v38  ;;  %v6009_v15 = vadd.f32 %v1975_v3, %v7275_v23  ;;  %v7276_v43 = vld [vmem:[#allocation25_spill] sm:$0xff]  ;;  %v7277_v58 = vld [vmem:[#allocation26_spill] sm:$0xff]  ;;  %v7278_v22 = vld [vmem:[#allocation31_spill] sm:$0xff]  ;;  %v2091_v63 = vsel %vm2055_vm2, %v5942_v8, 0.0  ;;  %2061 = vst.msk [vmem:[%s6014_s24 + $0x28] sm:$0xff] %vm2055_vm2, %v5946_v10 }
 0x17b   : > { %v6017_v54 = vadd.f32 %v1978_v19, %v7276_v43  ;;  %v6020_v48 = vadd.f32 %v1980_v13, %v7277_v58  ;;  %v6023_v35 = vadd.f32 %v1983_v45, %v7278_v22  ;;  %v7279_v3 = vld [vmem:[#allocation35_spill] sm:$0xff]  ;;  %v6032_v19 = vadd.f32 %v1990_v21, %v7281_v5  ;;  %2062 = vst.msk [vmem:[%s6014_s24 + $0x30] sm:$0xff] %vm2055_vm2, %v5950_v2 }
 0x17c   : > { %v6026_v25 = vadd.f32 %v1985_v29, %v7279_v3  ;;  %v2088_v13 = vsel %vm2055_vm2, %v5923_v41, 0.0  ;;  %v2089_v45 = vsel %vm2055_vm2, %v5932_v0, 0.0  ;;  %2063 = vst.msk [vmem:[%s6014_s24 + $0x38] sm:$0xff] %vm2055_vm2, %v5954_v33  ;;  %2064 = vst.msk [vmem:[%s6014_s24 + $0x40] sm:$0xff] %vm2055_vm2, %v5957_v16  ;;  %v2093_v29 = vsel %vm2055_vm2, %v5950_v2, 0.0 }
 0x17d   : > { %2065 = vst.msk [vmem:[%s6014_s24 + $0x48] sm:$0xff] %vm2055_vm2, %v5960_v37  ;;  %2066 = vst.msk [vmem:[%s6014_s24 + $0x50] sm:$0xff] %vm2055_vm2, %v5963_v1  ;;  %v2090_v39 = vadd.f32 %v2089_v45, %v2088_v13  ;;  %v2095_v21 = vsel %vm2055_vm2, %v5957_v16, 0.0  ;;  %v2119_v51 = vsel %vm2055_vm2, %v5928_v36, 0.0  ;;  %v2120_v55 = vsel %vm2055_vm2, %v5936_v18, 0.0 }
 0x17e   : > { %2067 = vst.msk [vmem:[%s6014_s24 + $0x58] sm:$0xff] %vm2055_vm2, %v5966_v52  ;;  %2068 = vst.msk [vmem:[%s6014_s24 + $0x60] sm:$0xff] %vm2055_vm2, %v5969_v62  ;;  %v2121_v34 = vadd.f32 %v2120_v55, %v2119_v51  ;;  %v2122_v17 = vsel %vm2055_vm2, %v5946_v10, 0.0  ;;  %v2097_v47 = vsel %vm2055_vm2, %v5963_v1, 0.0  ;;  %v2124_v30 = vsel %vm2055_vm2, %v5954_v33, 0.0 }
 0x17f   : > { %2069 = vst.msk [vmem:[%s6014_s24 + $0x68] sm:$0xff] %vm2055_vm2, %v5972_v44  ;;  %2070 = vst.msk [vmem:[%s6014_s24 + $0x70] sm:$0xff] %vm2055_vm2, %v5976_v60  ;;  %v2092_v9 = vadd.f32 %v2091_v63, %v2090_v39  ;;  %v2099_v27 = vsel %vm2055_vm2, %v5969_v62, 0.0  ;;  %v2126_v26 = vsel %vm2055_vm2, %v5960_v37, 0.0  ;;  %v2101_v7 = vsel %vm2055_vm2, %v5976_v60, 0.0 }
 0x180   : > { %2071 = vst.msk [vmem:[%s6014_s24 + $0x78] sm:$0xff] %vm2055_vm2, %v5979_v40  ;;  %2072 = vst.msk [vmem:[%s6014_s24 + $0x80] sm:$0xff] %vm2055_vm2, %v5982_v57  ;;  %v2123_v14 = vadd.f32 %v2122_v17, %v2121_v34  ;;  %v2128_v11 = vsel %vm2055_vm2, %v5966_v52, 0.0  ;;  %v2103_v38 = vsel %vm2055_vm2, %v5982_v57, 0.0  ;;  %v2130_v23 = vsel %vm2055_vm2, %v5972_v44, 0.0 }
 0x181   : > { %2073 = vst.msk [vmem:[%s6014_s24 + $0x88] sm:$0xff] %vm2055_vm2, %v5985_v24  ;;  %2074 = vst.msk [vmem:[%s6014_s24 + $0x90] sm:$0xff] %vm2055_vm2, %v5988_v4  ;;  %v2094_v53 = vadd.f32 %v2093_v29, %v2092_v9  ;;  %v2105_v22 = vsel %vm2055_vm2, %v5988_v4, 0.0  ;;  %v2107_v3 = vsel %vm2055_vm2, %v5994_v46, 0.0  ;;  %v2132_v32 = vsel %vm2055_vm2, %v5979_v40, 0.0 }
 0x182   : > { %2075 = vst.msk [vmem:[%s6014_s24 + $0x98] sm:$0xff] %vm2055_vm2, %v5991_v49  ;;  %2076 = vst.msk [vmem:[%s6014_s24 + $0xa0] sm:$0xff] %vm2055_vm2, %v5994_v46  ;;  %v2125_v59 = vadd.f32 %v2124_v30, %v2123_v14  ;;  %v2109_v13 = vsel %vm2055_vm2, %v6000_v42, 0.0  ;;  %v2111_v45 = vsel %vm2055_vm2, %v6006_v50, 0.0  ;;  %v2113_v39 = vsel %vm2055_vm2, %v6017_v54, 0.0 }
 0x183   : > { %2077 = vst.msk [vmem:[%s6014_s24 + $0xa8] sm:$0xff] %vm2055_vm2, %v5997_v56  ;;  %2078 = vst.msk [vmem:[%s6014_s24 + $0xb0] sm:$0xff] %vm2055_vm2, %v6000_v42  ;;  %v2096_v6 = vadd.f32 %v2095_v21, %v2094_v53  ;;  %v2134_v29 = vsel %vm2055_vm2, %v5985_v24, 0.0  ;;  %v2161_v9 = vmul.f32 %v5923_v41, %v5923_v41  ;;  %v2163_v21 = vmul.f32 %v5932_v0, %v5932_v0 }
 0x184   : > { %2079 = vst.msk [vmem:[%s6014_s24 + $0xb8] sm:$0xff] %vm2055_vm2, %v6003_v20  ;;  %2080 = vst.msk [vmem:[%s6014_s24 + $0xc0] sm:$0xff] %vm2055_vm2, %v6006_v50  ;;  %v2127_v31 = vadd.f32 %v2126_v26, %v2125_v59  ;;  %v2115_v55 = vsel %vm2055_vm2, %v6023_v35, 0.0  ;;  %v2165_v34 = vmul.f32 %v5942_v8, %v5942_v8  ;;  %v2117_v17 = vsel %vm2055_vm2, %v6029_v28, 0.0 }
 0x185   : > { %2081 = vst.msk [vmem:[%s6014_s24 + $0xc8] sm:$0xff] %vm2055_vm2, %v6009_v15  ;;  %2082 = vst.msk [vmem:[%s6014_s24 + $0xd0] sm:$0xff] %vm2055_vm2, %v6017_v54  ;;  %v2098_v61 = vadd.f32 %v2097_v47, %v2096_v6  ;;  %v2136_v47 = vsel %vm2055_vm2, %v5991_v49, 0.0  ;;  %v2138_v41 = vsel %vm2055_vm2, %v5997_v56, 0.0  ;;  %v2167_v0 = vmul.f32 %v5950_v2, %v5950_v2 }
 0x186   : > { %2083 = vst.msk [vmem:[%s6014_s24 + $0xd8] sm:$0xff] %vm2055_vm2, %v6020_v48  ;;  %2084 = vst.msk [vmem:[%s6014_s24 + $0xe0] sm:$0xff] %vm2055_vm2, %v6023_v35  ;;  %v2129_v58 = vadd.f32 %v2128_v11, %v2127_v31  ;;  %v2140_v14 = vsel %vm2055_vm2, %v6003_v20, 0.0  ;;  %v2142_v8 = vsel %vm2055_vm2, %v6009_v15, 0.0  ;;  %v2169_v26 = vmul.f32 %v5957_v16, %v5957_v16 }
 0x187   : > { %2085 = vst.msk [vmem:[%s6014_s24 + $0xe8] sm:$0xff] %vm2055_vm2, %v6026_v25  ;;  %2086 = vst.msk [vmem:[%s6014_s24 + $0xf0] sm:$0xff] %vm2055_vm2, %v6029_v28  ;;  %v2100_v12 = vadd.f32 %v2099_v27, %v2098_v61  ;;  %v2144_v27 = vsel %vm2055_vm2, %v6020_v48, 0.0  ;;  %v2193_v61 = vsel %vm2055_vm2, %v2161_v9, 0.0  ;;  %v2194_v59 = vsel %vm2055_vm2, %v2163_v21, 0.0 }
 0x188   : > { %2087 = vst.msk [vmem:[%s6014_s24 + $0xf8] sm:$0xff] %vm2055_vm2, %v6032_v19  ;;  %v2131_v63 = vadd.f32 %v2130_v23, %v2129_v58  ;;  %v2195_v11 = vadd.f32 %v2194_v59, %v2193_v61  ;;  %v2146_v31 = vsel %vm2055_vm2, %v6026_v25, 0.0  ;;  %v2171_v23 = vmul.f32 %v5963_v1, %v5963_v1 }
 0x189   : > { %v2102_v43 = vadd.f32 %v2101_v7, %v2100_v12  ;;  %v2196_v12 = vsel %vm2055_vm2, %v2165_v34, 0.0  ;;  %v2198_v16 = vsel %vm2055_vm2, %v2167_v0, 0.0  ;;  %v2181_v61 = vmul.f32 %v5994_v46, %v5994_v46 }
 0x18a   : > { %v2133_v53 = vadd.f32 %v2132_v32, %v2131_v63  ;;  %v2166_v32 = vmul.f32 %v5946_v10, %v5946_v10  ;;  %v2175_v10 = vmul.f32 %v5976_v60, %v5976_v60  ;;  %v2202_v9 = vsel %vm2055_vm2, %v2171_v23, 0.0 }
 0x18b   : > { %v2104_v5 = vadd.f32 %v2103_v38, %v2102_v43  ;;  %v2162_v38 = vmul.f32 %v5928_v36, %v5928_v36  ;;  %v2173_v36 = vmul.f32 %v5969_v62, %v5969_v62  ;;  %v2178_v46 = vmul.f32 %v5985_v24, %v5985_v24 }
 0x18c   : > { %v2135_v6 = vadd.f32 %v2134_v29, %v2133_v53  ;;  %v2177_v53 = vmul.f32 %v5982_v57, %v5982_v57  ;;  %v2187_v24 = vmul.f32 %v6017_v54, %v6017_v54  ;;  %v2189_v54 = vmul.f32 %v6023_v35, %v6023_v35 }
 0x18d   : > { %v2106_v51 = vadd.f32 %v2105_v22, %v2104_v5  ;;  %v2164_v22 = vmul.f32 %v5936_v18, %v5936_v18  ;;  %v2168_v5 = vmul.f32 %v5954_v33, %v5954_v33  ;;  %v2172_v18 = vmul.f32 %v5966_v52, %v5966_v52 }
 0x18e   : > { %v2137_v2 = vadd.f32 %v2136_v47, %v2135_v6  ;;  %v2224_v33 = vsel %vm2055_vm2, %v2162_v38, 0.0  ;;  %v2227_v52 = vsel %vm2055_vm2, %v2166_v32, 0.0  ;;  %v2206_v6 = vsel %vm2055_vm2, %v2175_v10, 0.0 }
 0x18f   : > { %v2108_v30 = vadd.f32 %v2107_v3, %v2106_v51  ;;  %v2197_v3 = vadd.f32 %v2196_v12, %v2195_v11  ;;  %v2229_v0 = vsel %vm2055_vm2, %v2168_v5, 0.0  ;;  %v2208_v59 = vsel %vm2055_vm2, %v2177_v53, 0.0 }
 0x190   : > { %v2139_v58 = vadd.f32 %v2138_v41, %v2137_v2  ;;  %v2233_v12 = vsel %vm2055_vm2, %v2172_v18, 0.0  ;;  %v2184_v10 = vmul.f32 %v6003_v20, %v6003_v20  ;;  %v2188_v20 = vmul.f32 %v6020_v48, %v6020_v48 }
 0x191   : > { %v2110_v7 = vadd.f32 %v2109_v13, %v2108_v30  ;;  %v2200_v13 = vsel %vm2055_vm2, %v2169_v26, 0.0  ;;  %v2199_v29 = vadd.f32 %v2198_v16, %v2197_v3  ;;  %v2179_v30 = vmul.f32 %v5988_v4, %v5988_v4 }
 0x192   : > { %v2141_v63 = vadd.f32 %v2140_v14, %v2139_v58  ;;  %v2185_v58 = vmul.f32 %v6006_v50, %v6006_v50  ;;  %v2182_v50 = vmul.f32 %v5997_v56, %v5997_v56  ;;  %v2218_v56 = vsel %vm2055_vm2, %v2187_v24, 0.0 }
 0x193   : > { %v2112_v43 = vadd.f32 %v2111_v45, %v2110_v7  ;;  %v2170_v45 = vmul.f32 %v5960_v37, %v5960_v37  ;;  %v2201_v51 = vadd.f32 %v2200_v13, %v2199_v29  ;;  %v2204_v37 = vsel %vm2055_vm2, %v2173_v36, 0.0 }
 0x194   : > { %v2143_v62 = vadd.f32 %v2142_v8, %v2141_v63  ;;  %v2174_v8 = vmul.f32 %v5972_v44, %v5972_v44  ;;  %v2183_v44 = vmul.f32 %v6000_v42, %v6000_v42  ;;  %v2180_v42 = vmul.f32 %v5991_v49, %v5991_v49 }
 0x195   : > { %v2114_v1 = vadd.f32 %v2113_v39, %v2112_v43  ;;  %v2225_v39 = vsel %vm2055_vm2, %v2164_v22, 0.0  ;;  %v2203_v60 = vadd.f32 %v2202_v9, %v2201_v51  ;;  %v2212_v22 = vsel %vm2055_vm2, %v2181_v61, 0.0 }
 0x196   : > { %v2226_v34 = vadd.f32 %v2225_v39, %v2224_v33  ;;  %v2145_v41 = vadd.f32 %v2144_v27, %v2143_v62  ;;  %v2176_v27 = vmul.f32 %v5979_v40, %v5979_v40  ;;  %v2235_v16 = vsel %vm2055_vm2, %v2174_v8, 0.0 }
 0x197   : > { %v2116_v21 = vadd.f32 %v2115_v55, %v2114_v1  ;;  %v2148_v55 = vsel %vm2055_vm2, %v6032_v19, 0.0  ;;  %v2205_v26 = vadd.f32 %v2204_v37, %v2203_v60  ;;  %v2214_v13 = vsel %vm2055_vm2, %v2183_v44, 0.0 }
 0x198   : > { %v2228_v14 = vadd.f32 %v2227_v52, %v2226_v34  ;;  %v2147_v57 = vadd.f32 %v2146_v31, %v2145_v41  ;;  %v2210_v31 = vsel %vm2055_vm2, %v2179_v30, 0.0  ;;  %v2237_v5 = vsel %vm2055_vm2, %v2176_v27, 0.0 }
 0x199   : > { %v2118_v47 = vadd.f32 %v2117_v17, %v2116_v21  ;;  %v2231_v17 = vsel %vm2055_vm2, %v2170_v45, 0.0  ;;  %v2207_v11 = vadd.f32 %v2206_v6, %v2205_v26  ;;  %v2239_v45 = vsel %vm2055_vm2, %v2178_v46, 0.0 }
 0x19a   : > { %v2230_v7 = vadd.f32 %v2229_v0, %v2228_v14  ;;  %v2149_v4 = vadd.f32 %v2148_v55, %v2147_v57  ;;  %v2216_v29 = vsel %vm2055_vm2, %v2185_v58, 0.0  ;;  %v2241_v33 = vsel %vm2055_vm2, %v2180_v42, 0.0 }
 0x19b   : > { %v2150_v2 = vsel %vm2055_vm2, %v2118_v47, 0.0  ;;  %v2209_v23 = vadd.f32 %v2208_v59, %v2207_v11  ;;  %v2186_v51 = vmul.f32 %v6009_v15, %v6009_v15  ;;  %v2243_v53 = vsel %vm2055_vm2, %v2182_v50, 0.0 }
 0x19c   : > { %v2232_v38 = vadd.f32 %v2231_v17, %v2230_v7  ;;  %v2151_v40 = vsel %vm2055_vm2, %v2149_v4, 0.0  ;;  %v2191_v34 = vmul.f32 %v6029_v28, %v6029_v28  ;;  %v2220_v47 = vsel %vm2055_vm2, %v2189_v54, 0.0 }
 0x19d   : > { %v2152_v43 = vadd.f32 %v2151_v40, %v2150_v2  ;;  %v2211_v32 = vadd.f32 %v2210_v31, %v2209_v23  ;;  %v2245_v41 = vsel %vm2055_vm2, %v2184_v10, 0.0  ;;  %v2190_v48 = vmul.f32 %v6026_v25, %v6026_v25 }
 0x19e   : > { %v2234_v3 = vadd.f32 %v2233_v12, %v2232_v38  ;;  %v2247_v28 = vsel %vm2055_vm2, %v2186_v51, 0.0  ;;  %v2192_v6 = vmul.f32 %v6032_v19, %v6032_v19  ;;  %v2222_v14 = vsel %vm2055_vm2, %v2191_v34, 0.0 }
 0x19f   : > { %v2153_v36 = vrot.slane %v2152_v43, 4  ;;  %v2213_v63 = vadd.f32 %v2212_v22, %v2211_v32  ;;  %v2249_v57 = vsel %vm2055_vm2, %v2188_v20, 0.0  ;;  %v2251_v8 = vsel %vm2055_vm2, %v2190_v48, 0.0 }
 0x1a0   : > { %v2236_v1 = vadd.f32 %v2235_v16, %v2234_v3 }
 0x1a1   : > { %v2154_v49 = vadd.f32 %v2153_v36, %v2152_v43  ;;  %v2215_v9 = vadd.f32 %v2214_v13, %v2213_v63 }
 0x1a2   : > { %v2238_v18 = vadd.f32 %v2237_v5, %v2236_v1 }
 0x1a3   : > { %v2155_v21 = vrot.slane %v2154_v49, 2  ;;  %v2217_v39 = vadd.f32 %v2216_v29, %v2215_v9 }
 0x1a4   : > { %v2240_v62 = vadd.f32 %v2239_v45, %v2238_v18 }
 0x1a5   : > { %v2156_v37 = vadd.f32 %v2155_v21, %v2154_v49  ;;  %v2219_v52 = vadd.f32 %v2218_v56, %v2217_v39 }
 0x1a6   : > { %v2242_v35 = vadd.f32 %v2241_v33, %v2240_v62 }
 0x1a7   : > { %v2157_v15 = vrot.slane %v2156_v37, 1  ;;  %v2221_v55 = vadd.f32 %v2220_v47, %v2219_v52 }
 0x1a8   : > { %v2244_v60 = vadd.f32 %v2243_v53, %v2242_v35 }
 0x1a9   : > { %v2158_v0 = vadd.f32 %v2157_v15, %v2156_v37 }
 0x1aa   : > { %v2246_v30 = vadd.f32 %v2245_v41, %v2244_v60 }
 0x1ab   : > { %2160 = vst.msk [vmem:[%s242_s29] sm:$0x1] %vm2159_vm3, %v2158_v0 }
 0x1ac   : > { %v2248_v25 = vadd.f32 %v2247_v28, %v2246_v30 }
 0x1ad   : > { %2676 = shalt.err (!%p2673_p5)
}
 0x1ae   : > { %s2677_s14 = scalar_lea.hbm %s6298_s8, 16  ;;  %s2681_s24 = scalar_lea.hbm %s6389_s3, 32 }
 0x1af   : > { %p2678_p6 = scmp.ne.s32.totalorder %s6298_s8, %s2677_s14  ;;  %p2682_p10 = scmp.lt.u32.totalorder %s6298_s8, %s6389_s3 }
 0x1b0   : > { %p2683_p11 = scmp.lt.u32.totalorder %s2681_s24, %s2677_s14  ;;  %p2685_p13 = scmp.lt.u32.totalorder %s2677_s14, %s6298_s8 }
 0x1b1   : > { %p2679_p7 = pnand %p2678_p6, %p2842_p4 }
 0x1b2   : > { %p2684_p12 = por %p2683_p11, %p2682_p10 }
 0x1b3   : > { %p2680_p9 = pneg %p2679_p7 }
 0x1b4   : > { %p2686_p0 = por %p2685_p13, %p2684_p12 }
 0x1b6   : > { %p2687_p1 = pnand %p2686_p0, %p2680_p9 }
 0x1b8   : > { %2690 = shalt.err (!%p2687_p1)
}
 0x1b9   : > { %2570 = dma.vmem_to_hbm [thread:$0]  (%p2842_p4), %s6288_s30, 16, %s6298_s8, %s2274_s9   ;;  %v2223_v19 = vadd.f32 %v2222_v14, %v2221_v55  ;;  %v2250_v26 = vadd.f32 %v2249_v57, %v2248_v25  ;;  %v2253_v17 = vsel %vm2055_vm2, %v2192_v6, 0.0 }
 0x1ba   : > { %s248_s7 = scalar_lea.vmem [#allocation4], %s6262_s26  ;;  %s6339_s10 = scalar_lea.hbm %s6390_s4, %s2564_s5 }
 0x1bb   : > { %v2252_v27 = vadd.f32 %v2251_v8, %v2250_v26  ;;  %v2255_v59 = vsel %vm2055_vm2, %v2223_v19, 0.0  ;;  %s2308_s30 = sshll.u32 %s248_s7, 4  ;;  %s2278_s11 = scalar_lea.sflag [#allocation5], %s6262_s26  ;;  %s6332_s30 = int_to_ptr.vmem [resolvable:$true] %s2308_s30 }
 0x1bc   : > { %s2691_s12 = scalar_lea.vmem %s6332_s30, 16  ;;  %s2776_s13 = smov [#allocation4]  }
 0x1bd   : > { %v2254_v61 = vadd.f32 %v2253_v17, %v2252_v27  ;;  %p2692_p2 = scmp.ne.s32.totalorder %s6332_s30, %s2691_s12  ;;  %s2695_s14 = sshll.u32 %s2776_s13, 4  ;;  %s2696_s14 = int_to_ptr.vmem [resolvable:$false] %s2695_s14 }
 0x1be   : > { %s2697_s21 = scalar_lea.vmem %s2696_s14, 32  ;;  %p2698_p6 = scmp.lt.s32.totalorder %s6332_s30, %s2696_s14 }
 0x1bf   : > { %v2256_v7 = vsel %vm2055_vm2, %v2254_v61, 0.0  ;;  %p2693_p3 = pnand %p2692_p2, %p2842_p4  ;;  %p2699_p7 = scmp.lt.s32.totalorder %s2697_s21, %s2691_s12 }
 0x1c0   : > { %v2257_v4 = vadd.f32 %v2256_v7, %v2255_v59 }
 0x1c1   : > { %p2694_p5 = pneg %p2693_p3  ;;  %p2700_p9 = por %p2699_p7, %p2698_p6 }
 0x1c2   : > { %v2258_v2 = vrot.slane %v2257_v4, 4 }
 0x1c3   : > { %p2701_p10 = pnand %p2700_p9, %p2694_p5 }
 0x1c4   : > { %v2259_v11 = vadd.f32 %v2258_v2, %v2257_v4 }
 0x1c6   : > { %v2260_v12 = vrot.slane %v2259_v11, 2 }
 0x1c8   : > { %v2261_v44 = vadd.f32 %v2260_v12, %v2259_v11 }
 0x1ca   : > { %v2262_v31 = vrot.slane %v2261_v44, 1 }
 0x1cc   : > { %v2263_v38 = vadd.f32 %v2262_v31, %v2261_v44 }
 0x1ce   : > { %2264 = vst.msk [vmem:[%s248_s7] sm:$0x1] %vm2159_vm3, %v2263_v38 }
 0x1cf   : > { %2704 = shalt.err (!%p2701_p10)
}
 0x1d0   : > { %s2705_s18 = scalar_lea.hbm %s6339_s10, 16  ;;  %s2709_s22 = scalar_lea.hbm %s6390_s4, 32 }
 0x1d1   : > { %p2706_p11 = scmp.ne.s32.totalorder %s6339_s10, %s2705_s18  ;;  %p2710_p0 = scmp.lt.u32.totalorder %s6339_s10, %s6390_s4 }
 0x1d2   : > { %p2711_p1 = scmp.lt.u32.totalorder %s2709_s22, %s2705_s18  ;;  %p2713_p3 = scmp.lt.u32.totalorder %s2705_s18, %s6339_s10 }
 0x1d3   : > { %p2707_p12 = pnand %p2706_p11, %p2842_p4 }
 0x1d4   : > { %p2712_p2 = por %p2711_p1, %p2710_p0 }
 0x1d5   : > { %p2708_p13 = pneg %p2707_p12 }
 0x1d6   : > { %p2714_p5 = por %p2713_p3, %p2712_p2 }
 0x1d8   : > { %p2715_p6 = pnand %p2714_p5, %p2708_p13 }
 0x1da   : > { %2718 = shalt.err (!%p2715_p6)
}
 0x1db   : > { %2571 = dma.vmem_to_hbm [thread:$0]  (%p2842_p4), %s6332_s30, 16, %s6339_s10, %s2278_s11  }
 0x1dc PF: > { %p2581_p7 = scmp.ge.s32.totalorder %s2773_s20, 2  ;;  %s2331_s6 = sand.u32 1, %s2753_s15  }
 0x1dd   : > { %s2332_s7 = scalar_lea.sflag [#allocation3], %s2331_s6 }
 0x1de   : > { %p2575_p9 = pnand %p2581_p7, %p2849_p8 }
 0x1e0   : > { %2744 = dma.done.wait (!%p2575_p9), %s2332_s7, 16  }
 0x1e1   : > { %2746 = vsyncadd (!%p2575_p9), %s2332_s7, 4294967280  ;;  %s2340_s8 = scalar_lea.sflag [#allocation5], %s2331_s6 }
 0x1e2   : > { %2748 = dma.done.wait (!%p2575_p9), %s2340_s8, 16  }
 0x1e3   : > { %2750 = vsyncadd (!%p2575_p9), %s2340_s8, 4294967280  ;;  %s21_s20 = sadd.s32 1, %s2773_s20   ;;  %s7282_s15 = smov %s2757_s16 }
 0x1e4   : > { %p18_p10 = scmp.ge.s32.totalorder %s21_s20, 4   ;;  %s7283_s16 = smov %s2761_s17 }
 0x1e5   : > { %s7284_s17 = smov %s2855_s28  ;;  %s7285_s18 = smov %s2769_s19 }
 0x1e6   : > { %s7286_s19 = smov %s7288_s23  ;;  %20 = sbr.rel (!%p18_p10) target bundleno = 6 (0x6), region = 97 }
 0x1ed   :  { %2344 = vsyncpa [#allocation3], 1 }
 0x1ee   :  { %2346 = vsyncpa [#allocation3 + $0x1], 1 }
 0x1ef   :  { %2347 = vsyncpa [#allocation5], 1 }
 0x1f0   :  { %2349 = vsyncpa [#allocation5 + $0x1], 1 }

</bundles_post_ra>
